<compile_context>
chip_gen: v7x
topology: tpu7x:2x2x1
jax: 0.10.0
libtpu: 0.0.40
codegen_flags: <defaults>
</compile_context>

<pallas_src>
import jax
import jax.numpy as jnp
from jax.experimental import pallas as pl
from jax.experimental.pallas import tpu as pltpu

D_IN = 3 * 32 * 32   # 3072
H1 = 512
H2 = 256
TM = 128             # batch-tile rows (safe on v5e/v6e/v7x)
LANE = 128           # lane-dense output width


def mlp_kernel(x_ref, w1_ref, b1_ref, w2_ref, b2_ref, w3_ref, b3_ref, o_ref):
    # Layer 1: (TM, 3072) @ (3072, 512) + b1, ReLU   (bf16 inputs, f32 accumulate)
    h1 = jnp.dot(x_ref[...], w1_ref[...], preferred_element_type=jnp.float32)
    h1 = jnp.maximum(h1 + b1_ref[...], 0.0).astype(jnp.bfloat16)
    # Layer 2: (TM, 512) @ (512, 256) + b2, ReLU
    h2 = jnp.dot(h1, w2_ref[...], preferred_element_type=jnp.float32)
    h2 = jnp.maximum(h2 + b2_ref[...], 0.0).astype(jnp.bfloat16)
    # Layer 3: (TM, 256) @ (256, 128-padded-classes) + b3 (no activation)
    out = jnp.dot(h2, w3_ref[...], preferred_element_type=jnp.float32)
    o_ref[...] = (out + b3_ref[...]).astype(o_ref.dtype)


def mlp_forward(x_nchw, params):
    w1, b1, w2, b2, w3, b3 = params
    num_classes = w3.shape[1]
    B = x_nchw.shape[0]

    # Same semantics as torch x.view(-1, 3*32*32) on contiguous NCHW input.
    x = x_nchw.reshape(B, D_IN).astype(jnp.float32)

    # Pad batch to a multiple of TM (clean (8,128)/MXU tiling, pipelined grid).
    Bp = pl.cdiv(B, TM) * TM
    if Bp != B:
        x = jnp.pad(x, ((0, Bp - B), (0, 0)))

    # Pad the class dimension to a lane-dense multiple of 128.
    Cp = max(LANE, pl.cdiv(num_classes, LANE) * LANE)
    w3p = jnp.pad(w3, ((0, 0), (0, Cp - num_classes)))
    b3p = jnp.pad(b3, ((0, 0), (0, Cp - num_classes)))

    # bf16 activations/weights (HBM traffic dominated by weight streaming), f32 biases.
    xb = x.astype(jnp.bfloat16)
    w1b = w1.astype(jnp.bfloat16)
    w2b = w2.astype(jnp.bfloat16)
    w3b = w3p.astype(jnp.bfloat16)
    b1f = b1.astype(jnp.float32)
    b2f = b2.astype(jnp.float32)
    b3f = b3p.astype(jnp.float32)

    grid = (Bp // TM,)

    # Weights/biases: full-array blocks, constant block index -> VMEM-resident.
    resident = lambda shape: pl.BlockSpec(shape, lambda i: tuple(0 for _ in shape))

    flops = 2 * Bp * (D_IN * H1 + H1 * H2 + H2 * Cp)
    bytes_accessed = (
        xb.size * 2
        + w1b.size * 2 + w2b.size * 2 + w3b.size * 2
        + b1f.size * 4 + b2f.size * 4 + b3f.size * 4
        + Bp * Cp * 4
    )

    out = pl.pallas_call(
        mlp_kernel,
        out_shape=jax.ShapeDtypeStruct((Bp, Cp), jnp.float32),
        grid_spec=pltpu.PrefetchScalarGridSpec(
            num_scalar_prefetch=0,
            grid=grid,
            in_specs=[
                pl.BlockSpec((TM, D_IN), lambda i: (i, 0)),   # x tile per grid step
                resident(w1b.shape), resident(b1f.shape),
                resident(w2b.shape), resident(b2f.shape),
                resident(w3b.shape), resident(b3f.shape),
            ],
            out_specs=pl.BlockSpec((TM, Cp), lambda i: (i, 0)),
        ),
        compiler_params=pltpu.CompilerParams(
            dimension_semantics=("parallel",),   # v7x: shard batch tiles across 2 TCs
            vmem_limit_bytes=48 << 20,           # > v5e 16 MiB default, < v7x 64 MiB phys
        ),
        cost_estimate=pl.CostEstimate(
            flops=flops, transcendentals=0, bytes_accessed=bytes_accessed
        ),
    )(xb, w1b, b1f, w2b, b2f, w3b, b3f)

    return out[:B, :num_classes]


def init_params(key, num_classes=10):
    # Deterministic synthetic init (shapes match the PyTorch module, weights stored
    # as (in_features, out_features) = transpose of nn.Linear's (out, in)).
    k1, k2, k3, k4, k5, k6 = jax.random.split(key, 6)

    def lin(kw, kb, fan_in, fan_out):
        bound = 1.0 / jnp.sqrt(fan_in)
        w = jax.random.uniform(kw, (fan_in, fan_out), jnp.float32, -bound, bound)
        b = jax.random.uniform(kb, (1, fan_out), jnp.float32, -bound, bound)
        return w, b

    w1, b1 = lin(k1, k2, D_IN, H1)
    w2, b2 = lin(k3, k4, H1, H2)
    w3, b3 = lin(k5, k6, H2, num_classes)
    return (w1, b1, w2, b2, w3, b3)


def mlp_reference_bf16(x_nchw, params):
    # Pure-JAX reference using the same bf16-weight / f32-accumulate recipe.
    w1, b1, w2, b2, w3, b3 = params
    x = x_nchw.reshape(x_nchw.shape[0], -1).astype(jnp.bfloat16)
    h1 = jnp.dot(x, w1.astype(jnp.bfloat16), preferred_element_type=jnp.float32) + b1
    h1 = jnp.maximum(h1, 0.0).astype(jnp.bfloat16)
    h2 = jnp.dot(h1, w2.astype(jnp.bfloat16), preferred_element_type=jnp.float32) + b2
    h2 = jnp.maximum(h2, 0.0).astype(jnp.bfloat16)
    return jnp.dot(h2, w3.astype(jnp.bfloat16), preferred_element_type=jnp.float32) + b3


def mlp_reference_f32(x_nchw, params):
    w1, b1, w2, b2, w3, b3 = params
    x = x_nchw.reshape(x_nchw.shape[0], -1).astype(jnp.float32)
    h1 = jnp.maximum(x @ w1 + b1, 0.0)
    h2 = jnp.maximum(h1 @ w2 + b2, 0.0)
    return h2 @ w3 + b3


if __name__ == "__main__":
    key = jax.random.PRNGKey(0)
    kx, kp = jax.random.split(key)
    x = jax.random.normal(kx, (2, 3, 32, 32), jnp.float32)  # NCHW like PyTorch
    params = init_params(kp, num_classes=10)

    out = mlp_forward(x, params)
    jax.block_until_ready(out)

    assert out.shape == (2, 10)
    # Tight check vs a bf16-matched reference; loose check vs the pure-f32 reference.
    ref_bf16 = mlp_reference_bf16(x, params)
    ref_f32 = mlp_reference_f32(x, params)
    assert jnp.allclose(out, ref_bf16, atol=5e-3, rtol=5e-3)
    assert jnp.allclose(out, ref_f32, atol=5e-2, rtol=5e-2)
    print("KERNEL_OK")
</pallas_src>

<mosaic_0001>
module attributes {stable_mosaic.version = 11 : i64} {
  func.func @mlp_kernel(%arg0: i32, %arg1: memref<128x3072xbf16, #tpu.memory_space<vmem>>, %arg2: memref<3072x512xbf16, #tpu.memory_space<vmem>>, %arg3: memref<1x512xf32, #tpu.memory_space<vmem>>, %arg4: memref<512x256xbf16, #tpu.memory_space<vmem>>, %arg5: memref<1x256xf32, #tpu.memory_space<vmem>>, %arg6: memref<256x128xbf16, #tpu.memory_space<vmem>>, %arg7: memref<1x128xf32, #tpu.memory_space<vmem>>, %arg8: memref<128x128xf32, #tpu.memory_space<vmem>>) attributes {dimension_semantics = [#tpu.dimension_semantics<parallel>], iteration_bounds = array<i64: 1>, scalar_prefetch = 0 : i64, scratch_operands = 0 : i64, tpu.core_type = #tpu.core_type<tc>, window_params = [{transform_indices = @transform_0, window_bounds = array<i64: 128, 3072>}, {pipeline_mode = #tpu.pipeline_mode<synchronous>, transform_indices = @transform_1, window_bounds = array<i64: 3072, 512>}, {pipeline_mode = #tpu.pipeline_mode<synchronous>, transform_indices = @transform_2, window_bounds = array<i64: 1, 512>}, {pipeline_mode = #tpu.pipeline_mode<synchronous>, transform_indices = @transform_3, window_bounds = array<i64: 512, 256>}, {pipeline_mode = #tpu.pipeline_mode<synchronous>, transform_indices = @transform_4, window_bounds = array<i64: 1, 256>}, {pipeline_mode = #tpu.pipeline_mode<synchronous>, transform_indices = @transform_5, window_bounds = array<i64: 256, 128>}, {pipeline_mode = #tpu.pipeline_mode<synchronous>, transform_indices = @transform_6, window_bounds = array<i64: 1, 128>}, {transform_indices = @transform_7, window_bounds = array<i64: 128, 128>}]} {
    %c0 = arith.constant 0 : index
    %c0_0 = arith.constant 0 : index
    %0 = vector.load %arg1[%c0, %c0_0] : memref<128x3072xbf16, #tpu.memory_space<vmem>>, vector<128x3072xbf16>
    %c0_1 = arith.constant 0 : index
    %c0_2 = arith.constant 0 : index
    %1 = vector.load %arg2[%c0_1, %c0_2] : memref<3072x512xbf16, #tpu.memory_space<vmem>>, vector<3072x512xbf16>
    %cst = arith.constant dense<0.000000e+00> : vector<128x512xf32>
    %2 = tpu.matmul %0, %1, %cst {dimension_numbers = #tpu.dot_dimension_numbers<[1], [0], [0], [1], [0, 0, 1, 1], [], []>} : vector<128x3072xbf16>, vector<3072x512xbf16>, vector<128x512xf32> -> vector<128x512xf32>
    %c0_3 = arith.constant 0 : index
    %c0_4 = arith.constant 0 : index
    %3 = vector.load %arg3[%c0_3, %c0_4] : memref<1x512xf32, #tpu.memory_space<vmem>>, vector<1x512xf32>
    %4 = vector.broadcast %3 : vector<1x512xf32> to vector<128x512xf32>
    %5 = arith.addf %2, %4 : vector<128x512xf32>
    %cst_5 = arith.constant 0.000000e+00 : f32
    %6 = vector.broadcast %cst_5 : f32 to vector<128x512xf32>
    %7 = arith.maximumf %5, %6 : vector<128x512xf32>
    %8 = arith.truncf %7 : vector<128x512xf32> to vector<128x512xbf16>
    %c0_6 = arith.constant 0 : index
    %c0_7 = arith.constant 0 : index
    %9 = vector.load %arg4[%c0_6, %c0_7] : memref<512x256xbf16, #tpu.memory_space<vmem>>, vector<512x256xbf16>
    %cst_8 = arith.constant dense<0.000000e+00> : vector<128x256xf32>
    %10 = tpu.matmul %8, %9, %cst_8 {dimension_numbers = #tpu.dot_dimension_numbers<[1], [0], [0], [1], [0, 0, 1, 1], [], []>} : vector<128x512xbf16>, vector<512x256xbf16>, vector<128x256xf32> -> vector<128x256xf32>
    %c0_9 = arith.constant 0 : index
    %c0_10 = arith.constant 0 : index
    %11 = vector.load %arg5[%c0_9, %c0_10] : memref<1x256xf32, #tpu.memory_space<vmem>>, vector<1x256xf32>
    %12 = vector.broadcast %11 : vector<1x256xf32> to vector<128x256xf32>
    %13 = arith.addf %10, %12 : vector<128x256xf32>
    %cst_11 = arith.constant 0.000000e+00 : f32
    %14 = vector.broadcast %cst_11 : f32 to vector<128x256xf32>
    %15 = arith.maximumf %13, %14 : vector<128x256xf32>
    %16 = arith.truncf %15 : vector<128x256xf32> to vector<128x256xbf16>
    %c0_12 = arith.constant 0 : index
    %c0_13 = arith.constant 0 : index
    %17 = vector.load %arg6[%c0_12, %c0_13] : memref<256x128xbf16, #tpu.memory_space<vmem>>, vector<256x128xbf16>
    %cst_14 = arith.constant dense<0.000000e+00> : vector<128x128xf32>
    %18 = tpu.matmul %16, %17, %cst_14 {dimension_numbers = #tpu.dot_dimension_numbers<[1], [0], [0], [1], [0, 0, 1, 1], [], []>} : vector<128x256xbf16>, vector<256x128xbf16>, vector<128x128xf32> -> vector<128x128xf32>
    %c0_15 = arith.constant 0 : index
    %c0_16 = arith.constant 0 : index
    %19 = vector.load %arg7[%c0_15, %c0_16] : memref<1x128xf32, #tpu.memory_space<vmem>>, vector<1x128xf32>
    %20 = vector.broadcast %19 : vector<1x128xf32> to vector<128x128xf32>
    %21 = arith.addf %18, %20 : vector<128x128xf32>
    %c0_17 = arith.constant 0 : index
    %c0_18 = arith.constant 0 : index
    %22 = vector.load %arg8[%c0_17, %c0_18] : memref<128x128xf32, #tpu.memory_space<vmem>>, vector<128x128xf32>
    tpu.vector_store %arg8[%c0_17, %c0_18], %21 {strides = array<i32>} : memref<128x128xf32, #tpu.memory_space<vmem>>, vector<128x128xf32>,
    return
  }
  func.func @transform_0(%arg0: i32) -> (i32, i32) {
    %c0_i32 = arith.constant 0 : i32
    %c0_i32_0 = arith.constant 0 : i32
    return %arg0, %c0_i32 : i32, i32
  }
  func.func @transform_1(%arg0: i32) -> (i32, i32) {
    %c0_i32 = arith.constant 0 : i32
    %c0_i32_0 = arith.constant 0 : i32
    %c0_i32_1 = arith.constant 0 : i32
    return %c0_i32, %c0_i32_0 : i32, i32
  }
  func.func @transform_2(%arg0: i32) -> (i32, i32) {
    %c0_i32 = arith.constant 0 : i32
    %c0_i32_0 = arith.constant 0 : i32
    %c0_i32_1 = arith.constant 0 : i32
    return %c0_i32, %c0_i32_0 : i32, i32
  }
  func.func @transform_3(%arg0: i32) -> (i32, i32) {
    %c0_i32 = arith.constant 0 : i32
    %c0_i32_0 = arith.constant 0 : i32
    %c0_i32_1 = arith.constant 0 : i32
    return %c0_i32, %c0_i32_0 : i32, i32
  }
  func.func @transform_4(%arg0: i32) -> (i32, i32) {
    %c0_i32 = arith.constant 0 : i32
    %c0_i32_0 = arith.constant 0 : i32
    %c0_i32_1 = arith.constant 0 : i32
    return %c0_i32, %c0_i32_0 : i32, i32
  }
  func.func @transform_5(%arg0: i32) -> (i32, i32) {
    %c0_i32 = arith.constant 0 : i32
    %c0_i32_0 = arith.constant 0 : i32
    %c0_i32_1 = arith.constant 0 : i32
    return %c0_i32, %c0_i32_0 : i32, i32
  }
  func.func @transform_6(%arg0: i32) -> (i32, i32) {
    %c0_i32 = arith.constant 0 : i32
    %c0_i32_0 = arith.constant 0 : i32
    %c0_i32_1 = arith.constant 0 : i32
    return %c0_i32, %c0_i32_0 : i32, i32
  }
  func.func @transform_7(%arg0: i32) -> (i32, i32) {
    %c0_i32 = arith.constant 0 : i32
    %c0_i32_0 = arith.constant 0 : i32
    return %arg0, %c0_i32 : i32, i32
  }
}

</mosaic_0001>

<bundles_post_ra>
// kernel: tpu_custom_call.1
= control target key start
LH: loop header
LB: loop body
LE: loop exit
PB: predicated region body
PF: predicated region fallthrough
CT: control target
= control target key end

     0   :  { %12 = vsyncpa [#allocation3], 0  ;;  %s13554_s0 = inlined_call_operand.hbm [shape: bf16[128,3072], index: 0, kind: input, shape index: {}]   ;;  %s13555_s1 = inlined_call_operand.hbm [shape: bf16[3072,512], index: 1, kind: input, shape index: {}]   ;;  %s13556_s2 = inlined_call_operand.hbm [shape: f32[1,512], index: 2, kind: input, shape index: {}]   ;;  %s13557_s3 = inlined_call_operand.hbm [shape: bf16[512,256], index: 3, kind: input, shape index: {}]   ;;  %s13558_s4 = inlined_call_operand.hbm [shape: f32[1,256], index: 4, kind: input, shape index: {}]   ;;  %s13559_s5 = inlined_call_operand.hbm [shape: bf16[256,128], index: 5, kind: input, shape index: {}]   ;;  %s13560_s6 = inlined_call_operand.hbm [shape: f32[1,128], index: 6, kind: input, shape index: {}]   ;;  %s13561_s7 = inlined_call_operand.hbm [shape: f32[128,128], index: 7, kind: output, shape index: {}]  }
   0x1   :  { %13 = vsyncpa [#allocation6], 0 }
   0x2   :  { %14 = vsyncpa [#allocation9], 0 }
   0x3   :  { %15 = vsyncpa [#allocation12], 0 }
   0x4   :  { %16 = vsyncpa [#allocation4], 0  ;;  %s13080_s24 = smov [#allocation5]   ;;  %s12894_s28 = scalar_lea.hbm %s13555_s1, 98304 }
   0x5   :  { %s34_s25 = sshll.u32 %s13080_s24, 4  ;;  %p12895_p0 = scmp.ne.s32.totalorder %s13555_s1, %s12894_s28  ;;  %s35_s25 = int_to_ptr.vmem [resolvable:$true] %s34_s25 }
   0x6   :  { %p12898_p1 = scmp.lt.u32.totalorder %s12894_s28, %s13555_s1 }
   0x8   :  { %p12900_p2 = pnand %p12898_p1, %p12895_p0 }
   0xa   :  { %12903 = shalt.err (!%p12900_p2)
}
   0xb   :  { %s12904_s10 = scalar_lea.vmem %s35_s25, 98304  ;;  %p12909_p4 = scmp.lt.s32.totalorder %s35_s25, %s35_s25 }
   0xc   :  { %p12905_p3 = scmp.ne.s32.totalorder %s35_s25, %s12904_s10  ;;  %p12910_p5 = scmp.lt.s32.totalorder %s12904_s10, %s12904_s10 }
   0xe   :  { %p12911_p6 = por %p12910_p5, %p12909_p4 }
  0x10   :  { %p12912_p7 = pnand %p12911_p6, %p12905_p3 }
  0x12   :  { %12915 = shalt.err (!%p12912_p7)
}
  0x13   :  { %s13081_s11 = smov 256   ;;  %s13082_s12 = smov 16  }
  0x14   :  { %40 = dma.hbm_to_vmem [thread:$0]  %s13555_s1, 98304, %s35_s25, [#allocation6], %s13081_s11, %s13081_s11, %s13082_s12  }
  0x15   :  { %s13083_s15 = smov [#allocation8]   ;;  %s12916_s19 = scalar_lea.hbm %s13557_s3, 8192 }
  0x16   :  { %s56_s16 = sshll.u32 %s13083_s15, 4  ;;  %p12917_p8 = scmp.ne.s32.totalorder %s13557_s3, %s12916_s19  ;;  %s57_s16 = int_to_ptr.vmem [resolvable:$true] %s56_s16 }
  0x17   :  { %p12920_p9 = scmp.lt.u32.totalorder %s12916_s19, %s13557_s3 }
  0x19   :  { %p12922_p10 = pnand %p12920_p9, %p12917_p8 }
  0x1b   :  { %12925 = shalt.err (!%p12922_p10)
}
  0x1c   :  { %s12926_s24 = scalar_lea.vmem %s57_s16, 8192  ;;  %p12931_p12 = scmp.lt.s32.totalorder %s57_s16, %s57_s16 }
  0x1d   :  { %p12927_p11 = scmp.ne.s32.totalorder %s57_s16, %s12926_s24  ;;  %p12932_p13 = scmp.lt.s32.totalorder %s12926_s24, %s12926_s24 }
  0x1f   :  { %p12933_p0 = por %p12932_p13, %p12931_p12 }
  0x21   :  { %p12934_p1 = pnand %p12933_p0, %p12927_p11 }
  0x23   :  { %12937 = shalt.err (!%p12934_p1)
}
  0x24   :  { %s13084_s1 = smov 128   ;;  %s13085_s25 = smov 8  }
  0x25   :  { %62 = dma.hbm_to_vmem [thread:$0]  %s13557_s3, 8192, %s57_s16, [#allocation9], %s13084_s1, %s13084_s1, %s13085_s25  }
  0x26   :  { %s13086_s28 = smov [#allocation11]   ;;  %s12938_s9 = scalar_lea.hbm %s13559_s5, 2048 }
  0x27   :  { %s78_s29 = sshll.u32 %s13086_s28, 4  ;;  %p12939_p2 = scmp.ne.s32.totalorder %s13559_s5, %s12938_s9  ;;  %s79_s29 = int_to_ptr.vmem [resolvable:$true] %s78_s29 }
  0x28   :  { %p12942_p3 = scmp.lt.u32.totalorder %s12938_s9, %s13559_s5 }
  0x2a   :  { %p12944_p4 = pnand %p12942_p3, %p12939_p2 }
  0x2c   :  { %12947 = shalt.err (!%p12944_p4)
}
  0x2d   :  { %s12948_s14 = scalar_lea.vmem %s79_s29, 2048  ;;  %p12953_p6 = scmp.lt.s32.totalorder %s79_s29, %s79_s29 }
  0x2e   :  { %p12949_p5 = scmp.ne.s32.totalorder %s79_s29, %s12948_s14  ;;  %p12954_p7 = scmp.lt.s32.totalorder %s12948_s14, %s12948_s14 }
  0x30   :  { %p12955_p8 = por %p12954_p7, %p12953_p6 }
  0x32   :  { %p12956_p9 = pnand %p12955_p8, %p12949_p5 }
  0x34   :  { %12959 = shalt.err (!%p12956_p9)
}
  0x35   :  { %s13087_s3 = smov 64   ;;  %s13088_s15 = smov 4  }
  0x36   :  { %84 = dma.hbm_to_vmem [thread:$0]  %s13559_s5, 2048, %s79_s29, [#allocation12], %s13087_s3, %s13087_s3, %s13088_s15  }
  0x37   :  { %s13089_s18 = smov [#allocation2]   ;;  %s12960_s22 = scalar_lea.hbm %s13554_s0, 24576 }
  0x38   :  { %s22_s19 = sshll.u32 %s13089_s18, 4  ;;  %p12961_p10 = scmp.ne.s32.totalorder %s13554_s0, %s12960_s22  ;;  %s23_s19 = int_to_ptr.vmem [resolvable:$true] %s22_s19 }
  0x39   :  { %p12964_p11 = scmp.lt.u32.totalorder %s12960_s22, %s13554_s0 }
  0x3b   :  { %p12966_p12 = pnand %p12964_p11, %p12961_p10 }
  0x3d   :  { %12969 = shalt.err (!%p12966_p12)
}
  0x3e   :  { %s12970_s28 = scalar_lea.vmem %s23_s19, 24576  ;;  %p12975_p0 = scmp.lt.s32.totalorder %s23_s19, %s23_s19 }
  0x3f   :  { %p12971_p13 = scmp.ne.s32.totalorder %s23_s19, %s12970_s28  ;;  %p12976_p1 = scmp.lt.s32.totalorder %s12970_s28, %s12970_s28 }
  0x41   :  { %p12977_p2 = por %p12976_p1, %p12975_p0 }
  0x43   :  { %p12978_p3 = pnand %p12977_p2, %p12971_p13 }
  0x45   :  { %12981 = shalt.err (!%p12978_p3)
}
  0x46   :  { %s13090_s5 = smov 1536   ;;  %s13091_s29 = smov 96  }
  0x47   :  { %28 = dma.hbm_to_vmem [thread:$0]  %s13554_s0, 24576, %s23_s19, [#allocation3], %s13090_s5, %s13090_s5, %s13091_s29  }
  0x48   :  { %s13092_s9 = smov [#allocation7]   ;;  %s13093_s11 = smov [#allocation10]  }
  0x49   :  { %s47_s10 = sshll.u32 %s13092_s9, 4  ;;  %s69_s12 = sshll.u32 %s13093_s11, 4  ;;  %s48_s10 = int_to_ptr.vmem [resolvable:$true] %s47_s10  ;;  %s70_s12 = int_to_ptr.vmem [resolvable:$true] %s69_s12 }
  0x4a   :  { %s12982_s3 = scalar_lea.hbm %s13556_s2, 64 }
  0x4b   :  { %p12983_p4 = scmp.ne.s32.totalorder %s13556_s2, %s12982_s3  ;;  %p12986_p5 = scmp.lt.u32.totalorder %s12982_s3, %s13556_s2 }
  0x4d   :  { %p12988_p6 = pnand %p12986_p5, %p12983_p4 }
  0x4f   :  { %12991 = shalt.err (!%p12988_p6)
}
  0x50   :  { %s12992_s0 = scalar_lea.vmem %s48_s10, 64  ;;  %p12997_p8 = scmp.lt.s32.totalorder %s48_s10, %s48_s10 }
  0x51   :  { %p12993_p7 = scmp.ne.s32.totalorder %s48_s10, %s12992_s0  ;;  %p12998_p9 = scmp.lt.s32.totalorder %s12992_s0, %s12992_s0 }
  0x53   :  { %p12999_p10 = por %p12998_p9, %p12997_p8 }
  0x55   :  { %p13000_p11 = pnand %p12999_p10, %p12993_p7 }
  0x57   :  { %13003 = shalt.err (!%p13000_p11)
}
  0x58   :  { %50 = dma.hbm_to_vmem [thread:$0]  %s13556_s2, 64, %s48_s10, [#allocation6]  }
  0x59   :  { %s13004_s23 = scalar_lea.hbm %s13558_s4, 32 }
  0x5a   :  { %p13005_p12 = scmp.ne.s32.totalorder %s13558_s4, %s13004_s23  ;;  %p13008_p13 = scmp.lt.u32.totalorder %s13004_s23, %s13558_s4 }
  0x5c   :  { %p13010_p0 = pnand %p13008_p13, %p13005_p12 }
  0x5e   :  { %13013 = shalt.err (!%p13010_p0)
}
  0x5f   :  { %s13014_s5 = scalar_lea.vmem %s70_s12, 32  ;;  %p13019_p2 = scmp.lt.s32.totalorder %s70_s12, %s70_s12 }
  0x60   :  { %p13015_p1 = scmp.ne.s32.totalorder %s70_s12, %s13014_s5  ;;  %p13020_p3 = scmp.lt.s32.totalorder %s13014_s5, %s13014_s5 }
  0x62   :  { %p13021_p4 = por %p13020_p3, %p13019_p2 }
  0x64   :  { %p13022_p5 = pnand %p13021_p4, %p13015_p1 }
  0x66   :  { %13025 = shalt.err (!%p13022_p5)
}
  0x67   :  { %72 = dma.hbm_to_vmem [thread:$0]  %s13558_s4, 32, %s70_s12, [#allocation9]  }
  0x68   :  { %s13094_s30 = smov [#allocation13]   ;;  %s13026_s11 = scalar_lea.hbm %s13560_s6, 16 }
  0x69   :  { %s91_s8 = sshll.u32 %s13094_s30, 4  ;;  %p13027_p6 = scmp.ne.s32.totalorder %s13560_s6, %s13026_s11  ;;  %s92_s8 = int_to_ptr.vmem [resolvable:$true] %s91_s8 }
  0x6a   :  { %p13030_p7 = scmp.lt.u32.totalorder %s13026_s11, %s13560_s6 }
  0x6c   :  { %p13032_p8 = pnand %p13030_p7, %p13027_p6 }
  0x6e   :  { %13035 = shalt.err (!%p13032_p8)
}
  0x6f   :  { %s13036_s16 = scalar_lea.vmem %s92_s8, 16  ;;  %s13040_s4 = scalar_lea.vmem %s92_s8, 32 }
  0x70   :  { %p13037_p9 = scmp.ne.s32.totalorder %s92_s8, %s13036_s16  ;;  %p13041_p10 = scmp.lt.s32.totalorder %s92_s8, %s92_s8 }
  0x71   :  { %p13042_p11 = scmp.lt.s32.totalorder %s13040_s4, %s13036_s16 }
  0x73   :  { %p13043_p12 = por %p13042_p11, %p13041_p10 }
  0x75   :  { %p13044_p13 = pnand %p13043_p12, %p13037_p9 }
  0x77   :  { %13047 = shalt.err (!%p13044_p13)
}
  0x78   :  { %94 = dma.hbm_to_vmem [thread:$0]  %s13560_s6, 16, %s92_s8, [#allocation12]  }
  0x79   :  { %13070 = dma.done.wait [#allocation3], 24576  }
  0x7a   :  { %13071 = vsyncadd [#allocation3], 4294942720 }
  0x7b   :  { %13072 = dma.done.wait [#allocation6], 98368  }
  0x7c   :  { %13073 = vsyncadd [#allocation6], 4294868928 }
  0x7d   :  { %13074 = dma.done.wait [#allocation9], 8224  }
  0x7e   :  { %13075 = vsyncadd [#allocation9], 4294959072 }
  0x7f   :  { %13076 = dma.done.wait [#allocation12], 2064  }
  0x80   :  { %13077 = vsyncadd [#allocation12], 4294965232  ;;  %v11630_v0 = vld [vmem:[#allocation5 + $0x4] ss:$16 sps:$4 sm:$0xff]   ;;  %v11632_v1 = vld [vmem:[#allocation5 + $0xc] ss:$16 sps:$4 sm:$0xff]  }
  0x81   :  { %5899 = vmatprep.subr.bf16.mxu0 %v11630_v0  ;;  %v11634_v2 = vld [vmem:[#allocation5] ss:$16 sps:$4 sm:$0xff]   ;;  %v11635_v3 = vld [vmem:[#allocation5 + $0x8] ss:$16 sps:$4 sm:$0xff]   ;;  %7255 = vmatprep.subr.bf16.mxu1 %v11632_v1  ;;  %v11636_v4 = vld [vmem:[#allocation5 + $0x24] ss:$16 sps:$4 sm:$0xff]  }
  0x82   :  { %5900 = vmatpush1.bf16.msra.mxu0 %v11634_v2  ;;  %7256 = vmatpush1.bf16.msra.mxu1 %v11635_v3  ;;  %v11638_v5 = vld [vmem:[#allocation5 + $0x2c] ss:$16 sps:$4 sm:$0xff]   ;;  %v11640_v6 = vld [vmem:[#allocation5 + $0x20] ss:$16 sps:$4 sm:$0xff]   ;;  %v11641_v7 = vld [vmem:[#allocation5 + $0x28] ss:$16 sps:$4 sm:$0xff]  }
  0x83   :  { %5901 = vmatprep.subr.bf16.mxu0 %v11636_v4  ;;  %7257 = vmatprep.subr.bf16.mxu1 %v11638_v5  ;;  %v11642_v8 = vld [vmem:[#allocation5 + $0x44] ss:$16 sps:$4 sm:$0xff]   ;;  %v11644_v9 = vld [vmem:[#allocation5 + $0x4c] ss:$16 sps:$4 sm:$0xff]   ;;  %v11646_v10 = vld [vmem:[#allocation5 + $0x40] ss:$16 sps:$4 sm:$0xff]  }
  0x84   :  { %v11647_v11 = vld [vmem:[#allocation5 + $0x48] ss:$16 sps:$4 sm:$0xff]   ;;  %v11648_v12 = vld [vmem:[#allocation5 + $0x64] ss:$16 sps:$4 sm:$0xff]   ;;  %v11650_v13 = vld [vmem:[#allocation5 + $0x6c] ss:$16 sps:$4 sm:$0xff]  }
  0x85   :  { %v11652_v14 = vld [vmem:[#allocation5 + $0x60] ss:$16 sps:$4 sm:$0xff]   ;;  %v11653_v15 = vld [vmem:[#allocation5 + $0x68] ss:$16 sps:$4 sm:$0xff]   ;;  %v11654_v16 = vld [vmem:[#allocation5 + $0x84] ss:$16 sps:$4 sm:$0xff]  }
  0x86   :  { %5902 = vmatpush1.bf16.msra.mxu0 %v11640_v6  ;;  %7258 = vmatpush1.bf16.msra.mxu1 %v11641_v7  ;;  %v11656_v17 = vld [vmem:[#allocation5 + $0x8c] ss:$16 sps:$4 sm:$0xff]   ;;  %v11658_v18 = vld [vmem:[#allocation5 + $0x80] ss:$16 sps:$4 sm:$0xff]   ;;  %v11659_v19 = vld [vmem:[#allocation5 + $0x88] ss:$16 sps:$4 sm:$0xff]  }
  0x87   :  { %5903 = vmatprep.subr.bf16.mxu0 %v11642_v8  ;;  %7259 = vmatprep.subr.bf16.mxu1 %v11644_v9  ;;  %v11660_v20 = vld [vmem:[#allocation5 + $0xa4] ss:$16 sps:$4 sm:$0xff]   ;;  %v11662_v21 = vld [vmem:[#allocation5 + $0xac] ss:$16 sps:$4 sm:$0xff]   ;;  %v11664_v22 = vld [vmem:[#allocation5 + $0xa0] ss:$16 sps:$4 sm:$0xff]  }
  0x88   :  { %v11665_v23 = vld [vmem:[#allocation5 + $0xa8] ss:$16 sps:$4 sm:$0xff]   ;;  %v11666_v24 = vld [vmem:[#allocation5 + $0xc4] ss:$16 sps:$4 sm:$0xff]   ;;  %v11668_v25 = vld [vmem:[#allocation5 + $0xcc] ss:$16 sps:$4 sm:$0xff]  }
  0x89   :  { %v11670_v26 = vld [vmem:[#allocation5 + $0xc0] ss:$16 sps:$4 sm:$0xff]   ;;  %v11671_v27 = vld [vmem:[#allocation5 + $0xc8] ss:$16 sps:$4 sm:$0xff]   ;;  %v11672_v28 = vld [vmem:[#allocation5 + $0xe4] ss:$16 sps:$4 sm:$0xff]  }
  0x8a   :  { %5904 = vmatpush1.bf16.msra.mxu0 %v11646_v10  ;;  %7260 = vmatpush1.bf16.msra.mxu1 %v11647_v11  ;;  %v11674_v29 = vld [vmem:[#allocation5 + $0xec] ss:$16 sps:$4 sm:$0xff]   ;;  %v11676_v30 = vld [vmem:[#allocation5 + $0xe0] ss:$16 sps:$4 sm:$0xff]   ;;  %v11677_v31 = vld [vmem:[#allocation5 + $0xe8] ss:$16 sps:$4 sm:$0xff]  }
  0x8b   :  { %5905 = vmatprep.subr.bf16.mxu0 %v11648_v12  ;;  %7261 = vmatprep.subr.bf16.mxu1 %v11650_v13  ;;  %v11678_v32 = vld [vmem:[#allocation5 + $0x104] ss:$16 sps:$4 sm:$0xff]   ;;  %v11680_v33 = vld [vmem:[#allocation5 + $0x10c] ss:$16 sps:$4 sm:$0xff]   ;;  %v11682_v34 = vld [vmem:[#allocation5 + $0x100] ss:$16 sps:$4 sm:$0xff]  }
  0x8c   :  { %v11683_v35 = vld [vmem:[#allocation5 + $0x108] ss:$16 sps:$4 sm:$0xff]   ;;  %v11684_v36 = vld [vmem:[#allocation5 + $0x124] ss:$16 sps:$4 sm:$0xff]   ;;  %v11686_v37 = vld [vmem:[#allocation5 + $0x12c] ss:$16 sps:$4 sm:$0xff]  }
  0x8d   :  { %v11688_v38 = vld [vmem:[#allocation5 + $0x120] ss:$16 sps:$4 sm:$0xff]   ;;  %v11689_v39 = vld [vmem:[#allocation5 + $0x128] ss:$16 sps:$4 sm:$0xff]   ;;  %v11690_v40 = vld [vmem:[#allocation5 + $0x144] ss:$16 sps:$4 sm:$0xff]  }
  0x8e   :  { %5906 = vmatpush1.bf16.msra.mxu0 %v11652_v14  ;;  %7262 = vmatpush1.bf16.msra.mxu1 %v11653_v15  ;;  %v11692_v41 = vld [vmem:[#allocation5 + $0x14c] ss:$16 sps:$4 sm:$0xff]   ;;  %v11694_v42 = vld [vmem:[#allocation5 + $0x140] ss:$16 sps:$4 sm:$0xff]   ;;  %v11695_v43 = vld [vmem:[#allocation5 + $0x148] ss:$16 sps:$4 sm:$0xff]  }
  0x8f   :  { %5907 = vmatprep.subr.bf16.mxu0 %v11654_v16  ;;  %7263 = vmatprep.subr.bf16.mxu1 %v11656_v17  ;;  %v11696_v44 = vld [vmem:[#allocation5 + $0x164] ss:$16 sps:$4 sm:$0xff]   ;;  %v11698_v45 = vld [vmem:[#allocation5 + $0x16c] ss:$16 sps:$4 sm:$0xff]   ;;  %v11700_v48 = vld [vmem:[#allocation5 + $0x160] ss:$16 sps:$4 sm:$0xff]  }
  0x90   :  { %v117_v46 = vld [vmem:[#allocation2] sm:$0xff]  ;;  %v11701_v49 = vld [vmem:[#allocation5 + $0x168] ss:$16 sps:$4 sm:$0xff]   ;;  %v11704_v52 = vld [vmem:[#allocation5 + $0x18c] ss:$16 sps:$4 sm:$0xff]   ;;  %s13095_s6 = smov [#allocation14]  }
  0x91   :  { %v129_v47 = vld [vmem:[#allocation2 + $0x60] sm:$0xff]  ;;  %v11707_v54 = vld [vmem:[#allocation5 + $0x188] ss:$16 sps:$4 sm:$0xff]   ;;  %v11710_v56 = vld [vmem:[#allocation5 + $0x1ac] ss:$16 sps:$4 sm:$0xff]   ;;  %s9630_s18 = sshll.u32 %s13095_s6, 4  ;;  %s9631_s18 = int_to_ptr.vmem [resolvable:$true] %s9630_s18 }
  0x92   :  { %5908 = vmatpush1.bf16.msra.mxu0 %v11658_v18  ;;  %7264 = vmatpush1.bf16.msra.mxu1 %v11659_v19  ;;  %v9646_v50 = vcombine.high %v117_v46, %v129_v47  ;;  %v11702_v51 = vld [vmem:[#allocation5 + $0x184] ss:$16 sps:$4 sm:$0xff]   ;;  %v11706_v53 = vld [vmem:[#allocation5 + $0x180] ss:$16 sps:$4 sm:$0xff]   ;;  %v11713_v58 = vld [vmem:[#allocation5 + $0x1a8] ss:$16 sps:$4 sm:$0xff]   ;;  %v9645_v7 = vcombine.low %v117_v46, %v129_v47  ;;  %p13053_p1 = scmp.lt.s32.totalorder %s9631_s18, %s9631_s18 }
  0x93   :  { %5909 = vmatprep.subr.bf16.mxu0 %v11660_v20  ;;  %7265 = vmatprep.subr.bf16.mxu1 %v11662_v21  ;;  %v11708_v55 = vld [vmem:[#allocation5 + $0x1a4] ss:$16 sps:$4 sm:$0xff]   ;;  %v11712_v57 = vld [vmem:[#allocation5 + $0x1a0] ss:$16 sps:$4 sm:$0xff]   ;;  %v11716_v60 = vld [vmem:[#allocation5 + $0x1cc] ss:$16 sps:$4 sm:$0xff]  }
  0x94   :  { %5931 = vmatprep.mubr.bf16.mxu0 %v9646_v50  ;;  %7287 = vmatprep.mubr.bf16.mxu1 %v9646_v50  ;;  %v11714_v59 = vld [vmem:[#allocation5 + $0x1c4] ss:$16 sps:$4 sm:$0xff]   ;;  %v11718_v61 = vld [vmem:[#allocation5 + $0x1c0] ss:$16 sps:$4 sm:$0xff]   ;;  %v11719_v62 = vld [vmem:[#allocation5 + $0x1c8] ss:$16 sps:$4 sm:$0xff]  }
  0x95   :  { %v11720_v63 = vld [vmem:[#allocation5 + $0x1e4] ss:$16 sps:$4 sm:$0xff]   ;;  %v11722_v0 = vld [vmem:[#allocation5 + $0x1ec] ss:$16 sps:$4 sm:$0xff]   ;;  %v11724_v1 = vld [vmem:[#allocation5 + $0x1e0] ss:$16 sps:$4 sm:$0xff]  }
  0x96   :  { %5910 = vmatpush1.bf16.msra.mxu0 %v11664_v22  ;;  %7266 = vmatpush1.bf16.msra.mxu1 %v11665_v23  ;;  %v11725_v2 = vld [vmem:[#allocation5 + $0x1e8] ss:$16 sps:$4 sm:$0xff]   ;;  %v11728_v3 = vld [vmem:[#allocation5 + $0x204] ss:$16 sps:$4 sm:$0xff]   ;;  %v11731_v4 = vld [vmem:[#allocation5 + $0x20c] ss:$16 sps:$4 sm:$0xff]  }
  0x97   :  { %5911 = vmatprep.subr.bf16.mxu0 %v11666_v24  ;;  %7267 = vmatprep.subr.bf16.mxu1 %v11668_v25  ;;  %v11726_v5 = vld [vmem:[#allocation5 + $0x200] ss:$16 sps:$4 sm:$0xff]   ;;  %v11729_v6 = vld [vmem:[#allocation5 + $0x208] ss:$16 sps:$4 sm:$0xff]   ;;  %v11734_v10 = vld [vmem:[#allocation5 + $0x224] ss:$16 sps:$4 sm:$0xff]  }
  0x98   :  { %v141_v8 = vld [vmem:[#allocation2 + $0xc0] sm:$0xff]  ;;  %v11737_v11 = vld [vmem:[#allocation5 + $0x22c] ss:$16 sps:$4 sm:$0xff]   ;;  %v11735_v14 = vld [vmem:[#allocation5 + $0x228] ss:$16 sps:$4 sm:$0xff]   ;;  %s13048_s0 = scalar_lea.vmem %s9631_s18, 2048 }
  0x99   :  { %v153_v9 = vld [vmem:[#allocation2 + $0x120] sm:$0xff]  ;;  %v11743_v16 = vld [vmem:[#allocation5 + $0x24c] ss:$16 sps:$4 sm:$0xff]   ;;  %v11741_v21 = vld [vmem:[#allocation5 + $0x248] ss:$16 sps:$4 sm:$0xff]   ;;  %p13049_p0 = scmp.ne.s32.totalorder %s9631_s18, %s13048_s0  ;;  %p13054_p2 = scmp.lt.s32.totalorder %s13048_s0, %s13048_s0 }
  0x9a   :  { %5912 = vmatpush1.bf16.msra.mxu0 %v11670_v26  ;;  %7268 = vmatpush1.bf16.msra.mxu1 %v11671_v27  ;;  %v9670_v12 = vcombine.high %v141_v8, %v153_v9  ;;  %v11732_v13 = vld [vmem:[#allocation5 + $0x220] ss:$16 sps:$4 sm:$0xff]   ;;  %v11740_v15 = vld [vmem:[#allocation5 + $0x244] ss:$16 sps:$4 sm:$0xff]   ;;  %v9669_v18 = vcombine.low %v141_v8, %v153_v9  ;;  %v11749_v23 = vld [vmem:[#allocation5 + $0x26c] ss:$16 sps:$4 sm:$0xff]  }
  0x9b   :  { %5913 = vmatprep.subr.bf16.mxu0 %v11672_v28  ;;  %7269 = vmatprep.subr.bf16.mxu1 %v11674_v29  ;;  %v165_v17 = vld [vmem:[#allocation2 + $0x180] sm:$0xff]  ;;  %v11747_v26 = vld [vmem:[#allocation5 + $0x268] ss:$16 sps:$4 sm:$0xff]   ;;  %v11755_v28 = vld [vmem:[#allocation5 + $0x28c] ss:$16 sps:$4 sm:$0xff]   ;;  %p13055_p3 = por %p13054_p2, %p13053_p1 }
  0x9c   :  { %v177_v19 = vld [vmem:[#allocation2 + $0x1e0] sm:$0xff]  ;;  %v11773_v47 = vld [vmem:[#allocation5 + $0x2ec] ss:$16 sps:$4 sm:$0xff]   ;;  %v11771_v50 = vld [vmem:[#allocation5 + $0x2e8] ss:$16 sps:$4 sm:$0xff]  }
  0x9d   :  { %v11738_v20 = vld [vmem:[#allocation5 + $0x240] ss:$16 sps:$4 sm:$0xff]   ;;  %v11746_v22 = vld [vmem:[#allocation5 + $0x264] ss:$16 sps:$4 sm:$0xff]   ;;  %v9694_v24 = vcombine.high %v165_v17, %v177_v19  ;;  %p13056_p4 = pnand %p13055_p3, %p13049_p0 }
  0x9e   :  { %5914 = vmatpush1.bf16.msra.mxu0 %v11676_v30  ;;  %7270 = vmatpush1.bf16.msra.mxu1 %v11677_v31  ;;  %v11744_v25 = vld [vmem:[#allocation5 + $0x260] ss:$16 sps:$4 sm:$0xff]   ;;  %v11752_v27 = vld [vmem:[#allocation5 + $0x284] ss:$16 sps:$4 sm:$0xff]   ;;  %v9693_v30 = vcombine.low %v165_v17, %v177_v19  ;;  %v11809_v19 = vld [vmem:[#allocation5 + $0x3ac] ss:$16 sps:$4 sm:$0xff]  }
  0x9f   :  { %5915 = vmatprep.subr.bf16.mxu0 %v11678_v32  ;;  %7271 = vmatprep.subr.bf16.mxu1 %v11680_v33  ;;  %v189_v29 = vld [vmem:[#allocation2 + $0x240] sm:$0xff]  ;;  %v11753_v33 = vld [vmem:[#allocation5 + $0x288] ss:$16 sps:$4 sm:$0xff]  }
  0xa0   :  { %v201_v31 = vld [vmem:[#allocation2 + $0x2a0] sm:$0xff] }
  0xa1   :  { %v11750_v32 = vld [vmem:[#allocation5 + $0x280] ss:$16 sps:$4 sm:$0xff]   ;;  %v11770_v46 = vld [vmem:[#allocation5 + $0x2e4] ss:$16 sps:$4 sm:$0xff]  }
  0xa2   :  { %5916 = vmatpush1.bf16.msra.mxu0 %v11682_v34  ;;  %7272 = vmatpush1.bf16.msra.mxu1 %v11683_v35  ;;  %v11758_v34 = vld [vmem:[#allocation5 + $0x2a4] ss:$16 sps:$4 sm:$0xff]   ;;  %v11761_v35 = vld [vmem:[#allocation5 + $0x2ac] ss:$16 sps:$4 sm:$0xff]   ;;  %v11792_v9 = vld [vmem:[#allocation5 + $0x360] ss:$16 sps:$4 sm:$0xff]  }
  0xa3   :  { %5917 = vmatprep.subr.bf16.mxu0 %v11684_v36  ;;  %7273 = vmatprep.subr.bf16.mxu1 %v11686_v37  ;;  %v9718_v36 = vcombine.high %v189_v29, %v201_v31  ;;  %v11756_v37 = vld [vmem:[#allocation5 + $0x2a0] ss:$16 sps:$4 sm:$0xff]  }
  0xa4   :  { %v297_v17 = vld [vmem:[#allocation2 + $0x5a0] sm:$0xff] }
  0xa6   :  { %5918 = vmatpush1.bf16.msra.mxu0 %v11688_v38  ;;  %7274 = vmatpush1.bf16.msra.mxu1 %v11689_v39  ;;  %v11759_v38 = vld [vmem:[#allocation5 + $0x2a8] ss:$16 sps:$4 sm:$0xff]   ;;  %v11764_v39 = vld [vmem:[#allocation5 + $0x2c4] ss:$16 sps:$4 sm:$0xff]  }
  0xa7   :  { %5919 = vmatprep.subr.bf16.mxu0 %v11690_v40  ;;  %7275 = vmatprep.subr.bf16.mxu1 %v11692_v41  ;;  %v11767_v40 = vld [vmem:[#allocation5 + $0x2cc] ss:$16 sps:$4 sm:$0xff]   ;;  %v11762_v41 = vld [vmem:[#allocation5 + $0x2c0] ss:$16 sps:$4 sm:$0xff]  }
  0xaa   :  { %5920 = vmatpush1.bf16.msra.mxu0 %v11694_v42  ;;  %7276 = vmatpush1.bf16.msra.mxu1 %v11695_v43  ;;  %v11765_v42 = vld [vmem:[#allocation5 + $0x2c8] ss:$16 sps:$4 sm:$0xff]   ;;  %v9717_v43 = vcombine.low %v189_v29, %v201_v31  ;;  %v11821_v31 = vld [vmem:[#allocation5 + $0x3ec] ss:$16 sps:$4 sm:$0xff]  }
  0xab   :  { %5921 = vmatprep.subr.bf16.mxu0 %v11696_v44  ;;  %7277 = vmatprep.subr.bf16.mxu1 %v11698_v45  ;;  %v213_v44 = vld [vmem:[#allocation2 + $0x300] sm:$0xff]  ;;  %v11813_v29 = vld [vmem:[#allocation5 + $0x3c8] ss:$16 sps:$4 sm:$0xff]  }
  0xac   :  { %v225_v45 = vld [vmem:[#allocation2 + $0x360] sm:$0xff] }
  0xae   :  { %5922 = vmatpush1.bf16.msra.mxu0 %v11700_v48  ;;  %7278 = vmatpush1.bf16.msra.mxu1 %v11701_v49  ;;  %v9742_v48 = vcombine.high %v213_v44, %v225_v45  ;;  %v11768_v49 = vld [vmem:[#allocation5 + $0x2e0] ss:$16 sps:$4 sm:$0xff]  }
  0xaf   :  { %5923 = vmatprep.subr.bf16.mxu0 %v11702_v51  ;;  %7279 = vmatprep.subr.bf16.mxu1 %v11704_v52  ;;  %v11776_v51 = vld [vmem:[#allocation5 + $0x304] ss:$16 sps:$4 sm:$0xff]   ;;  %v11779_v52 = vld [vmem:[#allocation5 + $0x30c] ss:$16 sps:$4 sm:$0xff]  }
  0xb2   :  { %5924 = vmatpush1.bf16.msra.mxu0 %v11706_v53  ;;  %7280 = vmatpush1.bf16.msra.mxu1 %v11707_v54  ;;  %v237_v53 = vld [vmem:[#allocation2 + $0x3c0] sm:$0xff]  ;;  %v9741_v54 = vcombine.low %v213_v44, %v225_v45 }
  0xb3   :  { %5925 = vmatprep.subr.bf16.mxu0 %v11708_v55  ;;  %7281 = vmatprep.subr.bf16.mxu1 %v11710_v56  ;;  %v249_v55 = vld [vmem:[#allocation2 + $0x420] sm:$0xff] }
  0xb4   :  { %v11774_v56 = vld [vmem:[#allocation5 + $0x300] ss:$16 sps:$4 sm:$0xff]  }
  0xb5   :  { %v11828_v45 = vld [vmem:[#allocation5 + $0x420] ss:$16 sps:$4 sm:$0xff]  }
  0xb6   :  { %5926 = vmatpush1.bf16.msra.mxu0 %v11712_v57  ;;  %7282 = vmatpush1.bf16.msra.mxu1 %v11713_v58  ;;  %v11777_v57 = vld [vmem:[#allocation5 + $0x308] ss:$16 sps:$4 sm:$0xff]   ;;  %v11782_v58 = vld [vmem:[#allocation5 + $0x324] ss:$16 sps:$4 sm:$0xff]  }
  0xb7   :  { %5927 = vmatprep.subr.bf16.mxu0 %v11714_v59  ;;  %7283 = vmatprep.subr.bf16.mxu1 %v11716_v60  ;;  %v11785_v59 = vld [vmem:[#allocation5 + $0x32c] ss:$16 sps:$4 sm:$0xff]   ;;  %v9766_v60 = vcombine.high %v237_v53, %v249_v55 }
  0xba   :  { %5928 = vmatpush1.bf16.msra.mxu0 %v11718_v61  ;;  %7284 = vmatpush1.bf16.msra.mxu1 %v11719_v62  ;;  %v11780_v61 = vld [vmem:[#allocation5 + $0x320] ss:$16 sps:$4 sm:$0xff]   ;;  %v11783_v62 = vld [vmem:[#allocation5 + $0x328] ss:$16 sps:$4 sm:$0xff]  }
  0xbb   :  { %5929 = vmatprep.subr.bf16.mxu0 %v11720_v63  ;;  %7285 = vmatprep.subr.bf16.mxu1 %v11722_v0  ;;  %v11788_v63 = vld [vmem:[#allocation5 + $0x344] ss:$16 sps:$4 sm:$0xff]   ;;  %v11791_v0 = vld [vmem:[#allocation5 + $0x34c] ss:$16 sps:$4 sm:$0xff]  }
  0xbe   :  { %5930 = vmatpush1.bf16.msra.mxu0 %v11724_v1  ;;  %7286 = vmatpush1.bf16.msra.mxu1 %v11725_v2  ;;  %v261_v1 = vld [vmem:[#allocation2 + $0x480] sm:$0xff]  ;;  %v9765_v2 = vcombine.low %v237_v53, %v249_v55  ;;  %v178_v53 = vld [vmem:[#allocation2 + $0x1e8] sm:$0xff] }
  0xbf   :  { %6012 = vmatprep.subr.bf16.mxu0 %v11728_v3  ;;  %7368 = vmatprep.subr.bf16.mxu1 %v11731_v4  ;;  %v273_v3 = vld [vmem:[#allocation2 + $0x4e0] sm:$0xff]  ;;  %v11845_v55 = vld [vmem:[#allocation5 + $0x46c] ss:$16 sps:$4 sm:$0xff]  }
  0xc0   :  { %v11786_v4 = vld [vmem:[#allocation5 + $0x340] ss:$16 sps:$4 sm:$0xff]   ;;  %v9790_v8 = vcombine.high %v261_v1, %v273_v3 }
  0xc1   :  { %5932 = vmatmul.mubr.bf16.vlgmr.msra.gmra.mrb[0].mxu0 %v9645_v7  ;;  %7288 = vmatmul.mubr.bf16.vlgmr.msra.gmra.mrb[0].mxu1 %v9645_v7  ;;  %v11797_v7 = vld [vmem:[#allocation5 + $0x36c] ss:$16 sps:$4 sm:$0xff]  }
  0xc2   :  { %6013 = vmatpush1.bf16.msra.mxu0 %v11726_v5  ;;  %7369 = vmatpush1.bf16.msra.mxu1 %v11729_v6  ;;  %v11789_v5 = vld [vmem:[#allocation5 + $0x348] ss:$16 sps:$4 sm:$0xff]   ;;  %v11794_v6 = vld [vmem:[#allocation5 + $0x364] ss:$16 sps:$4 sm:$0xff]  }
  0xc3   :  { %6014 = vmatprep.subr.bf16.mxu0 %v11734_v10  ;;  %7370 = vmatprep.subr.bf16.mxu1 %v11737_v11  ;;  %v11795_v10 = vld [vmem:[#allocation5 + $0x368] ss:$16 sps:$4 sm:$0xff]   ;;  %v11800_v11 = vld [vmem:[#allocation5 + $0x384] ss:$16 sps:$4 sm:$0xff]  }
  0xc4   :  { %5941 = vmatprep.mubr.bf16.mxu0 %v9670_v12  ;;  %7297 = vmatprep.mubr.bf16.mxu1 %v9670_v12  ;;  %v11803_v12 = vld [vmem:[#allocation5 + $0x38c] ss:$16 sps:$4 sm:$0xff]  }
  0xc6   :  { %6015 = vmatpush1.bf16.msra.mxu0 %v11732_v13  ;;  %7371 = vmatpush1.bf16.msra.mxu1 %v11735_v14  ;;  %v11798_v13 = vld [vmem:[#allocation5 + $0x380] ss:$16 sps:$4 sm:$0xff]   ;;  %v11801_v14 = vld [vmem:[#allocation5 + $0x388] ss:$16 sps:$4 sm:$0xff]  }
  0xc7   :  { %6016 = vmatprep.subr.bf16.mxu0 %v11740_v15  ;;  %7372 = vmatprep.subr.bf16.mxu1 %v11743_v16  ;;  %v9789_v15 = vcombine.low %v261_v1, %v273_v3  ;;  %v285_v16 = vld [vmem:[#allocation2 + $0x540] sm:$0xff]  ;;  %v11849_v1 = vld [vmem:[#allocation5 + $0x488] ss:$16 sps:$4 sm:$0xff]   ;;  %v11857_v3 = vld [vmem:[#allocation5 + $0x4ac] ss:$16 sps:$4 sm:$0xff]  }
  0xc9   :  { %5942 = vmatmul.mubr.bf16.gmra.mrb[4].mxu0 %v9669_v18  ;;  %7298 = vmatmul.mubr.bf16.gmra.mrb[4].mxu1 %v9669_v18  ;;  %v11806_v18 = vld [vmem:[#allocation5 + $0x3a4] ss:$16 sps:$4 sm:$0xff]  }
  0xca   :  { %6017 = vmatpush1.bf16.msra.mxu0 %v11738_v20  ;;  %7373 = vmatpush1.bf16.msra.mxu1 %v11741_v21  ;;  %v9814_v20 = vcombine.high %v285_v16, %v297_v17  ;;  %v11804_v21 = vld [vmem:[#allocation5 + $0x3a0] ss:$16 sps:$4 sm:$0xff]  }
  0xcb   :  { %6018 = vmatprep.subr.bf16.mxu0 %v11746_v22  ;;  %7374 = vmatprep.subr.bf16.mxu1 %v11749_v23  ;;  %v11807_v22 = vld [vmem:[#allocation5 + $0x3a8] ss:$16 sps:$4 sm:$0xff]   ;;  %v11812_v23 = vld [vmem:[#allocation5 + $0x3c4] ss:$16 sps:$4 sm:$0xff]  }
  0xcc   :  { %5951 = vmatprep.mubr.bf16.mxu0 %v9694_v24  ;;  %7307 = vmatprep.mubr.bf16.mxu1 %v9694_v24  ;;  %v11815_v24 = vld [vmem:[#allocation5 + $0x3cc] ss:$16 sps:$4 sm:$0xff]  }
  0xce   :  { %6019 = vmatpush1.bf16.msra.mxu0 %v11744_v25  ;;  %7375 = vmatpush1.bf16.msra.mxu1 %v11747_v26  ;;  %v118_v25 = vld [vmem:[#allocation2 + $0x8] sm:$0xff]  ;;  %v9813_v26 = vcombine.low %v285_v16, %v297_v17  ;;  %v11864_v17 = vld [vmem:[#allocation5 + $0x4e0] ss:$16 sps:$4 sm:$0xff]  }
  0xcf   :  { %6020 = vmatprep.subr.bf16.mxu0 %v11752_v27  ;;  %7376 = vmatprep.subr.bf16.mxu1 %v11755_v28  ;;  %v130_v27 = vld [vmem:[#allocation2 + $0x68] sm:$0xff]  ;;  %v11810_v28 = vld [vmem:[#allocation5 + $0x3c0] ss:$16 sps:$4 sm:$0xff]  }
  0xd1   :  { %5952 = vmatmul.mubr.bf16.gmra.mrb[8].mxu0 %v9693_v30  ;;  %7308 = vmatmul.mubr.bf16.gmra.mrb[8].mxu1 %v9693_v30  ;;  %v11818_v30 = vld [vmem:[#allocation5 + $0x3e4] ss:$16 sps:$4 sm:$0xff]  }
  0xd2   :  { %6021 = vmatpush1.bf16.msra.mxu0 %v11750_v32  ;;  %7377 = vmatpush1.bf16.msra.mxu1 %v11753_v33  ;;  %v9648_v32 = vcombine.high %v118_v25, %v130_v27  ;;  %v11816_v33 = vld [vmem:[#allocation5 + $0x3e0] ss:$16 sps:$4 sm:$0xff]  }
  0xd3   :  { %6022 = vmatprep.subr.bf16.mxu0 %v11758_v34  ;;  %7378 = vmatprep.subr.bf16.mxu1 %v11761_v35  ;;  %v11819_v34 = vld [vmem:[#allocation5 + $0x3e8] ss:$16 sps:$4 sm:$0xff]   ;;  %v11824_v35 = vld [vmem:[#allocation5 + $0x404] ss:$16 sps:$4 sm:$0xff]  }
  0xd4   :  { %5961 = vmatprep.mubr.bf16.mxu0 %v9718_v36  ;;  %7317 = vmatprep.mubr.bf16.mxu1 %v9718_v36  ;;  %v11827_v36 = vld [vmem:[#allocation5 + $0x40c] ss:$16 sps:$4 sm:$0xff]  }
  0xd6   :  { %6023 = vmatpush1.bf16.msra.mxu0 %v11756_v37  ;;  %7379 = vmatpush1.bf16.msra.mxu1 %v11759_v38  ;;  %v142_v37 = vld [vmem:[#allocation2 + $0xc8] sm:$0xff]  ;;  %v9647_v38 = vcombine.low %v118_v25, %v130_v27 }
  0xd7   :  { %6024 = vmatprep.subr.bf16.mxu0 %v11764_v39  ;;  %7380 = vmatprep.subr.bf16.mxu1 %v11767_v40  ;;  %v154_v39 = vld [vmem:[#allocation2 + $0x128] sm:$0xff]  ;;  %v11822_v40 = vld [vmem:[#allocation5 + $0x400] ss:$16 sps:$4 sm:$0xff]  }
  0xd8   :  { %v9672_v44 = vcombine.high %v142_v37, %v154_v39  ;;  %v250_v25 = vld [vmem:[#allocation2 + $0x428] sm:$0xff] }
  0xd9   :  { %5962 = vmatmul.mubr.bf16.gmra.mrb[12].mxu0 %v9717_v43  ;;  %7318 = vmatmul.mubr.bf16.gmra.mrb[12].mxu1 %v9717_v43  ;;  %v11833_v43 = vld [vmem:[#allocation5 + $0x42c] ss:$16 sps:$4 sm:$0xff]  }
  0xda   :  { %6025 = vmatpush1.bf16.msra.mxu0 %v11762_v41  ;;  %7381 = vmatpush1.bf16.msra.mxu1 %v11765_v42  ;;  %v11825_v41 = vld [vmem:[#allocation5 + $0x408] ss:$16 sps:$4 sm:$0xff]   ;;  %v11830_v42 = vld [vmem:[#allocation5 + $0x424] ss:$16 sps:$4 sm:$0xff]   ;;  %v11881_v27 = vld [vmem:[#allocation5 + $0x52c] ss:$16 sps:$4 sm:$0xff]  }
  0xdb   :  { %6026 = vmatprep.subr.bf16.mxu0 %v11770_v46  ;;  %7382 = vmatprep.subr.bf16.mxu1 %v11773_v47  ;;  %v11831_v46 = vld [vmem:[#allocation5 + $0x428] ss:$16 sps:$4 sm:$0xff]   ;;  %v11836_v47 = vld [vmem:[#allocation5 + $0x444] ss:$16 sps:$4 sm:$0xff]  }
  0xdc   :  { %5971 = vmatprep.mubr.bf16.mxu0 %v9742_v48  ;;  %7327 = vmatprep.mubr.bf16.mxu1 %v9742_v48  ;;  %v11839_v48 = vld [vmem:[#allocation5 + $0x44c] ss:$16 sps:$4 sm:$0xff]  }
  0xde   :  { %6027 = vmatpush1.bf16.msra.mxu0 %v11768_v49  ;;  %7383 = vmatpush1.bf16.msra.mxu1 %v11771_v50  ;;  %v11834_v49 = vld [vmem:[#allocation5 + $0x440] ss:$16 sps:$4 sm:$0xff]   ;;  %v11837_v50 = vld [vmem:[#allocation5 + $0x448] ss:$16 sps:$4 sm:$0xff]  }
  0xdf   :  { %6028 = vmatprep.subr.bf16.mxu0 %v11776_v51  ;;  %7384 = vmatprep.subr.bf16.mxu1 %v11779_v52  ;;  %v9671_v51 = vcombine.low %v142_v37, %v154_v39  ;;  %v166_v52 = vld [vmem:[#allocation2 + $0x188] sm:$0xff] }
  0xe0   :  { %v11885_v37 = vld [vmem:[#allocation5 + $0x548] ss:$16 sps:$4 sm:$0xff]   ;;  %v11893_v39 = vld [vmem:[#allocation5 + $0x56c] ss:$16 sps:$4 sm:$0xff]  }
  0xe1   :  { %5972 = vmatmul.mubr.bf16.gmra.mrb[16].mxu0 %v9741_v54  ;;  %7328 = vmatmul.mubr.bf16.gmra.mrb[16].mxu1 %v9741_v54  ;;  %v11842_v54 = vld [vmem:[#allocation5 + $0x464] ss:$16 sps:$4 sm:$0xff]  }
  0xe2   :  { %6029 = vmatpush1.bf16.msra.mxu0 %v11774_v56  ;;  %7385 = vmatpush1.bf16.msra.mxu1 %v11777_v57  ;;  %v9696_v56 = vcombine.high %v166_v52, %v178_v53  ;;  %v11840_v57 = vld [vmem:[#allocation5 + $0x460] ss:$16 sps:$4 sm:$0xff]  }
  0xe3   :  { %6030 = vmatprep.subr.bf16.mxu0 %v11782_v58  ;;  %7386 = vmatprep.subr.bf16.mxu1 %v11785_v59  ;;  %v11843_v58 = vld [vmem:[#allocation5 + $0x468] ss:$16 sps:$4 sm:$0xff]   ;;  %v11848_v59 = vld [vmem:[#allocation5 + $0x484] ss:$16 sps:$4 sm:$0xff]  }
  0xe4   :  { %5981 = vmatprep.mubr.bf16.mxu0 %v9766_v60  ;;  %7337 = vmatprep.mubr.bf16.mxu1 %v9766_v60  ;;  %v11851_v60 = vld [vmem:[#allocation5 + $0x48c] ss:$16 sps:$4 sm:$0xff]  }
  0xe6   :  { %6031 = vmatpush1.bf16.msra.mxu0 %v11780_v61  ;;  %7387 = vmatpush1.bf16.msra.mxu1 %v11783_v62  ;;  %v190_v61 = vld [vmem:[#allocation2 + $0x248] sm:$0xff]  ;;  %v9695_v62 = vcombine.low %v166_v52, %v178_v53  ;;  %v11900_v53 = vld [vmem:[#allocation5 + $0x5a0] ss:$16 sps:$4 sm:$0xff]  }
  0xe7   :  { %6032 = vmatprep.subr.bf16.mxu0 %v11788_v63  ;;  %7388 = vmatprep.subr.bf16.mxu1 %v11791_v0  ;;  %v202_v63 = vld [vmem:[#allocation2 + $0x2a8] sm:$0xff]  ;;  %v11846_v0 = vld [vmem:[#allocation5 + $0x480] ss:$16 sps:$4 sm:$0xff]  }
  0xe9   :  { %5982 = vmatmul.mubr.bf16.gmra.mrb[20].mxu0 %v9765_v2  ;;  %7338 = vmatmul.mubr.bf16.gmra.mrb[20].mxu1 %v9765_v2  ;;  %v11854_v2 = vld [vmem:[#allocation5 + $0x4a4] ss:$16 sps:$4 sm:$0xff]  }
  0xea   :  { %6033 = vmatpush1.bf16.msra.mxu0 %v11786_v4  ;;  %7389 = vmatpush1.bf16.msra.mxu1 %v11789_v5  ;;  %v9720_v4 = vcombine.high %v190_v61, %v202_v63  ;;  %v11852_v5 = vld [vmem:[#allocation5 + $0x4a0] ss:$16 sps:$4 sm:$0xff]  }
  0xeb   :  { %6034 = vmatprep.subr.bf16.mxu0 %v11794_v6  ;;  %7390 = vmatprep.subr.bf16.mxu1 %v11797_v7  ;;  %v11855_v6 = vld [vmem:[#allocation5 + $0x4a8] ss:$16 sps:$4 sm:$0xff]   ;;  %v11860_v7 = vld [vmem:[#allocation5 + $0x4c4] ss:$16 sps:$4 sm:$0xff]  }
  0xec   :  { %5991 = vmatprep.mubr.bf16.mxu0 %v9790_v8  ;;  %7347 = vmatprep.mubr.bf16.mxu1 %v9790_v8  ;;  %v11863_v8 = vld [vmem:[#allocation5 + $0x4cc] ss:$16 sps:$4 sm:$0xff]  }
  0xee   :  { %6035 = vmatpush1.bf16.msra.mxu0 %v11792_v9  ;;  %7391 = vmatpush1.bf16.msra.mxu1 %v11795_v10  ;;  %v214_v9 = vld [vmem:[#allocation2 + $0x308] sm:$0xff]  ;;  %v9719_v10 = vcombine.low %v190_v61, %v202_v63  ;;  %v131_v61 = vld [vmem:[#allocation2 + $0x70] sm:$0xff] }
  0xef   :  { %6036 = vmatprep.subr.bf16.mxu0 %v11800_v11  ;;  %7392 = vmatprep.subr.bf16.mxu1 %v11803_v12  ;;  %v226_v11 = vld [vmem:[#allocation2 + $0x368] sm:$0xff]  ;;  %v11858_v12 = vld [vmem:[#allocation5 + $0x4c0] ss:$16 sps:$4 sm:$0xff]  }
  0xf0   :  { %v9744_v16 = vcombine.high %v214_v9, %v226_v11  ;;  %v11917_v63 = vld [vmem:[#allocation5 + $0x5ec] ss:$16 sps:$4 sm:$0xff]  }
  0xf1   :  { %5992 = vmatmul.mubr.bf16.gmra.mrb[24].mxu0 %v9789_v15  ;;  %7348 = vmatmul.mubr.bf16.gmra.mrb[24].mxu1 %v9789_v15  ;;  %v11869_v15 = vld [vmem:[#allocation5 + $0x4ec] ss:$16 sps:$4 sm:$0xff]  }
  0xf2   :  { %6037 = vmatpush1.bf16.msra.mxu0 %v11798_v13  ;;  %7393 = vmatpush1.bf16.msra.mxu1 %v11801_v14  ;;  %v11861_v13 = vld [vmem:[#allocation5 + $0x4c8] ss:$16 sps:$4 sm:$0xff]   ;;  %v11866_v14 = vld [vmem:[#allocation5 + $0x4e4] ss:$16 sps:$4 sm:$0xff]  }
  0xf3   :  { %6038 = vmatprep.subr.bf16.mxu0 %v11806_v18  ;;  %7394 = vmatprep.subr.bf16.mxu1 %v11809_v19  ;;  %v11867_v18 = vld [vmem:[#allocation5 + $0x4e8] ss:$16 sps:$4 sm:$0xff]   ;;  %v11872_v19 = vld [vmem:[#allocation5 + $0x504] ss:$16 sps:$4 sm:$0xff]  }
  0xf4   :  { %6001 = vmatprep.mubr.bf16.mxu0 %v9814_v20  ;;  %7357 = vmatprep.mubr.bf16.mxu1 %v9814_v20  ;;  %v11875_v20 = vld [vmem:[#allocation5 + $0x50c] ss:$16 sps:$4 sm:$0xff]  }
  0xf6   :  { %6039 = vmatpush1.bf16.msra.mxu0 %v11804_v21  ;;  %7395 = vmatpush1.bf16.msra.mxu1 %v11807_v22  ;;  %v11870_v21 = vld [vmem:[#allocation5 + $0x500] ss:$16 sps:$4 sm:$0xff]   ;;  %v11873_v22 = vld [vmem:[#allocation5 + $0x508] ss:$16 sps:$4 sm:$0xff]  }
  0xf7   :  { %6040 = vmatprep.subr.bf16.mxu0 %v11812_v23  ;;  %7396 = vmatprep.subr.bf16.mxu1 %v11815_v24  ;;  %v9743_v23 = vcombine.low %v214_v9, %v226_v11  ;;  %v238_v24 = vld [vmem:[#allocation2 + $0x3c8] sm:$0xff] }
  0xf8   :  { %v11921_v9 = vld [vmem:[#allocation5 + $0x608] ss:$16 sps:$4 sm:$0xff]   ;;  %v11929_v11 = vld [vmem:[#allocation5 + $0x62c] ss:$16 sps:$4 sm:$0xff]  }
  0xf9   :  { %6002 = vmatmul.mubr.bf16.gmra.mrb[28].mxu0 %v9813_v26  ;;  %7358 = vmatmul.mubr.bf16.gmra.mrb[28].mxu1 %v9813_v26  ;;  %v11878_v26 = vld [vmem:[#allocation5 + $0x524] ss:$16 sps:$4 sm:$0xff]  }
  0xfa   :  { %6041 = vmatpush1.bf16.msra.mxu0 %v11810_v28  ;;  %7397 = vmatpush1.bf16.msra.mxu1 %v11813_v29  ;;  %v9768_v28 = vcombine.high %v238_v24, %v250_v25  ;;  %v11876_v29 = vld [vmem:[#allocation5 + $0x520] ss:$16 sps:$4 sm:$0xff]  }
  0xfb   :  { %6042 = vmatprep.subr.bf16.mxu0 %v11818_v30  ;;  %7398 = vmatprep.subr.bf16.mxu1 %v11821_v31  ;;  %v11879_v30 = vld [vmem:[#allocation5 + $0x528] ss:$16 sps:$4 sm:$0xff]   ;;  %v11884_v31 = vld [vmem:[#allocation5 + $0x544] ss:$16 sps:$4 sm:$0xff]  }
  0xfc   :  { %6044 = vmatprep.mubr.bf16.mxu0 %v9648_v32  ;;  %7400 = vmatprep.mubr.bf16.mxu1 %v9648_v32  ;;  %v11887_v32 = vld [vmem:[#allocation5 + $0x54c] ss:$16 sps:$4 sm:$0xff]  }
  0xfe   :  { %6043 = vmatpush1.bf16.msra.mxu0 %v11816_v33  ;;  %7399 = vmatpush1.bf16.msra.mxu1 %v11819_v34  ;;  %v262_v33 = vld [vmem:[#allocation2 + $0x488] sm:$0xff]  ;;  %v9767_v34 = vcombine.low %v238_v24, %v250_v25  ;;  %v11936_v25 = vld [vmem:[#allocation5 + $0x660] ss:$16 sps:$4 sm:$0xff]  }
  0xff   :  { %6125 = vmatprep.subr.bf16.mxu0 %v11824_v35  ;;  %7481 = vmatprep.subr.bf16.mxu1 %v11827_v36  ;;  %v274_v35 = vld [vmem:[#allocation2 + $0x4e8] sm:$0xff]  ;;  %v11882_v36 = vld [vmem:[#allocation5 + $0x540] ss:$16 sps:$4 sm:$0xff]  }
 0x101   :  { %6045 = vmatmul.mubr.bf16.vlgmr.msra.gmra.mrb[0].mxu0 %v9647_v38  ;;  %7401 = vmatmul.mubr.bf16.vlgmr.msra.gmra.mrb[0].mxu1 %v9647_v38  ;;  %v11890_v38 = vld [vmem:[#allocation5 + $0x564] ss:$16 sps:$4 sm:$0xff]  }
 0x102   :  { %6126 = vmatpush1.bf16.msra.mxu0 %v11822_v40  ;;  %7482 = vmatpush1.bf16.msra.mxu1 %v11825_v41  ;;  %v9792_v40 = vcombine.high %v262_v33, %v274_v35  ;;  %v11888_v41 = vld [vmem:[#allocation5 + $0x560] ss:$16 sps:$4 sm:$0xff]  }
 0x103   :  { %6127 = vmatprep.subr.bf16.mxu0 %v11830_v42  ;;  %7483 = vmatprep.subr.bf16.mxu1 %v11833_v43  ;;  %v11891_v42 = vld [vmem:[#allocation5 + $0x568] ss:$16 sps:$4 sm:$0xff]   ;;  %v11896_v43 = vld [vmem:[#allocation5 + $0x584] ss:$16 sps:$4 sm:$0xff]  }
 0x104   :  { %6054 = vmatprep.mubr.bf16.mxu0 %v9672_v44  ;;  %7410 = vmatprep.mubr.bf16.mxu1 %v9672_v44  ;;  %v11899_v44 = vld [vmem:[#allocation5 + $0x58c] ss:$16 sps:$4 sm:$0xff]  }
 0x106   :  { %6128 = vmatpush1.bf16.msra.mxu0 %v11828_v45  ;;  %7484 = vmatpush1.bf16.msra.mxu1 %v11831_v46  ;;  %v286_v45 = vld [vmem:[#allocation2 + $0x548] sm:$0xff]  ;;  %v9791_v46 = vcombine.low %v262_v33, %v274_v35  ;;  %v203_v33 = vld [vmem:[#allocation2 + $0x2b0] sm:$0xff] }
 0x107   :  { %6129 = vmatprep.subr.bf16.mxu0 %v11836_v47  ;;  %7485 = vmatprep.subr.bf16.mxu1 %v11839_v48  ;;  %v298_v47 = vld [vmem:[#allocation2 + $0x5a8] sm:$0xff]  ;;  %v11894_v48 = vld [vmem:[#allocation5 + $0x580] ss:$16 sps:$4 sm:$0xff]  }
 0x108   :  { %v9816_v52 = vcombine.high %v286_v45, %v298_v47  ;;  %v11953_v35 = vld [vmem:[#allocation5 + $0x6ac] ss:$16 sps:$4 sm:$0xff]  }
 0x109   :  { %6055 = vmatmul.mubr.bf16.gmra.mrb[4].mxu0 %v9671_v51  ;;  %7411 = vmatmul.mubr.bf16.gmra.mrb[4].mxu1 %v9671_v51  ;;  %v11905_v51 = vld [vmem:[#allocation5 + $0x5ac] ss:$16 sps:$4 sm:$0xff]  }
 0x10a   :  { %6130 = vmatpush1.bf16.msra.mxu0 %v11834_v49  ;;  %7486 = vmatpush1.bf16.msra.mxu1 %v11837_v50  ;;  %v11897_v49 = vld [vmem:[#allocation5 + $0x588] ss:$16 sps:$4 sm:$0xff]   ;;  %v11902_v50 = vld [vmem:[#allocation5 + $0x5a4] ss:$16 sps:$4 sm:$0xff]  }
 0x10b   :  { %6131 = vmatprep.subr.bf16.mxu0 %v11842_v54  ;;  %7487 = vmatprep.subr.bf16.mxu1 %v11845_v55  ;;  %v11903_v54 = vld [vmem:[#allocation5 + $0x5a8] ss:$16 sps:$4 sm:$0xff]   ;;  %v11908_v55 = vld [vmem:[#allocation5 + $0x5c4] ss:$16 sps:$4 sm:$0xff]  }
 0x10c   :  { %6064 = vmatprep.mubr.bf16.mxu0 %v9696_v56  ;;  %7420 = vmatprep.mubr.bf16.mxu1 %v9696_v56  ;;  %v11911_v56 = vld [vmem:[#allocation5 + $0x5cc] ss:$16 sps:$4 sm:$0xff]  }
 0x10e   :  { %6132 = vmatpush1.bf16.msra.mxu0 %v11840_v57  ;;  %7488 = vmatpush1.bf16.msra.mxu1 %v11843_v58  ;;  %v11906_v57 = vld [vmem:[#allocation5 + $0x5c0] ss:$16 sps:$4 sm:$0xff]   ;;  %v11909_v58 = vld [vmem:[#allocation5 + $0x5c8] ss:$16 sps:$4 sm:$0xff]  }
 0x10f   :  { %6133 = vmatprep.subr.bf16.mxu0 %v11848_v59  ;;  %7489 = vmatprep.subr.bf16.mxu1 %v11851_v60  ;;  %v9815_v59 = vcombine.low %v286_v45, %v298_v47  ;;  %v119_v60 = vld [vmem:[#allocation2 + $0x10] sm:$0xff]  ;;  %v11957_v45 = vld [vmem:[#allocation5 + $0x6c8] ss:$16 sps:$4 sm:$0xff]   ;;  %v11965_v47 = vld [vmem:[#allocation5 + $0x6ec] ss:$16 sps:$4 sm:$0xff]  }
 0x111   :  { %6065 = vmatmul.mubr.bf16.gmra.mrb[8].mxu0 %v9695_v62  ;;  %7421 = vmatmul.mubr.bf16.gmra.mrb[8].mxu1 %v9695_v62  ;;  %v11914_v62 = vld [vmem:[#allocation5 + $0x5e4] ss:$16 sps:$4 sm:$0xff]  }
 0x112   :  { %6134 = vmatpush1.bf16.msra.mxu0 %v11846_v0  ;;  %7490 = vmatpush1.bf16.msra.mxu1 %v11849_v1  ;;  %v9650_v0 = vcombine.high %v119_v60, %v131_v61  ;;  %v11912_v1 = vld [vmem:[#allocation5 + $0x5e0] ss:$16 sps:$4 sm:$0xff]  }
 0x113   :  { %6135 = vmatprep.subr.bf16.mxu0 %v11854_v2  ;;  %7491 = vmatprep.subr.bf16.mxu1 %v11857_v3  ;;  %v11915_v2 = vld [vmem:[#allocation5 + $0x5e8] ss:$16 sps:$4 sm:$0xff]   ;;  %v11920_v3 = vld [vmem:[#allocation5 + $0x604] ss:$16 sps:$4 sm:$0xff]  }
 0x114   :  { %6074 = vmatprep.mubr.bf16.mxu0 %v9720_v4  ;;  %7430 = vmatprep.mubr.bf16.mxu1 %v9720_v4  ;;  %v11923_v4 = vld [vmem:[#allocation5 + $0x60c] ss:$16 sps:$4 sm:$0xff]  }
 0x116   :  { %6136 = vmatpush1.bf16.msra.mxu0 %v11852_v5  ;;  %7492 = vmatpush1.bf16.msra.mxu1 %v11855_v6  ;;  %v143_v5 = vld [vmem:[#allocation2 + $0xd0] sm:$0xff]  ;;  %v9649_v6 = vcombine.low %v119_v60, %v131_v61 }
 0x117   :  { %6137 = vmatprep.subr.bf16.mxu0 %v11860_v7  ;;  %7493 = vmatprep.subr.bf16.mxu1 %v11863_v8  ;;  %v155_v7 = vld [vmem:[#allocation2 + $0x130] sm:$0xff] }
 0x118   :  { %v11918_v8 = vld [vmem:[#allocation5 + $0x600] ss:$16 sps:$4 sm:$0xff]  }
 0x119   :  { %6075 = vmatmul.mubr.bf16.gmra.mrb[12].mxu0 %v9719_v10  ;;  %7431 = vmatmul.mubr.bf16.gmra.mrb[12].mxu1 %v9719_v10  ;;  %v11926_v10 = vld [vmem:[#allocation5 + $0x624] ss:$16 sps:$4 sm:$0xff]   ;;  %v11972_v61 = vld [vmem:[#allocation5 + $0x720] ss:$16 sps:$4 sm:$0xff]  }
 0x11a   :  { %6138 = vmatpush1.bf16.msra.mxu0 %v11858_v12  ;;  %7494 = vmatpush1.bf16.msra.mxu1 %v11861_v13  ;;  %v9674_v12 = vcombine.high %v143_v5, %v155_v7  ;;  %v11924_v13 = vld [vmem:[#allocation5 + $0x620] ss:$16 sps:$4 sm:$0xff]  }
 0x11b   :  { %6139 = vmatprep.subr.bf16.mxu0 %v11866_v14  ;;  %7495 = vmatprep.subr.bf16.mxu1 %v11869_v15  ;;  %v11927_v14 = vld [vmem:[#allocation5 + $0x628] ss:$16 sps:$4 sm:$0xff]   ;;  %v11932_v15 = vld [vmem:[#allocation5 + $0x644] ss:$16 sps:$4 sm:$0xff]  }
 0x11c   :  { %6084 = vmatprep.mubr.bf16.mxu0 %v9744_v16  ;;  %7440 = vmatprep.mubr.bf16.mxu1 %v9744_v16  ;;  %v11935_v16 = vld [vmem:[#allocation5 + $0x64c] ss:$16 sps:$4 sm:$0xff]  }
 0x11e   :  { %6140 = vmatpush1.bf16.msra.mxu0 %v11864_v17  ;;  %7496 = vmatpush1.bf16.msra.mxu1 %v11867_v18  ;;  %v167_v17 = vld [vmem:[#allocation2 + $0x190] sm:$0xff]  ;;  %v9673_v18 = vcombine.low %v143_v5, %v155_v7  ;;  %v11989_v7 = vld [vmem:[#allocation5 + $0x76c] ss:$16 sps:$4 sm:$0xff]  }
 0x11f   :  { %6141 = vmatprep.subr.bf16.mxu0 %v11872_v19  ;;  %7497 = vmatprep.subr.bf16.mxu1 %v11875_v20  ;;  %v179_v19 = vld [vmem:[#allocation2 + $0x1f0] sm:$0xff] }
 0x120   :  { %v11930_v20 = vld [vmem:[#allocation5 + $0x640] ss:$16 sps:$4 sm:$0xff]   ;;  %v9698_v24 = vcombine.high %v167_v17, %v179_v19 }
 0x121   :  { %6085 = vmatmul.mubr.bf16.gmra.mrb[16].mxu0 %v9743_v23  ;;  %7441 = vmatmul.mubr.bf16.gmra.mrb[16].mxu1 %v9743_v23  ;;  %v11941_v23 = vld [vmem:[#allocation5 + $0x66c] ss:$16 sps:$4 sm:$0xff]   ;;  %v275_v5 = vld [vmem:[#allocation2 + $0x4f0] sm:$0xff] }
 0x122   :  { %6142 = vmatpush1.bf16.msra.mxu0 %v11870_v21  ;;  %7498 = vmatpush1.bf16.msra.mxu1 %v11873_v22  ;;  %v11933_v21 = vld [vmem:[#allocation5 + $0x648] ss:$16 sps:$4 sm:$0xff]   ;;  %v11938_v22 = vld [vmem:[#allocation5 + $0x664] ss:$16 sps:$4 sm:$0xff]  }
 0x123   :  { %6143 = vmatprep.subr.bf16.mxu0 %v11878_v26  ;;  %7499 = vmatprep.subr.bf16.mxu1 %v11881_v27  ;;  %v11939_v26 = vld [vmem:[#allocation5 + $0x668] ss:$16 sps:$4 sm:$0xff]   ;;  %v11944_v27 = vld [vmem:[#allocation5 + $0x684] ss:$16 sps:$4 sm:$0xff]  }
 0x124   :  { %6094 = vmatprep.mubr.bf16.mxu0 %v9768_v28  ;;  %7450 = vmatprep.mubr.bf16.mxu1 %v9768_v28  ;;  %v11947_v28 = vld [vmem:[#allocation5 + $0x68c] ss:$16 sps:$4 sm:$0xff]  }
 0x126   :  { %6144 = vmatpush1.bf16.msra.mxu0 %v11876_v29  ;;  %7500 = vmatpush1.bf16.msra.mxu1 %v11879_v30  ;;  %v11942_v29 = vld [vmem:[#allocation5 + $0x680] ss:$16 sps:$4 sm:$0xff]   ;;  %v11945_v30 = vld [vmem:[#allocation5 + $0x688] ss:$16 sps:$4 sm:$0xff]  }
 0x127   :  { %6145 = vmatprep.subr.bf16.mxu0 %v11884_v31  ;;  %7501 = vmatprep.subr.bf16.mxu1 %v11887_v32  ;;  %v9697_v31 = vcombine.low %v167_v17, %v179_v19  ;;  %v191_v32 = vld [vmem:[#allocation2 + $0x250] sm:$0xff]  ;;  %v11993_v17 = vld [vmem:[#allocation5 + $0x788] ss:$16 sps:$4 sm:$0xff]   ;;  %v12001_v19 = vld [vmem:[#allocation5 + $0x7ac] ss:$16 sps:$4 sm:$0xff]  }
 0x129   :  { %6095 = vmatmul.mubr.bf16.gmra.mrb[20].mxu0 %v9767_v34  ;;  %7451 = vmatmul.mubr.bf16.gmra.mrb[20].mxu1 %v9767_v34  ;;  %v11950_v34 = vld [vmem:[#allocation5 + $0x6a4] ss:$16 sps:$4 sm:$0xff]  }
 0x12a   :  { %6146 = vmatpush1.bf16.msra.mxu0 %v11882_v36  ;;  %7502 = vmatpush1.bf16.msra.mxu1 %v11885_v37  ;;  %v9722_v36 = vcombine.high %v191_v32, %v203_v33  ;;  %v11948_v37 = vld [vmem:[#allocation5 + $0x6a0] ss:$16 sps:$4 sm:$0xff]  }
 0x12b   :  { %6147 = vmatprep.subr.bf16.mxu0 %v11890_v38  ;;  %7503 = vmatprep.subr.bf16.mxu1 %v11893_v39  ;;  %v11951_v38 = vld [vmem:[#allocation5 + $0x6a8] ss:$16 sps:$4 sm:$0xff]   ;;  %v11956_v39 = vld [vmem:[#allocation5 + $0x6c4] ss:$16 sps:$4 sm:$0xff]  }
 0x12c   :  { %6104 = vmatprep.mubr.bf16.mxu0 %v9792_v40  ;;  %7460 = vmatprep.mubr.bf16.mxu1 %v9792_v40  ;;  %v11959_v40 = vld [vmem:[#allocation5 + $0x6cc] ss:$16 sps:$4 sm:$0xff]  }
 0x12e   :  { %6148 = vmatpush1.bf16.msra.mxu0 %v11888_v41  ;;  %7504 = vmatpush1.bf16.msra.mxu1 %v11891_v42  ;;  %v215_v41 = vld [vmem:[#allocation2 + $0x310] sm:$0xff]  ;;  %v9721_v42 = vcombine.low %v191_v32, %v203_v33 }
 0x12f   :  { %6149 = vmatprep.subr.bf16.mxu0 %v11896_v43  ;;  %7505 = vmatprep.subr.bf16.mxu1 %v11899_v44  ;;  %v227_v43 = vld [vmem:[#allocation2 + $0x370] sm:$0xff] }
 0x130   :  { %v11954_v44 = vld [vmem:[#allocation5 + $0x6c0] ss:$16 sps:$4 sm:$0xff]  }
 0x131   :  { %6105 = vmatmul.mubr.bf16.gmra.mrb[24].mxu0 %v9791_v46  ;;  %7461 = vmatmul.mubr.bf16.gmra.mrb[24].mxu1 %v9791_v46  ;;  %v11962_v46 = vld [vmem:[#allocation5 + $0x6e4] ss:$16 sps:$4 sm:$0xff]   ;;  %v12008_v33 = vld [vmem:[#allocation5 + $0x7e0] ss:$16 sps:$4 sm:$0xff]  }
 0x132   :  { %6150 = vmatpush1.bf16.msra.mxu0 %v11894_v48  ;;  %7506 = vmatpush1.bf16.msra.mxu1 %v11897_v49  ;;  %v9746_v48 = vcombine.high %v215_v41, %v227_v43  ;;  %v11960_v49 = vld [vmem:[#allocation5 + $0x6e0] ss:$16 sps:$4 sm:$0xff]  }
 0x133   :  { %6151 = vmatprep.subr.bf16.mxu0 %v11902_v50  ;;  %7507 = vmatprep.subr.bf16.mxu1 %v11905_v51  ;;  %v11963_v50 = vld [vmem:[#allocation5 + $0x6e8] ss:$16 sps:$4 sm:$0xff]   ;;  %v11968_v51 = vld [vmem:[#allocation5 + $0x704] ss:$16 sps:$4 sm:$0xff]  }
 0x134   :  { %6114 = vmatprep.mubr.bf16.mxu0 %v9816_v52  ;;  %7470 = vmatprep.mubr.bf16.mxu1 %v9816_v52  ;;  %v11971_v52 = vld [vmem:[#allocation5 + $0x70c] ss:$16 sps:$4 sm:$0xff]  }
 0x136   :  { %6152 = vmatpush1.bf16.msra.mxu0 %v11900_v53  ;;  %7508 = vmatpush1.bf16.msra.mxu1 %v11903_v54  ;;  %v239_v53 = vld [vmem:[#allocation2 + $0x3d0] sm:$0xff]  ;;  %v9745_v54 = vcombine.low %v215_v41, %v227_v43  ;;  %v156_v41 = vld [vmem:[#allocation2 + $0x138] sm:$0xff] }
 0x137   :  { %6153 = vmatprep.subr.bf16.mxu0 %v11908_v55  ;;  %7509 = vmatprep.subr.bf16.mxu1 %v11911_v56  ;;  %v251_v55 = vld [vmem:[#allocation2 + $0x430] sm:$0xff]  ;;  %v12025_v43 = vld [vmem:[#allocation5 + $0x82c] ss:$16 sps:$4 sm:$0xff]  }
 0x138   :  { %v11966_v56 = vld [vmem:[#allocation5 + $0x700] ss:$16 sps:$4 sm:$0xff]   ;;  %v9770_v60 = vcombine.high %v239_v53, %v251_v55 }
 0x139   :  { %6115 = vmatmul.mubr.bf16.gmra.mrb[28].mxu0 %v9815_v59  ;;  %7471 = vmatmul.mubr.bf16.gmra.mrb[28].mxu1 %v9815_v59  ;;  %v11977_v59 = vld [vmem:[#allocation5 + $0x72c] ss:$16 sps:$4 sm:$0xff]  }
 0x13a   :  { %6154 = vmatpush1.bf16.msra.mxu0 %v11906_v57  ;;  %7510 = vmatpush1.bf16.msra.mxu1 %v11909_v58  ;;  %v11969_v57 = vld [vmem:[#allocation5 + $0x708] ss:$16 sps:$4 sm:$0xff]   ;;  %v11974_v58 = vld [vmem:[#allocation5 + $0x724] ss:$16 sps:$4 sm:$0xff]  }
 0x13b   :  { %6155 = vmatprep.subr.bf16.mxu0 %v11914_v62  ;;  %7511 = vmatprep.subr.bf16.mxu1 %v11917_v63  ;;  %v11975_v62 = vld [vmem:[#allocation5 + $0x728] ss:$16 sps:$4 sm:$0xff]   ;;  %v11980_v63 = vld [vmem:[#allocation5 + $0x744] ss:$16 sps:$4 sm:$0xff]  }
 0x13c   :  { %6157 = vmatprep.mubr.bf16.mxu0 %v9650_v0  ;;  %7513 = vmatprep.mubr.bf16.mxu1 %v9650_v0  ;;  %v11983_v0 = vld [vmem:[#allocation5 + $0x74c] ss:$16 sps:$4 sm:$0xff]  }
 0x13e   :  { %6156 = vmatpush1.bf16.msra.mxu0 %v11912_v1  ;;  %7512 = vmatpush1.bf16.msra.mxu1 %v11915_v2  ;;  %v11978_v1 = vld [vmem:[#allocation5 + $0x740] ss:$16 sps:$4 sm:$0xff]   ;;  %v11981_v2 = vld [vmem:[#allocation5 + $0x748] ss:$16 sps:$4 sm:$0xff]  }
 0x13f   :  { %6238 = vmatprep.subr.bf16.mxu0 %v11920_v3  ;;  %7594 = vmatprep.subr.bf16.mxu1 %v11923_v4  ;;  %v9769_v3 = vcombine.low %v239_v53, %v251_v55  ;;  %v263_v4 = vld [vmem:[#allocation2 + $0x490] sm:$0xff]  ;;  %v12029_v53 = vld [vmem:[#allocation5 + $0x848] ss:$16 sps:$4 sm:$0xff]   ;;  %v12037_v55 = vld [vmem:[#allocation5 + $0x86c] ss:$16 sps:$4 sm:$0xff]  }
 0x141   :  { %6158 = vmatmul.mubr.bf16.vlgmr.msra.gmra.mrb[0].mxu0 %v9649_v6  ;;  %7514 = vmatmul.mubr.bf16.vlgmr.msra.gmra.mrb[0].mxu1 %v9649_v6  ;;  %v11986_v6 = vld [vmem:[#allocation5 + $0x764] ss:$16 sps:$4 sm:$0xff]  }
 0x142   :  { %6239 = vmatpush1.bf16.msra.mxu0 %v11918_v8  ;;  %7595 = vmatpush1.bf16.msra.mxu1 %v11921_v9  ;;  %v9794_v8 = vcombine.high %v263_v4, %v275_v5  ;;  %v11984_v9 = vld [vmem:[#allocation5 + $0x760] ss:$16 sps:$4 sm:$0xff]  }
 0x143   :  { %6240 = vmatprep.subr.bf16.mxu0 %v11926_v10  ;;  %7596 = vmatprep.subr.bf16.mxu1 %v11929_v11  ;;  %v11987_v10 = vld [vmem:[#allocation5 + $0x768] ss:$16 sps:$4 sm:$0xff]   ;;  %v11992_v11 = vld [vmem:[#allocation5 + $0x784] ss:$16 sps:$4 sm:$0xff]  }
 0x144   :  { %6167 = vmatprep.mubr.bf16.mxu0 %v9674_v12  ;;  %7523 = vmatprep.mubr.bf16.mxu1 %v9674_v12  ;;  %v11995_v12 = vld [vmem:[#allocation5 + $0x78c] ss:$16 sps:$4 sm:$0xff]  }
 0x146   :  { %6241 = vmatpush1.bf16.msra.mxu0 %v11924_v13  ;;  %7597 = vmatpush1.bf16.msra.mxu1 %v11927_v14  ;;  %v287_v13 = vld [vmem:[#allocation2 + $0x550] sm:$0xff]  ;;  %v9793_v14 = vcombine.low %v263_v4, %v275_v5 }
 0x147   :  { %6242 = vmatprep.subr.bf16.mxu0 %v11932_v15  ;;  %7598 = vmatprep.subr.bf16.mxu1 %v11935_v16  ;;  %v299_v15 = vld [vmem:[#allocation2 + $0x5b0] sm:$0xff] }
 0x148   :  { %v11990_v16 = vld [vmem:[#allocation5 + $0x780] ss:$16 sps:$4 sm:$0xff]  }
 0x149   :  { %6168 = vmatmul.mubr.bf16.gmra.mrb[4].mxu0 %v9673_v18  ;;  %7524 = vmatmul.mubr.bf16.gmra.mrb[4].mxu1 %v9673_v18  ;;  %v11998_v18 = vld [vmem:[#allocation5 + $0x7a4] ss:$16 sps:$4 sm:$0xff]   ;;  %v12044_v5 = vld [vmem:[#allocation5 + $0x8a0] ss:$16 sps:$4 sm:$0xff]  }
 0x14a   :  { %6243 = vmatpush1.bf16.msra.mxu0 %v11930_v20  ;;  %7599 = vmatpush1.bf16.msra.mxu1 %v11933_v21  ;;  %v9818_v20 = vcombine.high %v287_v13, %v299_v15  ;;  %v11996_v21 = vld [vmem:[#allocation5 + $0x7a0] ss:$16 sps:$4 sm:$0xff]  }
 0x14b   :  { %6244 = vmatprep.subr.bf16.mxu0 %v11938_v22  ;;  %7600 = vmatprep.subr.bf16.mxu1 %v11941_v23  ;;  %v11999_v22 = vld [vmem:[#allocation5 + $0x7a8] ss:$16 sps:$4 sm:$0xff]   ;;  %v12004_v23 = vld [vmem:[#allocation5 + $0x7c4] ss:$16 sps:$4 sm:$0xff]  }
 0x14c   :  { %6177 = vmatprep.mubr.bf16.mxu0 %v9698_v24  ;;  %7533 = vmatprep.mubr.bf16.mxu1 %v9698_v24  ;;  %v12007_v24 = vld [vmem:[#allocation5 + $0x7cc] ss:$16 sps:$4 sm:$0xff]  }
 0x14e   :  { %6245 = vmatpush1.bf16.msra.mxu0 %v11936_v25  ;;  %7601 = vmatpush1.bf16.msra.mxu1 %v11939_v26  ;;  %v120_v25 = vld [vmem:[#allocation2 + $0x18] sm:$0xff]  ;;  %v9817_v26 = vcombine.low %v287_v13, %v299_v15 }
 0x14f   :  { %6246 = vmatprep.subr.bf16.mxu0 %v11944_v27  ;;  %7602 = vmatprep.subr.bf16.mxu1 %v11947_v28  ;;  %v132_v27 = vld [vmem:[#allocation2 + $0x78] sm:$0xff]  ;;  %v12002_v28 = vld [vmem:[#allocation5 + $0x7c0] ss:$16 sps:$4 sm:$0xff]  }
 0x150   :  { %v9652_v32 = vcombine.high %v120_v25, %v132_v27  ;;  %v228_v13 = vld [vmem:[#allocation2 + $0x378] sm:$0xff] }
 0x151   :  { %6178 = vmatmul.mubr.bf16.gmra.mrb[8].mxu0 %v9697_v31  ;;  %7534 = vmatmul.mubr.bf16.gmra.mrb[8].mxu1 %v9697_v31  ;;  %v12013_v31 = vld [vmem:[#allocation5 + $0x7ec] ss:$16 sps:$4 sm:$0xff]  }
 0x152   :  { %6247 = vmatpush1.bf16.msra.mxu0 %v11942_v29  ;;  %7603 = vmatpush1.bf16.msra.mxu1 %v11945_v30  ;;  %v12005_v29 = vld [vmem:[#allocation5 + $0x7c8] ss:$16 sps:$4 sm:$0xff]   ;;  %v12010_v30 = vld [vmem:[#allocation5 + $0x7e4] ss:$16 sps:$4 sm:$0xff]   ;;  %v12061_v15 = vld [vmem:[#allocation5 + $0x8ec] ss:$16 sps:$4 sm:$0xff]  }
 0x153   :  { %6248 = vmatprep.subr.bf16.mxu0 %v11950_v34  ;;  %7604 = vmatprep.subr.bf16.mxu1 %v11953_v35  ;;  %v12011_v34 = vld [vmem:[#allocation5 + $0x7e8] ss:$16 sps:$4 sm:$0xff]   ;;  %v12016_v35 = vld [vmem:[#allocation5 + $0x804] ss:$16 sps:$4 sm:$0xff]  }
 0x154   :  { %6187 = vmatprep.mubr.bf16.mxu0 %v9722_v36  ;;  %7543 = vmatprep.mubr.bf16.mxu1 %v9722_v36  ;;  %v12019_v36 = vld [vmem:[#allocation5 + $0x80c] ss:$16 sps:$4 sm:$0xff]  }
 0x156   :  { %6249 = vmatpush1.bf16.msra.mxu0 %v11948_v37  ;;  %7605 = vmatpush1.bf16.msra.mxu1 %v11951_v38  ;;  %v12014_v37 = vld [vmem:[#allocation5 + $0x800] ss:$16 sps:$4 sm:$0xff]   ;;  %v12017_v38 = vld [vmem:[#allocation5 + $0x808] ss:$16 sps:$4 sm:$0xff]  }
 0x157   :  { %6250 = vmatprep.subr.bf16.mxu0 %v11956_v39  ;;  %7606 = vmatprep.subr.bf16.mxu1 %v11959_v40  ;;  %v9651_v39 = vcombine.low %v120_v25, %v132_v27  ;;  %v144_v40 = vld [vmem:[#allocation2 + $0xd8] sm:$0xff] }
 0x158   :  { %v12065_v25 = vld [vmem:[#allocation5 + $0x908] ss:$16 sps:$4 sm:$0xff]   ;;  %v12073_v27 = vld [vmem:[#allocation5 + $0x92c] ss:$16 sps:$4 sm:$0xff]  }
 0x159   :  { %6188 = vmatmul.mubr.bf16.gmra.mrb[12].mxu0 %v9721_v42  ;;  %7544 = vmatmul.mubr.bf16.gmra.mrb[12].mxu1 %v9721_v42  ;;  %v12022_v42 = vld [vmem:[#allocation5 + $0x824] ss:$16 sps:$4 sm:$0xff]  }
 0x15a   :  { %6251 = vmatpush1.bf16.msra.mxu0 %v11954_v44  ;;  %7607 = vmatpush1.bf16.msra.mxu1 %v11957_v45  ;;  %v9676_v44 = vcombine.high %v144_v40, %v156_v41  ;;  %v12020_v45 = vld [vmem:[#allocation5 + $0x820] ss:$16 sps:$4 sm:$0xff]  }
 0x15b   :  { %6252 = vmatprep.subr.bf16.mxu0 %v11962_v46  ;;  %7608 = vmatprep.subr.bf16.mxu1 %v11965_v47  ;;  %v12023_v46 = vld [vmem:[#allocation5 + $0x828] ss:$16 sps:$4 sm:$0xff]   ;;  %v12028_v47 = vld [vmem:[#allocation5 + $0x844] ss:$16 sps:$4 sm:$0xff]  }
 0x15c   :  { %6197 = vmatprep.mubr.bf16.mxu0 %v9746_v48  ;;  %7553 = vmatprep.mubr.bf16.mxu1 %v9746_v48  ;;  %v12031_v48 = vld [vmem:[#allocation5 + $0x84c] ss:$16 sps:$4 sm:$0xff]  }
 0x15e   :  { %6253 = vmatpush1.bf16.msra.mxu0 %v11960_v49  ;;  %7609 = vmatpush1.bf16.msra.mxu1 %v11963_v50  ;;  %v168_v49 = vld [vmem:[#allocation2 + $0x198] sm:$0xff]  ;;  %v9675_v50 = vcombine.low %v144_v40, %v156_v41  ;;  %v12080_v41 = vld [vmem:[#allocation5 + $0x960] ss:$16 sps:$4 sm:$0xff]  }
 0x15f   :  { %6254 = vmatprep.subr.bf16.mxu0 %v11968_v51  ;;  %7610 = vmatprep.subr.bf16.mxu1 %v11971_v52  ;;  %v180_v51 = vld [vmem:[#allocation2 + $0x1f8] sm:$0xff]  ;;  %v12026_v52 = vld [vmem:[#allocation5 + $0x840] ss:$16 sps:$4 sm:$0xff]  }
 0x161   :  { %6198 = vmatmul.mubr.bf16.gmra.mrb[16].mxu0 %v9745_v54  ;;  %7554 = vmatmul.mubr.bf16.gmra.mrb[16].mxu1 %v9745_v54  ;;  %v12034_v54 = vld [vmem:[#allocation5 + $0x864] ss:$16 sps:$4 sm:$0xff]  }
 0x162   :  { %6255 = vmatpush1.bf16.msra.mxu0 %v11966_v56  ;;  %7611 = vmatpush1.bf16.msra.mxu1 %v11969_v57  ;;  %v9700_v56 = vcombine.high %v168_v49, %v180_v51  ;;  %v12032_v57 = vld [vmem:[#allocation5 + $0x860] ss:$16 sps:$4 sm:$0xff]  }
 0x163   :  { %6256 = vmatprep.subr.bf16.mxu0 %v11974_v58  ;;  %7612 = vmatprep.subr.bf16.mxu1 %v11977_v59  ;;  %v12035_v58 = vld [vmem:[#allocation5 + $0x868] ss:$16 sps:$4 sm:$0xff]   ;;  %v12040_v59 = vld [vmem:[#allocation5 + $0x884] ss:$16 sps:$4 sm:$0xff]  }
 0x164   :  { %6207 = vmatprep.mubr.bf16.mxu0 %v9770_v60  ;;  %7563 = vmatprep.mubr.bf16.mxu1 %v9770_v60  ;;  %v12043_v60 = vld [vmem:[#allocation5 + $0x88c] ss:$16 sps:$4 sm:$0xff]  }
 0x166   :  { %6257 = vmatpush1.bf16.msra.mxu0 %v11972_v61  ;;  %7613 = vmatpush1.bf16.msra.mxu1 %v11975_v62  ;;  %v192_v61 = vld [vmem:[#allocation2 + $0x258] sm:$0xff]  ;;  %v9699_v62 = vcombine.low %v168_v49, %v180_v51 }
 0x167   :  { %6258 = vmatprep.subr.bf16.mxu0 %v11980_v63  ;;  %7614 = vmatprep.subr.bf16.mxu1 %v11983_v0  ;;  %v204_v63 = vld [vmem:[#allocation2 + $0x2b8] sm:$0xff]  ;;  %v12038_v0 = vld [vmem:[#allocation5 + $0x880] ss:$16 sps:$4 sm:$0xff]  }
 0x168   :  { %v9724_v4 = vcombine.high %v192_v61, %v204_v63  ;;  %v300_v49 = vld [vmem:[#allocation2 + $0x5b8] sm:$0xff] }
 0x169   :  { %6208 = vmatmul.mubr.bf16.gmra.mrb[20].mxu0 %v9769_v3  ;;  %7564 = vmatmul.mubr.bf16.gmra.mrb[20].mxu1 %v9769_v3  ;;  %v12049_v3 = vld [vmem:[#allocation5 + $0x8ac] ss:$16 sps:$4 sm:$0xff]  }
 0x16a   :  { %6259 = vmatpush1.bf16.msra.mxu0 %v11978_v1  ;;  %7615 = vmatpush1.bf16.msra.mxu1 %v11981_v2  ;;  %v12041_v1 = vld [vmem:[#allocation5 + $0x888] ss:$16 sps:$4 sm:$0xff]   ;;  %v12046_v2 = vld [vmem:[#allocation5 + $0x8a4] ss:$16 sps:$4 sm:$0xff]   ;;  %v12097_v51 = vld [vmem:[#allocation5 + $0x9ac] ss:$16 sps:$4 sm:$0xff]  }
 0x16b   :  { %6260 = vmatprep.subr.bf16.mxu0 %v11986_v6  ;;  %7616 = vmatprep.subr.bf16.mxu1 %v11989_v7  ;;  %v12047_v6 = vld [vmem:[#allocation5 + $0x8a8] ss:$16 sps:$4 sm:$0xff]   ;;  %v12052_v7 = vld [vmem:[#allocation5 + $0x8c4] ss:$16 sps:$4 sm:$0xff]  }
 0x16c   :  { %6217 = vmatprep.mubr.bf16.mxu0 %v9794_v8  ;;  %7573 = vmatprep.mubr.bf16.mxu1 %v9794_v8  ;;  %v12055_v8 = vld [vmem:[#allocation5 + $0x8cc] ss:$16 sps:$4 sm:$0xff]  }
 0x16e   :  { %6261 = vmatpush1.bf16.msra.mxu0 %v11984_v9  ;;  %7617 = vmatpush1.bf16.msra.mxu1 %v11987_v10  ;;  %v12050_v9 = vld [vmem:[#allocation5 + $0x8c0] ss:$16 sps:$4 sm:$0xff]   ;;  %v12053_v10 = vld [vmem:[#allocation5 + $0x8c8] ss:$16 sps:$4 sm:$0xff]  }
 0x16f   :  { %6262 = vmatprep.subr.bf16.mxu0 %v11992_v11  ;;  %7618 = vmatprep.subr.bf16.mxu1 %v11995_v12  ;;  %v9723_v11 = vcombine.low %v192_v61, %v204_v63  ;;  %v216_v12 = vld [vmem:[#allocation2 + $0x318] sm:$0xff] }
 0x170   :  { %v12101_v61 = vld [vmem:[#allocation5 + $0x9c8] ss:$16 sps:$4 sm:$0xff]   ;;  %v12109_v63 = vld [vmem:[#allocation5 + $0x9ec] ss:$16 sps:$4 sm:$0xff]  }
 0x171   :  { %6218 = vmatmul.mubr.bf16.gmra.mrb[24].mxu0 %v9793_v14  ;;  %7574 = vmatmul.mubr.bf16.gmra.mrb[24].mxu1 %v9793_v14  ;;  %v12058_v14 = vld [vmem:[#allocation5 + $0x8e4] ss:$16 sps:$4 sm:$0xff]  }
 0x172   :  { %6263 = vmatpush1.bf16.msra.mxu0 %v11990_v16  ;;  %7619 = vmatpush1.bf16.msra.mxu1 %v11993_v17  ;;  %v9748_v16 = vcombine.high %v216_v12, %v228_v13  ;;  %v12056_v17 = vld [vmem:[#allocation5 + $0x8e0] ss:$16 sps:$4 sm:$0xff]  }
 0x173   :  { %6264 = vmatprep.subr.bf16.mxu0 %v11998_v18  ;;  %7620 = vmatprep.subr.bf16.mxu1 %v12001_v19  ;;  %v12059_v18 = vld [vmem:[#allocation5 + $0x8e8] ss:$16 sps:$4 sm:$0xff]   ;;  %v12064_v19 = vld [vmem:[#allocation5 + $0x904] ss:$16 sps:$4 sm:$0xff]  }
 0x174   :  { %6227 = vmatprep.mubr.bf16.mxu0 %v9818_v20  ;;  %7583 = vmatprep.mubr.bf16.mxu1 %v9818_v20  ;;  %v12067_v20 = vld [vmem:[#allocation5 + $0x90c] ss:$16 sps:$4 sm:$0xff]  }
 0x176   :  { %6265 = vmatpush1.bf16.msra.mxu0 %v11996_v21  ;;  %7621 = vmatpush1.bf16.msra.mxu1 %v11999_v22  ;;  %v240_v21 = vld [vmem:[#allocation2 + $0x3d8] sm:$0xff]  ;;  %v9747_v22 = vcombine.low %v216_v12, %v228_v13  ;;  %v12116_v13 = vld [vmem:[#allocation5 + $0xa20] ss:$16 sps:$4 sm:$0xff]  }
 0x177   :  { %6266 = vmatprep.subr.bf16.mxu0 %v12004_v23  ;;  %7622 = vmatprep.subr.bf16.mxu1 %v12007_v24  ;;  %v252_v23 = vld [vmem:[#allocation2 + $0x438] sm:$0xff]  ;;  %v12062_v24 = vld [vmem:[#allocation5 + $0x900] ss:$16 sps:$4 sm:$0xff]  }
 0x179   :  { %6228 = vmatmul.mubr.bf16.gmra.mrb[28].mxu0 %v9817_v26  ;;  %7584 = vmatmul.mubr.bf16.gmra.mrb[28].mxu1 %v9817_v26  ;;  %v12070_v26 = vld [vmem:[#allocation5 + $0x924] ss:$16 sps:$4 sm:$0xff]  }
 0x17a   :  { %6267 = vmatpush1.bf16.msra.mxu0 %v12002_v28  ;;  %7623 = vmatpush1.bf16.msra.mxu1 %v12005_v29  ;;  %v9772_v28 = vcombine.high %v240_v21, %v252_v23  ;;  %v12068_v29 = vld [vmem:[#allocation5 + $0x920] ss:$16 sps:$4 sm:$0xff]  }
 0x17b   :  { %6268 = vmatprep.subr.bf16.mxu0 %v12010_v30  ;;  %7624 = vmatprep.subr.bf16.mxu1 %v12013_v31  ;;  %v12071_v30 = vld [vmem:[#allocation5 + $0x928] ss:$16 sps:$4 sm:$0xff]   ;;  %v12076_v31 = vld [vmem:[#allocation5 + $0x944] ss:$16 sps:$4 sm:$0xff]  }
 0x17c   :  { %6270 = vmatprep.mubr.bf16.mxu0 %v9652_v32  ;;  %7626 = vmatprep.mubr.bf16.mxu1 %v9652_v32  ;;  %v12079_v32 = vld [vmem:[#allocation5 + $0x94c] ss:$16 sps:$4 sm:$0xff]  }
 0x17e   :  { %6269 = vmatpush1.bf16.msra.mxu0 %v12008_v33  ;;  %7625 = vmatpush1.bf16.msra.mxu1 %v12011_v34  ;;  %v264_v33 = vld [vmem:[#allocation2 + $0x498] sm:$0xff]  ;;  %v9771_v34 = vcombine.low %v240_v21, %v252_v23  ;;  %v181_v21 = vld [vmem:[#allocation2 + $0x200] sm:$0xff] }
 0x17f   :  { %6351 = vmatprep.subr.bf16.mxu0 %v12016_v35  ;;  %7707 = vmatprep.subr.bf16.mxu1 %v12019_v36  ;;  %v276_v35 = vld [vmem:[#allocation2 + $0x4f8] sm:$0xff]  ;;  %v12074_v36 = vld [vmem:[#allocation5 + $0x940] ss:$16 sps:$4 sm:$0xff]  }
 0x180   :  { %v9796_v40 = vcombine.high %v264_v33, %v276_v35  ;;  %v12133_v23 = vld [vmem:[#allocation5 + $0xa6c] ss:$16 sps:$4 sm:$0xff]  }
 0x181   :  { %6271 = vmatmul.mubr.bf16.vlgmr.msra.gmra.mrb[0].mxu0 %v9651_v39  ;;  %7627 = vmatmul.mubr.bf16.vlgmr.msra.gmra.mrb[0].mxu1 %v9651_v39  ;;  %v12085_v39 = vld [vmem:[#allocation5 + $0x96c] ss:$16 sps:$4 sm:$0xff]  }
 0x182   :  { %6352 = vmatpush1.bf16.msra.mxu0 %v12014_v37  ;;  %7708 = vmatpush1.bf16.msra.mxu1 %v12017_v38  ;;  %v12077_v37 = vld [vmem:[#allocation5 + $0x948] ss:$16 sps:$4 sm:$0xff]   ;;  %v12082_v38 = vld [vmem:[#allocation5 + $0x964] ss:$16 sps:$4 sm:$0xff]  }
 0x183   :  { %6353 = vmatprep.subr.bf16.mxu0 %v12022_v42  ;;  %7709 = vmatprep.subr.bf16.mxu1 %v12025_v43  ;;  %v12083_v42 = vld [vmem:[#allocation5 + $0x968] ss:$16 sps:$4 sm:$0xff]   ;;  %v12088_v43 = vld [vmem:[#allocation5 + $0x984] ss:$16 sps:$4 sm:$0xff]  }
 0x184   :  { %6280 = vmatprep.mubr.bf16.mxu0 %v9676_v44  ;;  %7636 = vmatprep.mubr.bf16.mxu1 %v9676_v44  ;;  %v12091_v44 = vld [vmem:[#allocation5 + $0x98c] ss:$16 sps:$4 sm:$0xff]  }
 0x186   :  { %6354 = vmatpush1.bf16.msra.mxu0 %v12020_v45  ;;  %7710 = vmatpush1.bf16.msra.mxu1 %v12023_v46  ;;  %v12086_v45 = vld [vmem:[#allocation5 + $0x980] ss:$16 sps:$4 sm:$0xff]   ;;  %v12089_v46 = vld [vmem:[#allocation5 + $0x988] ss:$16 sps:$4 sm:$0xff]  }
 0x187   :  { %6355 = vmatprep.subr.bf16.mxu0 %v12028_v47  ;;  %7711 = vmatprep.subr.bf16.mxu1 %v12031_v48  ;;  %v9795_v47 = vcombine.low %v264_v33, %v276_v35  ;;  %v288_v48 = vld [vmem:[#allocation2 + $0x558] sm:$0xff] }
 0x188   :  { %v12137_v33 = vld [vmem:[#allocation5 + $0xa88] ss:$16 sps:$4 sm:$0xff]   ;;  %v12145_v35 = vld [vmem:[#allocation5 + $0xaac] ss:$16 sps:$4 sm:$0xff]  }
 0x189   :  { %6281 = vmatmul.mubr.bf16.gmra.mrb[4].mxu0 %v9675_v50  ;;  %7637 = vmatmul.mubr.bf16.gmra.mrb[4].mxu1 %v9675_v50  ;;  %v12094_v50 = vld [vmem:[#allocation5 + $0x9a4] ss:$16 sps:$4 sm:$0xff]  }
 0x18a   :  { %6356 = vmatpush1.bf16.msra.mxu0 %v12026_v52  ;;  %7712 = vmatpush1.bf16.msra.mxu1 %v12029_v53  ;;  %v9820_v52 = vcombine.high %v288_v48, %v300_v49  ;;  %v12092_v53 = vld [vmem:[#allocation5 + $0x9a0] ss:$16 sps:$4 sm:$0xff]  }
 0x18b   :  { %6357 = vmatprep.subr.bf16.mxu0 %v12034_v54  ;;  %7713 = vmatprep.subr.bf16.mxu1 %v12037_v55  ;;  %v12095_v54 = vld [vmem:[#allocation5 + $0x9a8] ss:$16 sps:$4 sm:$0xff]   ;;  %v12100_v55 = vld [vmem:[#allocation5 + $0x9c4] ss:$16 sps:$4 sm:$0xff]  }
 0x18c   :  { %6290 = vmatprep.mubr.bf16.mxu0 %v9700_v56  ;;  %7646 = vmatprep.mubr.bf16.mxu1 %v9700_v56  ;;  %v12103_v56 = vld [vmem:[#allocation5 + $0x9cc] ss:$16 sps:$4 sm:$0xff]  }
 0x18e   :  { %6358 = vmatpush1.bf16.msra.mxu0 %v12032_v57  ;;  %7714 = vmatpush1.bf16.msra.mxu1 %v12035_v58  ;;  %v121_v57 = vld [vmem:[#allocation2 + $0x20] sm:$0xff]  ;;  %v9819_v58 = vcombine.low %v288_v48, %v300_v49 }
 0x18f   :  { %6359 = vmatprep.subr.bf16.mxu0 %v12040_v59  ;;  %7715 = vmatprep.subr.bf16.mxu1 %v12043_v60  ;;  %v133_v59 = vld [vmem:[#allocation2 + $0x80] sm:$0xff] }
 0x190   :  { %v12098_v60 = vld [vmem:[#allocation5 + $0x9c0] ss:$16 sps:$4 sm:$0xff]  }
 0x191   :  { %6291 = vmatmul.mubr.bf16.gmra.mrb[8].mxu0 %v9699_v62  ;;  %7647 = vmatmul.mubr.bf16.gmra.mrb[8].mxu1 %v9699_v62  ;;  %v12106_v62 = vld [vmem:[#allocation5 + $0x9e4] ss:$16 sps:$4 sm:$0xff]   ;;  %v12152_v49 = vld [vmem:[#allocation5 + $0xae0] ss:$16 sps:$4 sm:$0xff]  }
 0x192   :  { %6360 = vmatpush1.bf16.msra.mxu0 %v12038_v0  ;;  %7716 = vmatpush1.bf16.msra.mxu1 %v12041_v1  ;;  %v9654_v0 = vcombine.high %v121_v57, %v133_v59  ;;  %v12104_v1 = vld [vmem:[#allocation5 + $0x9e0] ss:$16 sps:$4 sm:$0xff]  }
 0x193   :  { %6361 = vmatprep.subr.bf16.mxu0 %v12046_v2  ;;  %7717 = vmatprep.subr.bf16.mxu1 %v12049_v3  ;;  %v12107_v2 = vld [vmem:[#allocation5 + $0x9e8] ss:$16 sps:$4 sm:$0xff]   ;;  %v12112_v3 = vld [vmem:[#allocation5 + $0xa04] ss:$16 sps:$4 sm:$0xff]  }
 0x194   :  { %6300 = vmatprep.mubr.bf16.mxu0 %v9724_v4  ;;  %7656 = vmatprep.mubr.bf16.mxu1 %v9724_v4  ;;  %v12115_v4 = vld [vmem:[#allocation5 + $0xa0c] ss:$16 sps:$4 sm:$0xff]  }
 0x196   :  { %6362 = vmatpush1.bf16.msra.mxu0 %v12044_v5  ;;  %7718 = vmatpush1.bf16.msra.mxu1 %v12047_v6  ;;  %v145_v5 = vld [vmem:[#allocation2 + $0xe0] sm:$0xff]  ;;  %v9653_v6 = vcombine.low %v121_v57, %v133_v59  ;;  %v12169_v59 = vld [vmem:[#allocation5 + $0xb2c] ss:$16 sps:$4 sm:$0xff]  }
 0x197   :  { %6363 = vmatprep.subr.bf16.mxu0 %v12052_v7  ;;  %7719 = vmatprep.subr.bf16.mxu1 %v12055_v8  ;;  %v157_v7 = vld [vmem:[#allocation2 + $0x140] sm:$0xff] }
 0x198   :  { %v12110_v8 = vld [vmem:[#allocation5 + $0xa00] ss:$16 sps:$4 sm:$0xff]   ;;  %v9678_v12 = vcombine.high %v145_v5, %v157_v7 }
 0x199   :  { %6301 = vmatmul.mubr.bf16.gmra.mrb[12].mxu0 %v9723_v11  ;;  %7657 = vmatmul.mubr.bf16.gmra.mrb[12].mxu1 %v9723_v11  ;;  %v12121_v11 = vld [vmem:[#allocation5 + $0xa2c] ss:$16 sps:$4 sm:$0xff]   ;;  %v253_v57 = vld [vmem:[#allocation2 + $0x440] sm:$0xff] }
 0x19a   :  { %6364 = vmatpush1.bf16.msra.mxu0 %v12050_v9  ;;  %7720 = vmatpush1.bf16.msra.mxu1 %v12053_v10  ;;  %v12113_v9 = vld [vmem:[#allocation5 + $0xa08] ss:$16 sps:$4 sm:$0xff]   ;;  %v12118_v10 = vld [vmem:[#allocation5 + $0xa24] ss:$16 sps:$4 sm:$0xff]  }
 0x19b   :  { %6365 = vmatprep.subr.bf16.mxu0 %v12058_v14  ;;  %7721 = vmatprep.subr.bf16.mxu1 %v12061_v15  ;;  %v12119_v14 = vld [vmem:[#allocation5 + $0xa28] ss:$16 sps:$4 sm:$0xff]   ;;  %v12124_v15 = vld [vmem:[#allocation5 + $0xa44] ss:$16 sps:$4 sm:$0xff]  }
 0x19c   :  { %6310 = vmatprep.mubr.bf16.mxu0 %v9748_v16  ;;  %7666 = vmatprep.mubr.bf16.mxu1 %v9748_v16  ;;  %v12127_v16 = vld [vmem:[#allocation5 + $0xa4c] ss:$16 sps:$4 sm:$0xff]  }
 0x19e   :  { %6366 = vmatpush1.bf16.msra.mxu0 %v12056_v17  ;;  %7722 = vmatpush1.bf16.msra.mxu1 %v12059_v18  ;;  %v12122_v17 = vld [vmem:[#allocation5 + $0xa40] ss:$16 sps:$4 sm:$0xff]   ;;  %v12125_v18 = vld [vmem:[#allocation5 + $0xa48] ss:$16 sps:$4 sm:$0xff]  }
 0x19f   :  { %6367 = vmatprep.subr.bf16.mxu0 %v12064_v19  ;;  %7723 = vmatprep.subr.bf16.mxu1 %v12067_v20  ;;  %v9677_v19 = vcombine.low %v145_v5, %v157_v7  ;;  %v169_v20 = vld [vmem:[#allocation2 + $0x1a0] sm:$0xff]  ;;  %v12173_v5 = vld [vmem:[#allocation5 + $0xb48] ss:$16 sps:$4 sm:$0xff]   ;;  %v12181_v7 = vld [vmem:[#allocation5 + $0xb6c] ss:$16 sps:$4 sm:$0xff]  }
 0x1a1   :  { %6311 = vmatmul.mubr.bf16.gmra.mrb[16].mxu0 %v9747_v22  ;;  %7667 = vmatmul.mubr.bf16.gmra.mrb[16].mxu1 %v9747_v22  ;;  %v12130_v22 = vld [vmem:[#allocation5 + $0xa64] ss:$16 sps:$4 sm:$0xff]  }
 0x1a2   :  { %6368 = vmatpush1.bf16.msra.mxu0 %v12062_v24  ;;  %7724 = vmatpush1.bf16.msra.mxu1 %v12065_v25  ;;  %v9702_v24 = vcombine.high %v169_v20, %v181_v21  ;;  %v12128_v25 = vld [vmem:[#allocation5 + $0xa60] ss:$16 sps:$4 sm:$0xff]  }
 0x1a3   :  { %6369 = vmatprep.subr.bf16.mxu0 %v12070_v26  ;;  %7725 = vmatprep.subr.bf16.mxu1 %v12073_v27  ;;  %v12131_v26 = vld [vmem:[#allocation5 + $0xa68] ss:$16 sps:$4 sm:$0xff]   ;;  %v12136_v27 = vld [vmem:[#allocation5 + $0xa84] ss:$16 sps:$4 sm:$0xff]  }
 0x1a4   :  { %6320 = vmatprep.mubr.bf16.mxu0 %v9772_v28  ;;  %7676 = vmatprep.mubr.bf16.mxu1 %v9772_v28  ;;  %v12139_v28 = vld [vmem:[#allocation5 + $0xa8c] ss:$16 sps:$4 sm:$0xff]  }
 0x1a6   :  { %6370 = vmatpush1.bf16.msra.mxu0 %v12068_v29  ;;  %7726 = vmatpush1.bf16.msra.mxu1 %v12071_v30  ;;  %v193_v29 = vld [vmem:[#allocation2 + $0x260] sm:$0xff]  ;;  %v9701_v30 = vcombine.low %v169_v20, %v181_v21 }
 0x1a7   :  { %6371 = vmatprep.subr.bf16.mxu0 %v12076_v31  ;;  %7727 = vmatprep.subr.bf16.mxu1 %v12079_v32  ;;  %v205_v31 = vld [vmem:[#allocation2 + $0x2c0] sm:$0xff] }
 0x1a8   :  { %v12134_v32 = vld [vmem:[#allocation5 + $0xa80] ss:$16 sps:$4 sm:$0xff]  }
 0x1a9   :  { %6321 = vmatmul.mubr.bf16.gmra.mrb[20].mxu0 %v9771_v34  ;;  %7677 = vmatmul.mubr.bf16.gmra.mrb[20].mxu1 %v9771_v34  ;;  %v12142_v34 = vld [vmem:[#allocation5 + $0xaa4] ss:$16 sps:$4 sm:$0xff]   ;;  %v12188_v21 = vld [vmem:[#allocation5 + $0xba0] ss:$16 sps:$4 sm:$0xff]  }
 0x1aa   :  { %6372 = vmatpush1.bf16.msra.mxu0 %v12074_v36  ;;  %7728 = vmatpush1.bf16.msra.mxu1 %v12077_v37  ;;  %v9726_v36 = vcombine.high %v193_v29, %v205_v31  ;;  %v12140_v37 = vld [vmem:[#allocation5 + $0xaa0] ss:$16 sps:$4 sm:$0xff]  }
 0x1ab   :  { %6373 = vmatprep.subr.bf16.mxu0 %v12082_v38  ;;  %7729 = vmatprep.subr.bf16.mxu1 %v12085_v39  ;;  %v12143_v38 = vld [vmem:[#allocation5 + $0xaa8] ss:$16 sps:$4 sm:$0xff]   ;;  %v12148_v39 = vld [vmem:[#allocation5 + $0xac4] ss:$16 sps:$4 sm:$0xff]  }
 0x1ac   :  { %6330 = vmatprep.mubr.bf16.mxu0 %v9796_v40  ;;  %7686 = vmatprep.mubr.bf16.mxu1 %v9796_v40  ;;  %v12151_v40 = vld [vmem:[#allocation5 + $0xacc] ss:$16 sps:$4 sm:$0xff]  }
 0x1ae   :  { %6374 = vmatpush1.bf16.msra.mxu0 %v12080_v41  ;;  %7730 = vmatpush1.bf16.msra.mxu1 %v12083_v42  ;;  %v217_v41 = vld [vmem:[#allocation2 + $0x320] sm:$0xff]  ;;  %v9725_v42 = vcombine.low %v193_v29, %v205_v31  ;;  %v134_v29 = vld [vmem:[#allocation2 + $0x88] sm:$0xff] }
 0x1af   :  { %6375 = vmatprep.subr.bf16.mxu0 %v12088_v43  ;;  %7731 = vmatprep.subr.bf16.mxu1 %v12091_v44  ;;  %v229_v43 = vld [vmem:[#allocation2 + $0x380] sm:$0xff]  ;;  %v12205_v31 = vld [vmem:[#allocation5 + $0xbec] ss:$16 sps:$4 sm:$0xff]  }
 0x1b0   :  { %v12146_v44 = vld [vmem:[#allocation5 + $0xac0] ss:$16 sps:$4 sm:$0xff]   ;;  %v9750_v48 = vcombine.high %v217_v41, %v229_v43 }
 0x1b1   :  { %6331 = vmatmul.mubr.bf16.gmra.mrb[24].mxu0 %v9795_v47  ;;  %7687 = vmatmul.mubr.bf16.gmra.mrb[24].mxu1 %v9795_v47  ;;  %v12157_v47 = vld [vmem:[#allocation5 + $0xaec] ss:$16 sps:$4 sm:$0xff]  }
 0x1b2   :  { %6376 = vmatpush1.bf16.msra.mxu0 %v12086_v45  ;;  %7732 = vmatpush1.bf16.msra.mxu1 %v12089_v46  ;;  %v12149_v45 = vld [vmem:[#allocation5 + $0xac8] ss:$16 sps:$4 sm:$0xff]   ;;  %v12154_v46 = vld [vmem:[#allocation5 + $0xae4] ss:$16 sps:$4 sm:$0xff]  }
 0x1b3   :  { %6377 = vmatprep.subr.bf16.mxu0 %v12094_v50  ;;  %7733 = vmatprep.subr.bf16.mxu1 %v12097_v51  ;;  %v12155_v50 = vld [vmem:[#allocation5 + $0xae8] ss:$16 sps:$4 sm:$0xff]   ;;  %v12160_v51 = vld [vmem:[#allocation5 + $0xb04] ss:$16 sps:$4 sm:$0xff]  }
 0x1b4   :  { %6340 = vmatprep.mubr.bf16.mxu0 %v9820_v52  ;;  %7696 = vmatprep.mubr.bf16.mxu1 %v9820_v52  ;;  %v12163_v52 = vld [vmem:[#allocation5 + $0xb0c] ss:$16 sps:$4 sm:$0xff]  }
 0x1b6   :  { %6378 = vmatpush1.bf16.msra.mxu0 %v12092_v53  ;;  %7734 = vmatpush1.bf16.msra.mxu1 %v12095_v54  ;;  %v12158_v53 = vld [vmem:[#allocation5 + $0xb00] ss:$16 sps:$4 sm:$0xff]   ;;  %v12161_v54 = vld [vmem:[#allocation5 + $0xb08] ss:$16 sps:$4 sm:$0xff]  }
 0x1b7   :  { %6379 = vmatprep.subr.bf16.mxu0 %v12100_v55  ;;  %7735 = vmatprep.subr.bf16.mxu1 %v12103_v56  ;;  %v9749_v55 = vcombine.low %v217_v41, %v229_v43  ;;  %v241_v56 = vld [vmem:[#allocation2 + $0x3e0] sm:$0xff]  ;;  %v158_v41 = vld [vmem:[#allocation2 + $0x148] sm:$0xff] }
 0x1b8   :  { %v12217_v43 = vld [vmem:[#allocation5 + $0xc2c] ss:$16 sps:$4 sm:$0xff]  }
 0x1b9   :  { %6341 = vmatmul.mubr.bf16.gmra.mrb[28].mxu0 %v9819_v58  ;;  %7697 = vmatmul.mubr.bf16.gmra.mrb[28].mxu1 %v9819_v58  ;;  %v12166_v58 = vld [vmem:[#allocation5 + $0xb24] ss:$16 sps:$4 sm:$0xff]  }
 0x1ba   :  { %6380 = vmatpush1.bf16.msra.mxu0 %v12098_v60  ;;  %7736 = vmatpush1.bf16.msra.mxu1 %v12101_v61  ;;  %v9774_v60 = vcombine.high %v241_v56, %v253_v57  ;;  %v12164_v61 = vld [vmem:[#allocation5 + $0xb20] ss:$16 sps:$4 sm:$0xff]  }
 0x1bb   :  { %6381 = vmatprep.subr.bf16.mxu0 %v12106_v62  ;;  %7737 = vmatprep.subr.bf16.mxu1 %v12109_v63  ;;  %v12167_v62 = vld [vmem:[#allocation5 + $0xb28] ss:$16 sps:$4 sm:$0xff]   ;;  %v12172_v63 = vld [vmem:[#allocation5 + $0xb44] ss:$16 sps:$4 sm:$0xff]  }
 0x1bc   :  { %6383 = vmatprep.mubr.bf16.mxu0 %v9654_v0  ;;  %7739 = vmatprep.mubr.bf16.mxu1 %v9654_v0  ;;  %v12175_v0 = vld [vmem:[#allocation5 + $0xb4c] ss:$16 sps:$4 sm:$0xff]  }
 0x1be   :  { %6382 = vmatpush1.bf16.msra.mxu0 %v12104_v1  ;;  %7738 = vmatpush1.bf16.msra.mxu1 %v12107_v2  ;;  %v265_v1 = vld [vmem:[#allocation2 + $0x4a0] sm:$0xff]  ;;  %v9773_v2 = vcombine.low %v241_v56, %v253_v57 }
 0x1bf   :  { %6464 = vmatprep.subr.bf16.mxu0 %v12112_v3  ;;  %7820 = vmatprep.subr.bf16.mxu1 %v12115_v4  ;;  %v277_v3 = vld [vmem:[#allocation2 + $0x500] sm:$0xff] }
 0x1c0   :  { %v12170_v4 = vld [vmem:[#allocation5 + $0xb40] ss:$16 sps:$4 sm:$0xff]  }
 0x1c1   :  { %6384 = vmatmul.mubr.bf16.vlgmr.msra.gmra.mrb[0].mxu0 %v9653_v6  ;;  %7740 = vmatmul.mubr.bf16.vlgmr.msra.gmra.mrb[0].mxu1 %v9653_v6  ;;  %v12178_v6 = vld [vmem:[#allocation5 + $0xb64] ss:$16 sps:$4 sm:$0xff]   ;;  %v12224_v57 = vld [vmem:[#allocation5 + $0xc60] ss:$16 sps:$4 sm:$0xff]  }
 0x1c2   :  { %6465 = vmatpush1.bf16.msra.mxu0 %v12110_v8  ;;  %7821 = vmatpush1.bf16.msra.mxu1 %v12113_v9  ;;  %v9798_v8 = vcombine.high %v265_v1, %v277_v3  ;;  %v12176_v9 = vld [vmem:[#allocation5 + $0xb60] ss:$16 sps:$4 sm:$0xff]  }
 0x1c3   :  { %6466 = vmatprep.subr.bf16.mxu0 %v12118_v10  ;;  %7822 = vmatprep.subr.bf16.mxu1 %v12121_v11  ;;  %v12179_v10 = vld [vmem:[#allocation5 + $0xb68] ss:$16 sps:$4 sm:$0xff]   ;;  %v12184_v11 = vld [vmem:[#allocation5 + $0xb84] ss:$16 sps:$4 sm:$0xff]  }
 0x1c4   :  { %6393 = vmatprep.mubr.bf16.mxu0 %v9678_v12  ;;  %7749 = vmatprep.mubr.bf16.mxu1 %v9678_v12  ;;  %v12187_v12 = vld [vmem:[#allocation5 + $0xb8c] ss:$16 sps:$4 sm:$0xff]  }
 0x1c6   :  { %6467 = vmatpush1.bf16.msra.mxu0 %v12116_v13  ;;  %7823 = vmatpush1.bf16.msra.mxu1 %v12119_v14  ;;  %v12182_v13 = vld [vmem:[#allocation5 + $0xb80] ss:$16 sps:$4 sm:$0xff]   ;;  %v12185_v14 = vld [vmem:[#allocation5 + $0xb88] ss:$16 sps:$4 sm:$0xff]  }
 0x1c7   :  { %6468 = vmatprep.subr.bf16.mxu0 %v12124_v15  ;;  %7824 = vmatprep.subr.bf16.mxu1 %v12127_v16  ;;  %v9797_v15 = vcombine.low %v265_v1, %v277_v3  ;;  %v289_v16 = vld [vmem:[#allocation2 + $0x560] sm:$0xff]  ;;  %v206_v1 = vld [vmem:[#allocation2 + $0x2c8] sm:$0xff] }
 0x1c8   :  { %v12241_v3 = vld [vmem:[#allocation5 + $0xcac] ss:$16 sps:$4 sm:$0xff]  }
 0x1c9   :  { %6394 = vmatmul.mubr.bf16.gmra.mrb[4].mxu0 %v9677_v19  ;;  %7750 = vmatmul.mubr.bf16.gmra.mrb[4].mxu1 %v9677_v19  ;;  %v12193_v19 = vld [vmem:[#allocation5 + $0xbac] ss:$16 sps:$4 sm:$0xff]  }
 0x1ca   :  { %6469 = vmatpush1.bf16.msra.mxu0 %v12122_v17  ;;  %7825 = vmatpush1.bf16.msra.mxu1 %v12125_v18  ;;  %v301_v17 = vld [vmem:[#allocation2 + $0x5c0] sm:$0xff] }
 0x1cb   :  { %6470 = vmatprep.subr.bf16.mxu0 %v12130_v22  ;;  %7826 = vmatprep.subr.bf16.mxu1 %v12133_v23  ;;  %v12190_v18 = vld [vmem:[#allocation5 + $0xba4] ss:$16 sps:$4 sm:$0xff]   ;;  %v9822_v20 = vcombine.high %v289_v16, %v301_v17  ;;  %v12191_v22 = vld [vmem:[#allocation5 + $0xba8] ss:$16 sps:$4 sm:$0xff]  }
 0x1cc   :  { %6403 = vmatprep.mubr.bf16.mxu0 %v9702_v24  ;;  %7759 = vmatprep.mubr.bf16.mxu1 %v9702_v24  ;;  %v12196_v23 = vld [vmem:[#allocation5 + $0xbc4] ss:$16 sps:$4 sm:$0xff]   ;;  %v12199_v24 = vld [vmem:[#allocation5 + $0xbcc] ss:$16 sps:$4 sm:$0xff]  }
 0x1ce   :  { %6471 = vmatpush1.bf16.msra.mxu0 %v12128_v25  ;;  %7827 = vmatpush1.bf16.msra.mxu1 %v12131_v26  ;;  %v12194_v25 = vld [vmem:[#allocation5 + $0xbc0] ss:$16 sps:$4 sm:$0xff]   ;;  %v12197_v26 = vld [vmem:[#allocation5 + $0xbc8] ss:$16 sps:$4 sm:$0xff]  }
 0x1cf   :  { %6472 = vmatprep.subr.bf16.mxu0 %v12136_v27  ;;  %7828 = vmatprep.subr.bf16.mxu1 %v12139_v28  ;;  %v9821_v27 = vcombine.low %v289_v16, %v301_v17  ;;  %v122_v28 = vld [vmem:[#allocation2 + $0x28] sm:$0xff]  ;;  %v12248_v17 = vld [vmem:[#allocation5 + $0xce0] ss:$16 sps:$4 sm:$0xff]  }
 0x1d1   :  { %6404 = vmatmul.mubr.bf16.gmra.mrb[8].mxu0 %v9701_v30  ;;  %7760 = vmatmul.mubr.bf16.gmra.mrb[8].mxu1 %v9701_v30  ;;  %v12202_v30 = vld [vmem:[#allocation5 + $0xbe4] ss:$16 sps:$4 sm:$0xff]  }
 0x1d2   :  { %6473 = vmatpush1.bf16.msra.mxu0 %v12134_v32  ;;  %7829 = vmatpush1.bf16.msra.mxu1 %v12137_v33  ;;  %v9656_v32 = vcombine.high %v122_v28, %v134_v29  ;;  %v12200_v33 = vld [vmem:[#allocation5 + $0xbe0] ss:$16 sps:$4 sm:$0xff]  }
 0x1d3   :  { %6474 = vmatprep.subr.bf16.mxu0 %v12142_v34  ;;  %7830 = vmatprep.subr.bf16.mxu1 %v12145_v35  ;;  %v12203_v34 = vld [vmem:[#allocation5 + $0xbe8] ss:$16 sps:$4 sm:$0xff]   ;;  %v12208_v35 = vld [vmem:[#allocation5 + $0xc04] ss:$16 sps:$4 sm:$0xff]  }
 0x1d4   :  { %6413 = vmatprep.mubr.bf16.mxu0 %v9726_v36  ;;  %7769 = vmatprep.mubr.bf16.mxu1 %v9726_v36  ;;  %v12211_v36 = vld [vmem:[#allocation5 + $0xc0c] ss:$16 sps:$4 sm:$0xff]  }
 0x1d6   :  { %6475 = vmatpush1.bf16.msra.mxu0 %v12140_v37  ;;  %7831 = vmatpush1.bf16.msra.mxu1 %v12143_v38  ;;  %v12206_v37 = vld [vmem:[#allocation5 + $0xc00] ss:$16 sps:$4 sm:$0xff]   ;;  %v12209_v38 = vld [vmem:[#allocation5 + $0xc08] ss:$16 sps:$4 sm:$0xff]  }
 0x1d7   :  { %6476 = vmatprep.subr.bf16.mxu0 %v12148_v39  ;;  %7832 = vmatprep.subr.bf16.mxu1 %v12151_v40  ;;  %v9655_v39 = vcombine.low %v122_v28, %v134_v29  ;;  %v146_v40 = vld [vmem:[#allocation2 + $0xe8] sm:$0xff]  ;;  %v12260_v29 = vld [vmem:[#allocation5 + $0xd20] ss:$16 sps:$4 sm:$0xff]  }
 0x1d9   :  { %6414 = vmatmul.mubr.bf16.gmra.mrb[12].mxu0 %v9725_v42  ;;  %7770 = vmatmul.mubr.bf16.gmra.mrb[12].mxu1 %v9725_v42  ;;  %v12214_v42 = vld [vmem:[#allocation5 + $0xc24] ss:$16 sps:$4 sm:$0xff]  }
 0x1da   :  { %6477 = vmatpush1.bf16.msra.mxu0 %v12146_v44  ;;  %7833 = vmatpush1.bf16.msra.mxu1 %v12149_v45  ;;  %v9680_v44 = vcombine.high %v146_v40, %v158_v41  ;;  %v12212_v45 = vld [vmem:[#allocation5 + $0xc20] ss:$16 sps:$4 sm:$0xff]  }
 0x1db   :  { %6478 = vmatprep.subr.bf16.mxu0 %v12154_v46  ;;  %7834 = vmatprep.subr.bf16.mxu1 %v12157_v47  ;;  %v12215_v46 = vld [vmem:[#allocation5 + $0xc28] ss:$16 sps:$4 sm:$0xff]   ;;  %v12220_v47 = vld [vmem:[#allocation5 + $0xc44] ss:$16 sps:$4 sm:$0xff]  }
 0x1dc   :  { %6423 = vmatprep.mubr.bf16.mxu0 %v9750_v48  ;;  %7779 = vmatprep.mubr.bf16.mxu1 %v9750_v48  ;;  %v12223_v48 = vld [vmem:[#allocation5 + $0xc4c] ss:$16 sps:$4 sm:$0xff]  }
 0x1de   :  { %6479 = vmatpush1.bf16.msra.mxu0 %v12152_v49  ;;  %7835 = vmatpush1.bf16.msra.mxu1 %v12155_v50  ;;  %v12218_v49 = vld [vmem:[#allocation5 + $0xc40] ss:$16 sps:$4 sm:$0xff]   ;;  %v12221_v50 = vld [vmem:[#allocation5 + $0xc48] ss:$16 sps:$4 sm:$0xff]  }
 0x1df   :  { %6480 = vmatprep.subr.bf16.mxu0 %v12160_v51  ;;  %7836 = vmatprep.subr.bf16.mxu1 %v12163_v52  ;;  %v9679_v51 = vcombine.low %v146_v40, %v158_v41  ;;  %v170_v52 = vld [vmem:[#allocation2 + $0x1a8] sm:$0xff]  ;;  %v12272_v41 = vld [vmem:[#allocation5 + $0xd60] ss:$16 sps:$4 sm:$0xff]  }
 0x1e1   :  { %6424 = vmatmul.mubr.bf16.gmra.mrb[16].mxu0 %v9749_v55  ;;  %7780 = vmatmul.mubr.bf16.gmra.mrb[16].mxu1 %v9749_v55  ;;  %v12229_v55 = vld [vmem:[#allocation5 + $0xc6c] ss:$16 sps:$4 sm:$0xff]  }
 0x1e2   :  { %6481 = vmatpush1.bf16.msra.mxu0 %v12158_v53  ;;  %7837 = vmatpush1.bf16.msra.mxu1 %v12161_v54  ;;  %v182_v53 = vld [vmem:[#allocation2 + $0x208] sm:$0xff]  ;;  %v12226_v54 = vld [vmem:[#allocation5 + $0xc64] ss:$16 sps:$4 sm:$0xff]  }
 0x1e3   :  { %6482 = vmatprep.subr.bf16.mxu0 %v12166_v58  ;;  %7838 = vmatprep.subr.bf16.mxu1 %v12169_v59  ;;  %v9704_v56 = vcombine.high %v170_v52, %v182_v53  ;;  %v12227_v58 = vld [vmem:[#allocation5 + $0xc68] ss:$16 sps:$4 sm:$0xff]   ;;  %v12232_v59 = vld [vmem:[#allocation5 + $0xc84] ss:$16 sps:$4 sm:$0xff]  }
 0x1e4   :  { %6433 = vmatprep.mubr.bf16.mxu0 %v9774_v60  ;;  %7789 = vmatprep.mubr.bf16.mxu1 %v9774_v60  ;;  %v12235_v60 = vld [vmem:[#allocation5 + $0xc8c] ss:$16 sps:$4 sm:$0xff]  }
 0x1e6   :  { %6483 = vmatpush1.bf16.msra.mxu0 %v12164_v61  ;;  %7839 = vmatpush1.bf16.msra.mxu1 %v12167_v62  ;;  %v12230_v61 = vld [vmem:[#allocation5 + $0xc80] ss:$16 sps:$4 sm:$0xff]   ;;  %v12233_v62 = vld [vmem:[#allocation5 + $0xc88] ss:$16 sps:$4 sm:$0xff]  }
 0x1e7   :  { %6484 = vmatprep.subr.bf16.mxu0 %v12172_v63  ;;  %7840 = vmatprep.subr.bf16.mxu1 %v12175_v0  ;;  %v9703_v63 = vcombine.low %v170_v52, %v182_v53  ;;  %v194_v0 = vld [vmem:[#allocation2 + $0x268] sm:$0xff]  ;;  %v12284_v53 = vld [vmem:[#allocation5 + $0xda0] ss:$16 sps:$4 sm:$0xff]  }
 0x1e9   :  { %6434 = vmatmul.mubr.bf16.gmra.mrb[20].mxu0 %v9773_v2  ;;  %7790 = vmatmul.mubr.bf16.gmra.mrb[20].mxu1 %v9773_v2  ;;  %v12238_v2 = vld [vmem:[#allocation5 + $0xca4] ss:$16 sps:$4 sm:$0xff]  }
 0x1ea   :  { %6485 = vmatpush1.bf16.msra.mxu0 %v12170_v4  ;;  %7841 = vmatpush1.bf16.msra.mxu1 %v12173_v5  ;;  %v9728_v4 = vcombine.high %v194_v0, %v206_v1  ;;  %v12236_v5 = vld [vmem:[#allocation5 + $0xca0] ss:$16 sps:$4 sm:$0xff]  }
 0x1eb   :  { %6486 = vmatprep.subr.bf16.mxu0 %v12178_v6  ;;  %7842 = vmatprep.subr.bf16.mxu1 %v12181_v7  ;;  %v12239_v6 = vld [vmem:[#allocation5 + $0xca8] ss:$16 sps:$4 sm:$0xff]   ;;  %v12244_v7 = vld [vmem:[#allocation5 + $0xcc4] ss:$16 sps:$4 sm:$0xff]  }
 0x1ec   :  { %6443 = vmatprep.mubr.bf16.mxu0 %v9798_v8  ;;  %7799 = vmatprep.mubr.bf16.mxu1 %v9798_v8  ;;  %v12247_v8 = vld [vmem:[#allocation5 + $0xccc] ss:$16 sps:$4 sm:$0xff]  }
 0x1ee   :  { %6487 = vmatpush1.bf16.msra.mxu0 %v12176_v9  ;;  %7843 = vmatpush1.bf16.msra.mxu1 %v12179_v10  ;;  %v12242_v9 = vld [vmem:[#allocation5 + $0xcc0] ss:$16 sps:$4 sm:$0xff]   ;;  %v12245_v10 = vld [vmem:[#allocation5 + $0xcc8] ss:$16 sps:$4 sm:$0xff]  }
 0x1ef   :  { %6488 = vmatprep.subr.bf16.mxu0 %v12184_v11  ;;  %7844 = vmatprep.subr.bf16.mxu1 %v12187_v12  ;;  %v9727_v11 = vcombine.low %v194_v0, %v206_v1  ;;  %v218_v12 = vld [vmem:[#allocation2 + $0x328] sm:$0xff]  ;;  %v12296_v1 = vld [vmem:[#allocation5 + $0xde0] ss:$16 sps:$4 sm:$0xff]  }
 0x1f1   :  { %6444 = vmatmul.mubr.bf16.gmra.mrb[24].mxu0 %v9797_v15  ;;  %7800 = vmatmul.mubr.bf16.gmra.mrb[24].mxu1 %v9797_v15  ;;  %v12253_v15 = vld [vmem:[#allocation5 + $0xcec] ss:$16 sps:$4 sm:$0xff]  }
 0x1f2   :  { %6489 = vmatpush1.bf16.msra.mxu0 %v12182_v13  ;;  %7845 = vmatpush1.bf16.msra.mxu1 %v12185_v14  ;;  %v230_v13 = vld [vmem:[#allocation2 + $0x388] sm:$0xff]  ;;  %v12250_v14 = vld [vmem:[#allocation5 + $0xce4] ss:$16 sps:$4 sm:$0xff]  }
 0x1f3   :  { %6490 = vmatprep.subr.bf16.mxu0 %v12190_v18  ;;  %7846 = vmatprep.subr.bf16.mxu1 %v12193_v19  ;;  %v9752_v16 = vcombine.high %v218_v12, %v230_v13  ;;  %v12251_v18 = vld [vmem:[#allocation5 + $0xce8] ss:$16 sps:$4 sm:$0xff]   ;;  %v12256_v19 = vld [vmem:[#allocation5 + $0xd04] ss:$16 sps:$4 sm:$0xff]  }
 0x1f4   :  { %6453 = vmatprep.mubr.bf16.mxu0 %v9822_v20  ;;  %7809 = vmatprep.mubr.bf16.mxu1 %v9822_v20  ;;  %v12259_v20 = vld [vmem:[#allocation5 + $0xd0c] ss:$16 sps:$4 sm:$0xff]  }
 0x1f6   :  { %6491 = vmatpush1.bf16.msra.mxu0 %v12188_v21  ;;  %7847 = vmatpush1.bf16.msra.mxu1 %v12191_v22  ;;  %v12254_v21 = vld [vmem:[#allocation5 + $0xd00] ss:$16 sps:$4 sm:$0xff]   ;;  %v12257_v22 = vld [vmem:[#allocation5 + $0xd08] ss:$16 sps:$4 sm:$0xff]  }
 0x1f7   :  { %6492 = vmatprep.subr.bf16.mxu0 %v12196_v23  ;;  %7848 = vmatprep.subr.bf16.mxu1 %v12199_v24  ;;  %v9751_v23 = vcombine.low %v218_v12, %v230_v13  ;;  %v242_v24 = vld [vmem:[#allocation2 + $0x3e8] sm:$0xff]  ;;  %v12308_v13 = vld [vmem:[#allocation5 + $0xe20] ss:$16 sps:$4 sm:$0xff]  }
 0x1f9   :  { %6454 = vmatmul.mubr.bf16.gmra.mrb[28].mxu0 %v9821_v27  ;;  %7810 = vmatmul.mubr.bf16.gmra.mrb[28].mxu1 %v9821_v27  ;;  %v12265_v27 = vld [vmem:[#allocation5 + $0xd2c] ss:$16 sps:$4 sm:$0xff]  }
 0x1fa   :  { %6493 = vmatpush1.bf16.msra.mxu0 %v12194_v25  ;;  %7849 = vmatpush1.bf16.msra.mxu1 %v12197_v26  ;;  %v254_v25 = vld [vmem:[#allocation2 + $0x448] sm:$0xff]  ;;  %v12262_v26 = vld [vmem:[#allocation5 + $0xd24] ss:$16 sps:$4 sm:$0xff]  }
 0x1fb   :  { %6494 = vmatprep.subr.bf16.mxu0 %v12202_v30  ;;  %7850 = vmatprep.subr.bf16.mxu1 %v12205_v31  ;;  %v9776_v28 = vcombine.high %v242_v24, %v254_v25  ;;  %v12263_v30 = vld [vmem:[#allocation5 + $0xd28] ss:$16 sps:$4 sm:$0xff]   ;;  %v12268_v31 = vld [vmem:[#allocation5 + $0xd44] ss:$16 sps:$4 sm:$0xff]  }
 0x1fc   :  { %6496 = vmatprep.mubr.bf16.mxu0 %v9656_v32  ;;  %7852 = vmatprep.mubr.bf16.mxu1 %v9656_v32  ;;  %v12271_v32 = vld [vmem:[#allocation5 + $0xd4c] ss:$16 sps:$4 sm:$0xff]  }
 0x1fe   :  { %6495 = vmatpush1.bf16.msra.mxu0 %v12200_v33  ;;  %7851 = vmatpush1.bf16.msra.mxu1 %v12203_v34  ;;  %v12266_v33 = vld [vmem:[#allocation5 + $0xd40] ss:$16 sps:$4 sm:$0xff]   ;;  %v12269_v34 = vld [vmem:[#allocation5 + $0xd48] ss:$16 sps:$4 sm:$0xff]  }
 0x1ff   :  { %6577 = vmatprep.subr.bf16.mxu0 %v12208_v35  ;;  %7933 = vmatprep.subr.bf16.mxu1 %v12211_v36  ;;  %v9775_v35 = vcombine.low %v242_v24, %v254_v25  ;;  %v266_v36 = vld [vmem:[#allocation2 + $0x4a8] sm:$0xff]  ;;  %v12320_v25 = vld [vmem:[#allocation5 + $0xe60] ss:$16 sps:$4 sm:$0xff]  }
 0x201   :  { %6497 = vmatmul.mubr.bf16.vlgmr.msra.gmra.mrb[0].mxu0 %v9655_v39  ;;  %7853 = vmatmul.mubr.bf16.vlgmr.msra.gmra.mrb[0].mxu1 %v9655_v39  ;;  %v12277_v39 = vld [vmem:[#allocation5 + $0xd6c] ss:$16 sps:$4 sm:$0xff]  }
 0x202   :  { %6578 = vmatpush1.bf16.msra.mxu0 %v12206_v37  ;;  %7934 = vmatpush1.bf16.msra.mxu1 %v12209_v38  ;;  %v278_v37 = vld [vmem:[#allocation2 + $0x508] sm:$0xff]  ;;  %v12274_v38 = vld [vmem:[#allocation5 + $0xd64] ss:$16 sps:$4 sm:$0xff]  }
 0x203   :  { %6579 = vmatprep.subr.bf16.mxu0 %v12214_v42  ;;  %7935 = vmatprep.subr.bf16.mxu1 %v12217_v43  ;;  %v9800_v40 = vcombine.high %v266_v36, %v278_v37  ;;  %v12275_v42 = vld [vmem:[#allocation5 + $0xd68] ss:$16 sps:$4 sm:$0xff]   ;;  %v12280_v43 = vld [vmem:[#allocation5 + $0xd84] ss:$16 sps:$4 sm:$0xff]  }
 0x204   :  { %6506 = vmatprep.mubr.bf16.mxu0 %v9680_v44  ;;  %7862 = vmatprep.mubr.bf16.mxu1 %v9680_v44  ;;  %v12283_v44 = vld [vmem:[#allocation5 + $0xd8c] ss:$16 sps:$4 sm:$0xff]  }
 0x206   :  { %6580 = vmatpush1.bf16.msra.mxu0 %v12212_v45  ;;  %7936 = vmatpush1.bf16.msra.mxu1 %v12215_v46  ;;  %v12278_v45 = vld [vmem:[#allocation5 + $0xd80] ss:$16 sps:$4 sm:$0xff]   ;;  %v12281_v46 = vld [vmem:[#allocation5 + $0xd88] ss:$16 sps:$4 sm:$0xff]  }
 0x207   :  { %6581 = vmatprep.subr.bf16.mxu0 %v12220_v47  ;;  %7937 = vmatprep.subr.bf16.mxu1 %v12223_v48  ;;  %v9799_v47 = vcombine.low %v266_v36, %v278_v37  ;;  %v290_v48 = vld [vmem:[#allocation2 + $0x568] sm:$0xff]  ;;  %v12332_v37 = vld [vmem:[#allocation5 + $0xea0] ss:$16 sps:$4 sm:$0xff]  }
 0x209   :  { %6507 = vmatmul.mubr.bf16.gmra.mrb[4].mxu0 %v9679_v51  ;;  %7863 = vmatmul.mubr.bf16.gmra.mrb[4].mxu1 %v9679_v51  ;;  %v12289_v51 = vld [vmem:[#allocation5 + $0xdac] ss:$16 sps:$4 sm:$0xff]  }
 0x20a   :  { %6582 = vmatpush1.bf16.msra.mxu0 %v12218_v49  ;;  %7938 = vmatpush1.bf16.msra.mxu1 %v12221_v50  ;;  %v302_v49 = vld [vmem:[#allocation2 + $0x5c8] sm:$0xff]  ;;  %v12286_v50 = vld [vmem:[#allocation5 + $0xda4] ss:$16 sps:$4 sm:$0xff]  }
 0x20b   :  { %6583 = vmatprep.subr.bf16.mxu0 %v12226_v54  ;;  %7939 = vmatprep.subr.bf16.mxu1 %v12229_v55  ;;  %v9824_v52 = vcombine.high %v290_v48, %v302_v49  ;;  %v12287_v54 = vld [vmem:[#allocation5 + $0xda8] ss:$16 sps:$4 sm:$0xff]   ;;  %v12292_v55 = vld [vmem:[#allocation5 + $0xdc4] ss:$16 sps:$4 sm:$0xff]  }
 0x20c   :  { %6516 = vmatprep.mubr.bf16.mxu0 %v9704_v56  ;;  %7872 = vmatprep.mubr.bf16.mxu1 %v9704_v56  ;;  %v12295_v56 = vld [vmem:[#allocation5 + $0xdcc] ss:$16 sps:$4 sm:$0xff]  }
 0x20e   :  { %6584 = vmatpush1.bf16.msra.mxu0 %v12224_v57  ;;  %7940 = vmatpush1.bf16.msra.mxu1 %v12227_v58  ;;  %v12290_v57 = vld [vmem:[#allocation5 + $0xdc0] ss:$16 sps:$4 sm:$0xff]   ;;  %v12293_v58 = vld [vmem:[#allocation5 + $0xdc8] ss:$16 sps:$4 sm:$0xff]  }
 0x20f   :  { %6585 = vmatprep.subr.bf16.mxu0 %v12232_v59  ;;  %7941 = vmatprep.subr.bf16.mxu1 %v12235_v60  ;;  %v9823_v59 = vcombine.low %v290_v48, %v302_v49  ;;  %v123_v60 = vld [vmem:[#allocation2 + $0x30] sm:$0xff] }
 0x210   :  { %v12344_v49 = vld [vmem:[#allocation5 + $0xee0] ss:$16 sps:$4 sm:$0xff]  }
 0x211   :  { %6517 = vmatmul.mubr.bf16.gmra.mrb[8].mxu0 %v9703_v63  ;;  %7873 = vmatmul.mubr.bf16.gmra.mrb[8].mxu1 %v9703_v63  ;;  %v12301_v63 = vld [vmem:[#allocation5 + $0xdec] ss:$16 sps:$4 sm:$0xff]  }
 0x212   :  { %6586 = vmatpush1.bf16.msra.mxu0 %v12230_v61  ;;  %7942 = vmatpush1.bf16.msra.mxu1 %v12233_v62  ;;  %v135_v61 = vld [vmem:[#allocation2 + $0x90] sm:$0xff] }
 0x213   :  { %6587 = vmatprep.subr.bf16.mxu0 %v12238_v2  ;;  %7943 = vmatprep.subr.bf16.mxu1 %v12241_v3  ;;  %v12298_v62 = vld [vmem:[#allocation5 + $0xde4] ss:$16 sps:$4 sm:$0xff]   ;;  %v9658_v0 = vcombine.high %v123_v60, %v135_v61  ;;  %v12299_v2 = vld [vmem:[#allocation5 + $0xde8] ss:$16 sps:$4 sm:$0xff]  }
 0x214   :  { %6526 = vmatprep.mubr.bf16.mxu0 %v9728_v4  ;;  %7882 = vmatprep.mubr.bf16.mxu1 %v9728_v4  ;;  %v12304_v3 = vld [vmem:[#allocation5 + $0xe04] ss:$16 sps:$4 sm:$0xff]   ;;  %v12307_v4 = vld [vmem:[#allocation5 + $0xe0c] ss:$16 sps:$4 sm:$0xff]  }
 0x216   :  { %6588 = vmatpush1.bf16.msra.mxu0 %v12236_v5  ;;  %7944 = vmatpush1.bf16.msra.mxu1 %v12239_v6  ;;  %v12302_v5 = vld [vmem:[#allocation5 + $0xe00] ss:$16 sps:$4 sm:$0xff]   ;;  %v12305_v6 = vld [vmem:[#allocation5 + $0xe08] ss:$16 sps:$4 sm:$0xff]  }
 0x217   :  { %6589 = vmatprep.subr.bf16.mxu0 %v12244_v7  ;;  %7945 = vmatprep.subr.bf16.mxu1 %v12247_v8  ;;  %v9657_v7 = vcombine.low %v123_v60, %v135_v61  ;;  %v147_v8 = vld [vmem:[#allocation2 + $0xf0] sm:$0xff] }
 0x218   :  { %v12356_v61 = vld [vmem:[#allocation5 + $0xf20] ss:$16 sps:$4 sm:$0xff]  }
 0x219   :  { %6527 = vmatmul.mubr.bf16.gmra.mrb[12].mxu0 %v9727_v11  ;;  %7883 = vmatmul.mubr.bf16.gmra.mrb[12].mxu1 %v9727_v11  ;;  %v12313_v11 = vld [vmem:[#allocation5 + $0xe2c] ss:$16 sps:$4 sm:$0xff]  }
 0x21a   :  { %6590 = vmatpush1.bf16.msra.mxu0 %v12242_v9  ;;  %7946 = vmatpush1.bf16.msra.mxu1 %v12245_v10  ;;  %v159_v9 = vld [vmem:[#allocation2 + $0x150] sm:$0xff] }
 0x21b   :  { %6591 = vmatprep.subr.bf16.mxu0 %v12250_v14  ;;  %7947 = vmatprep.subr.bf16.mxu1 %v12253_v15  ;;  %v12310_v10 = vld [vmem:[#allocation5 + $0xe24] ss:$16 sps:$4 sm:$0xff]   ;;  %v9682_v12 = vcombine.high %v147_v8, %v159_v9  ;;  %v12311_v14 = vld [vmem:[#allocation5 + $0xe28] ss:$16 sps:$4 sm:$0xff]  }
 0x21c   :  { %6536 = vmatprep.mubr.bf16.mxu0 %v9752_v16  ;;  %7892 = vmatprep.mubr.bf16.mxu1 %v9752_v16  ;;  %v12316_v15 = vld [vmem:[#allocation5 + $0xe44] ss:$16 sps:$4 sm:$0xff]   ;;  %v12319_v16 = vld [vmem:[#allocation5 + $0xe4c] ss:$16 sps:$4 sm:$0xff]  }
 0x21e   :  { %6592 = vmatpush1.bf16.msra.mxu0 %v12248_v17  ;;  %7948 = vmatpush1.bf16.msra.mxu1 %v12251_v18  ;;  %v12314_v17 = vld [vmem:[#allocation5 + $0xe40] ss:$16 sps:$4 sm:$0xff]   ;;  %v12317_v18 = vld [vmem:[#allocation5 + $0xe48] ss:$16 sps:$4 sm:$0xff]  }
 0x21f   :  { %6593 = vmatprep.subr.bf16.mxu0 %v12256_v19  ;;  %7949 = vmatprep.subr.bf16.mxu1 %v12259_v20  ;;  %v9681_v19 = vcombine.low %v147_v8, %v159_v9  ;;  %v171_v20 = vld [vmem:[#allocation2 + $0x1b0] sm:$0xff] }
 0x220   :  { %v12368_v9 = vld [vmem:[#allocation5 + $0xf60] ss:$16 sps:$4 sm:$0xff]  }
 0x221   :  { %6537 = vmatmul.mubr.bf16.gmra.mrb[16].mxu0 %v9751_v23  ;;  %7893 = vmatmul.mubr.bf16.gmra.mrb[16].mxu1 %v9751_v23  ;;  %v12325_v23 = vld [vmem:[#allocation5 + $0xe6c] ss:$16 sps:$4 sm:$0xff]  }
 0x222   :  { %6594 = vmatpush1.bf16.msra.mxu0 %v12254_v21  ;;  %7950 = vmatpush1.bf16.msra.mxu1 %v12257_v22  ;;  %v183_v21 = vld [vmem:[#allocation2 + $0x210] sm:$0xff] }
 0x223   :  { %6595 = vmatprep.subr.bf16.mxu0 %v12262_v26  ;;  %7951 = vmatprep.subr.bf16.mxu1 %v12265_v27  ;;  %v12322_v22 = vld [vmem:[#allocation5 + $0xe64] ss:$16 sps:$4 sm:$0xff]   ;;  %v9706_v24 = vcombine.high %v171_v20, %v183_v21  ;;  %v12323_v26 = vld [vmem:[#allocation5 + $0xe68] ss:$16 sps:$4 sm:$0xff]  }
 0x224   :  { %6546 = vmatprep.mubr.bf16.mxu0 %v9776_v28  ;;  %7902 = vmatprep.mubr.bf16.mxu1 %v9776_v28  ;;  %v12328_v27 = vld [vmem:[#allocation5 + $0xe84] ss:$16 sps:$4 sm:$0xff]   ;;  %v12331_v28 = vld [vmem:[#allocation5 + $0xe8c] ss:$16 sps:$4 sm:$0xff]  }
 0x226   :  { %6596 = vmatpush1.bf16.msra.mxu0 %v12260_v29  ;;  %7952 = vmatpush1.bf16.msra.mxu1 %v12263_v30  ;;  %v12326_v29 = vld [vmem:[#allocation5 + $0xe80] ss:$16 sps:$4 sm:$0xff]   ;;  %v12329_v30 = vld [vmem:[#allocation5 + $0xe88] ss:$16 sps:$4 sm:$0xff]  }
 0x227   :  { %6597 = vmatprep.subr.bf16.mxu0 %v12268_v31  ;;  %7953 = vmatprep.subr.bf16.mxu1 %v12271_v32  ;;  %v9705_v31 = vcombine.low %v171_v20, %v183_v21  ;;  %v195_v32 = vld [vmem:[#allocation2 + $0x270] sm:$0xff] }
 0x228   :  { %v12380_v21 = vld [vmem:[#allocation5 + $0xfa0] ss:$16 sps:$4 sm:$0xff]  }
 0x229   :  { %6547 = vmatmul.mubr.bf16.gmra.mrb[20].mxu0 %v9775_v35  ;;  %7903 = vmatmul.mubr.bf16.gmra.mrb[20].mxu1 %v9775_v35  ;;  %v12337_v35 = vld [vmem:[#allocation5 + $0xeac] ss:$16 sps:$4 sm:$0xff]  }
 0x22a   :  { %6598 = vmatpush1.bf16.msra.mxu0 %v12266_v33  ;;  %7954 = vmatpush1.bf16.msra.mxu1 %v12269_v34  ;;  %v207_v33 = vld [vmem:[#allocation2 + $0x2d0] sm:$0xff] }
 0x22b   :  { %6599 = vmatprep.subr.bf16.mxu0 %v12274_v38  ;;  %7955 = vmatprep.subr.bf16.mxu1 %v12277_v39  ;;  %v12334_v34 = vld [vmem:[#allocation5 + $0xea4] ss:$16 sps:$4 sm:$0xff]   ;;  %v9730_v36 = vcombine.high %v195_v32, %v207_v33  ;;  %v12335_v38 = vld [vmem:[#allocation5 + $0xea8] ss:$16 sps:$4 sm:$0xff]  }
 0x22c   :  { %6556 = vmatprep.mubr.bf16.mxu0 %v9800_v40  ;;  %7912 = vmatprep.mubr.bf16.mxu1 %v9800_v40  ;;  %v12340_v39 = vld [vmem:[#allocation5 + $0xec4] ss:$16 sps:$4 sm:$0xff]   ;;  %v12343_v40 = vld [vmem:[#allocation5 + $0xecc] ss:$16 sps:$4 sm:$0xff]  }
 0x22e   :  { %6600 = vmatpush1.bf16.msra.mxu0 %v12272_v41  ;;  %7956 = vmatpush1.bf16.msra.mxu1 %v12275_v42  ;;  %v12338_v41 = vld [vmem:[#allocation5 + $0xec0] ss:$16 sps:$4 sm:$0xff]   ;;  %v12341_v42 = vld [vmem:[#allocation5 + $0xec8] ss:$16 sps:$4 sm:$0xff]  }
 0x22f   :  { %6601 = vmatprep.subr.bf16.mxu0 %v12280_v43  ;;  %7957 = vmatprep.subr.bf16.mxu1 %v12283_v44  ;;  %v9729_v43 = vcombine.low %v195_v32, %v207_v33  ;;  %v219_v44 = vld [vmem:[#allocation2 + $0x330] sm:$0xff] }
 0x230   :  { %v12392_v33 = vld [vmem:[#allocation5 + $0xfe0] ss:$16 sps:$4 sm:$0xff]  }
 0x231   :  { %6557 = vmatmul.mubr.bf16.gmra.mrb[24].mxu0 %v9799_v47  ;;  %7913 = vmatmul.mubr.bf16.gmra.mrb[24].mxu1 %v9799_v47  ;;  %v12349_v47 = vld [vmem:[#allocation5 + $0xeec] ss:$16 sps:$4 sm:$0xff]  }
 0x232   :  { %6602 = vmatpush1.bf16.msra.mxu0 %v12278_v45  ;;  %7958 = vmatpush1.bf16.msra.mxu1 %v12281_v46  ;;  %v231_v45 = vld [vmem:[#allocation2 + $0x390] sm:$0xff] }
 0x233   :  { %6603 = vmatprep.subr.bf16.mxu0 %v12286_v50  ;;  %7959 = vmatprep.subr.bf16.mxu1 %v12289_v51  ;;  %v12346_v46 = vld [vmem:[#allocation5 + $0xee4] ss:$16 sps:$4 sm:$0xff]   ;;  %v9754_v48 = vcombine.high %v219_v44, %v231_v45  ;;  %v12347_v50 = vld [vmem:[#allocation5 + $0xee8] ss:$16 sps:$4 sm:$0xff]  }
 0x234   :  { %6566 = vmatprep.mubr.bf16.mxu0 %v9824_v52  ;;  %7922 = vmatprep.mubr.bf16.mxu1 %v9824_v52  ;;  %v12352_v51 = vld [vmem:[#allocation5 + $0xf04] ss:$16 sps:$4 sm:$0xff]   ;;  %v12355_v52 = vld [vmem:[#allocation5 + $0xf0c] ss:$16 sps:$4 sm:$0xff]  }
 0x236   :  { %6604 = vmatpush1.bf16.msra.mxu0 %v12284_v53  ;;  %7960 = vmatpush1.bf16.msra.mxu1 %v12287_v54  ;;  %v12350_v53 = vld [vmem:[#allocation5 + $0xf00] ss:$16 sps:$4 sm:$0xff]   ;;  %v12353_v54 = vld [vmem:[#allocation5 + $0xf08] ss:$16 sps:$4 sm:$0xff]  }
 0x237   :  { %6605 = vmatprep.subr.bf16.mxu0 %v12292_v55  ;;  %7961 = vmatprep.subr.bf16.mxu1 %v12295_v56  ;;  %v9753_v55 = vcombine.low %v219_v44, %v231_v45  ;;  %v243_v56 = vld [vmem:[#allocation2 + $0x3f0] sm:$0xff] }
 0x238   :  { %v12404_v45 = vld [vmem:[#allocation5 + $0x1020] ss:$16 sps:$4 sm:$0xff]  }
 0x239   :  { %6567 = vmatmul.mubr.bf16.gmra.mrb[28].mxu0 %v9823_v59  ;;  %7923 = vmatmul.mubr.bf16.gmra.mrb[28].mxu1 %v9823_v59  ;;  %v12361_v59 = vld [vmem:[#allocation5 + $0xf2c] ss:$16 sps:$4 sm:$0xff]  }
 0x23a   :  { %6606 = vmatpush1.bf16.msra.mxu0 %v12290_v57  ;;  %7962 = vmatpush1.bf16.msra.mxu1 %v12293_v58  ;;  %v255_v57 = vld [vmem:[#allocation2 + $0x450] sm:$0xff] }
 0x23b   :  { %6607 = vmatprep.subr.bf16.mxu0 %v12298_v62  ;;  %7963 = vmatprep.subr.bf16.mxu1 %v12301_v63  ;;  %v12358_v58 = vld [vmem:[#allocation5 + $0xf24] ss:$16 sps:$4 sm:$0xff]   ;;  %v9778_v60 = vcombine.high %v243_v56, %v255_v57  ;;  %v12359_v62 = vld [vmem:[#allocation5 + $0xf28] ss:$16 sps:$4 sm:$0xff]  }
 0x23c   :  { %6609 = vmatprep.mubr.bf16.mxu0 %v9658_v0  ;;  %7965 = vmatprep.mubr.bf16.mxu1 %v9658_v0  ;;  %v12364_v63 = vld [vmem:[#allocation5 + $0xf44] ss:$16 sps:$4 sm:$0xff]   ;;  %v12367_v0 = vld [vmem:[#allocation5 + $0xf4c] ss:$16 sps:$4 sm:$0xff]  }
 0x23e   :  { %6608 = vmatpush1.bf16.msra.mxu0 %v12296_v1  ;;  %7964 = vmatpush1.bf16.msra.mxu1 %v12299_v2  ;;  %v12362_v1 = vld [vmem:[#allocation5 + $0xf40] ss:$16 sps:$4 sm:$0xff]   ;;  %v12365_v2 = vld [vmem:[#allocation5 + $0xf48] ss:$16 sps:$4 sm:$0xff]  }
 0x23f   :  { %6690 = vmatprep.subr.bf16.mxu0 %v12304_v3  ;;  %8046 = vmatprep.subr.bf16.mxu1 %v12307_v4  ;;  %v9777_v3 = vcombine.low %v243_v56, %v255_v57  ;;  %v267_v4 = vld [vmem:[#allocation2 + $0x4b0] sm:$0xff] }
 0x240   :  { %v12416_v57 = vld [vmem:[#allocation5 + $0x1060] ss:$16 sps:$4 sm:$0xff]  }
 0x241   :  { %6610 = vmatmul.mubr.bf16.vlgmr.msra.gmra.mrb[0].mxu0 %v9657_v7  ;;  %7966 = vmatmul.mubr.bf16.vlgmr.msra.gmra.mrb[0].mxu1 %v9657_v7  ;;  %v12373_v7 = vld [vmem:[#allocation5 + $0xf6c] ss:$16 sps:$4 sm:$0xff]  }
 0x242   :  { %6691 = vmatpush1.bf16.msra.mxu0 %v12302_v5  ;;  %8047 = vmatpush1.bf16.msra.mxu1 %v12305_v6  ;;  %v279_v5 = vld [vmem:[#allocation2 + $0x510] sm:$0xff] }
 0x243   :  { %6692 = vmatprep.subr.bf16.mxu0 %v12310_v10  ;;  %8048 = vmatprep.subr.bf16.mxu1 %v12313_v11  ;;  %v12370_v6 = vld [vmem:[#allocation5 + $0xf64] ss:$16 sps:$4 sm:$0xff]   ;;  %v9802_v8 = vcombine.high %v267_v4, %v279_v5  ;;  %v12371_v10 = vld [vmem:[#allocation5 + $0xf68] ss:$16 sps:$4 sm:$0xff]  }
 0x244   :  { %6619 = vmatprep.mubr.bf16.mxu0 %v9682_v12  ;;  %7975 = vmatprep.mubr.bf16.mxu1 %v9682_v12  ;;  %v12376_v11 = vld [vmem:[#allocation5 + $0xf84] ss:$16 sps:$4 sm:$0xff]   ;;  %v12379_v12 = vld [vmem:[#allocation5 + $0xf8c] ss:$16 sps:$4 sm:$0xff]  }
 0x246   :  { %6693 = vmatpush1.bf16.msra.mxu0 %v12308_v13  ;;  %8049 = vmatpush1.bf16.msra.mxu1 %v12311_v14  ;;  %v12374_v13 = vld [vmem:[#allocation5 + $0xf80] ss:$16 sps:$4 sm:$0xff]   ;;  %v12377_v14 = vld [vmem:[#allocation5 + $0xf88] ss:$16 sps:$4 sm:$0xff]  }
 0x247   :  { %6694 = vmatprep.subr.bf16.mxu0 %v12316_v15  ;;  %8050 = vmatprep.subr.bf16.mxu1 %v12319_v16  ;;  %v9801_v15 = vcombine.low %v267_v4, %v279_v5  ;;  %v291_v16 = vld [vmem:[#allocation2 + $0x570] sm:$0xff] }
 0x248   :  { %v12428_v5 = vld [vmem:[#allocation5 + $0x10a0] ss:$16 sps:$4 sm:$0xff]  }
 0x249   :  { %6620 = vmatmul.mubr.bf16.gmra.mrb[4].mxu0 %v9681_v19  ;;  %7976 = vmatmul.mubr.bf16.gmra.mrb[4].mxu1 %v9681_v19  ;;  %v12385_v19 = vld [vmem:[#allocation5 + $0xfac] ss:$16 sps:$4 sm:$0xff]  }
 0x24a   :  { %6695 = vmatpush1.bf16.msra.mxu0 %v12314_v17  ;;  %8051 = vmatpush1.bf16.msra.mxu1 %v12317_v18  ;;  %v303_v17 = vld [vmem:[#allocation2 + $0x5d0] sm:$0xff] }
 0x24b   :  { %6696 = vmatprep.subr.bf16.mxu0 %v12322_v22  ;;  %8052 = vmatprep.subr.bf16.mxu1 %v12325_v23  ;;  %v12382_v18 = vld [vmem:[#allocation5 + $0xfa4] ss:$16 sps:$4 sm:$0xff]   ;;  %v9826_v20 = vcombine.high %v291_v16, %v303_v17  ;;  %v12383_v22 = vld [vmem:[#allocation5 + $0xfa8] ss:$16 sps:$4 sm:$0xff]  }
 0x24c   :  { %6629 = vmatprep.mubr.bf16.mxu0 %v9706_v24  ;;  %7985 = vmatprep.mubr.bf16.mxu1 %v9706_v24  ;;  %v12388_v23 = vld [vmem:[#allocation5 + $0xfc4] ss:$16 sps:$4 sm:$0xff]   ;;  %v12391_v24 = vld [vmem:[#allocation5 + $0xfcc] ss:$16 sps:$4 sm:$0xff]  }
 0x24e   :  { %6697 = vmatpush1.bf16.msra.mxu0 %v12320_v25  ;;  %8053 = vmatpush1.bf16.msra.mxu1 %v12323_v26  ;;  %v12386_v25 = vld [vmem:[#allocation5 + $0xfc0] ss:$16 sps:$4 sm:$0xff]   ;;  %v12389_v26 = vld [vmem:[#allocation5 + $0xfc8] ss:$16 sps:$4 sm:$0xff]  }
 0x24f   :  { %6698 = vmatprep.subr.bf16.mxu0 %v12328_v27  ;;  %8054 = vmatprep.subr.bf16.mxu1 %v12331_v28  ;;  %v9825_v27 = vcombine.low %v291_v16, %v303_v17  ;;  %v124_v28 = vld [vmem:[#allocation2 + $0x38] sm:$0xff]  ;;  %v12440_v17 = vld [vmem:[#allocation5 + $0x10e0] ss:$16 sps:$4 sm:$0xff]  }
 0x251   :  { %6630 = vmatmul.mubr.bf16.gmra.mrb[8].mxu0 %v9705_v31  ;;  %7986 = vmatmul.mubr.bf16.gmra.mrb[8].mxu1 %v9705_v31  ;;  %v12397_v31 = vld [vmem:[#allocation5 + $0xfec] ss:$16 sps:$4 sm:$0xff]  }
 0x252   :  { %6699 = vmatpush1.bf16.msra.mxu0 %v12326_v29  ;;  %8055 = vmatpush1.bf16.msra.mxu1 %v12329_v30  ;;  %v136_v29 = vld [vmem:[#allocation2 + $0x98] sm:$0xff]  ;;  %v12394_v30 = vld [vmem:[#allocation5 + $0xfe4] ss:$16 sps:$4 sm:$0xff]  }
 0x253   :  { %6700 = vmatprep.subr.bf16.mxu0 %v12334_v34  ;;  %8056 = vmatprep.subr.bf16.mxu1 %v12337_v35  ;;  %v9660_v32 = vcombine.high %v124_v28, %v136_v29  ;;  %v12395_v34 = vld [vmem:[#allocation5 + $0xfe8] ss:$16 sps:$4 sm:$0xff]   ;;  %v12400_v35 = vld [vmem:[#allocation5 + $0x1004] ss:$16 sps:$4 sm:$0xff]  }
 0x254   :  { %6639 = vmatprep.mubr.bf16.mxu0 %v9730_v36  ;;  %7995 = vmatprep.mubr.bf16.mxu1 %v9730_v36  ;;  %v12403_v36 = vld [vmem:[#allocation5 + $0x100c] ss:$16 sps:$4 sm:$0xff]  }
 0x256   :  { %6701 = vmatpush1.bf16.msra.mxu0 %v12332_v37  ;;  %8057 = vmatpush1.bf16.msra.mxu1 %v12335_v38  ;;  %v12398_v37 = vld [vmem:[#allocation5 + $0x1000] ss:$16 sps:$4 sm:$0xff]   ;;  %v12401_v38 = vld [vmem:[#allocation5 + $0x1008] ss:$16 sps:$4 sm:$0xff]  }
 0x257   :  { %6702 = vmatprep.subr.bf16.mxu0 %v12340_v39  ;;  %8058 = vmatprep.subr.bf16.mxu1 %v12343_v40  ;;  %v9659_v39 = vcombine.low %v124_v28, %v136_v29  ;;  %v148_v40 = vld [vmem:[#allocation2 + $0xf8] sm:$0xff]  ;;  %v12452_v29 = vld [vmem:[#allocation5 + $0x1120] ss:$16 sps:$4 sm:$0xff]  }
 0x259   :  { %6640 = vmatmul.mubr.bf16.gmra.mrb[12].mxu0 %v9729_v43  ;;  %7996 = vmatmul.mubr.bf16.gmra.mrb[12].mxu1 %v9729_v43  ;;  %v12409_v43 = vld [vmem:[#allocation5 + $0x102c] ss:$16 sps:$4 sm:$0xff]  }
 0x25a   :  { %6703 = vmatpush1.bf16.msra.mxu0 %v12338_v41  ;;  %8059 = vmatpush1.bf16.msra.mxu1 %v12341_v42  ;;  %v160_v41 = vld [vmem:[#allocation2 + $0x158] sm:$0xff]  ;;  %v12406_v42 = vld [vmem:[#allocation5 + $0x1024] ss:$16 sps:$4 sm:$0xff]  }
 0x25b   :  { %6704 = vmatprep.subr.bf16.mxu0 %v12346_v46  ;;  %8060 = vmatprep.subr.bf16.mxu1 %v12349_v47  ;;  %v9684_v44 = vcombine.high %v148_v40, %v160_v41  ;;  %v12407_v46 = vld [vmem:[#allocation5 + $0x1028] ss:$16 sps:$4 sm:$0xff]   ;;  %v12412_v47 = vld [vmem:[#allocation5 + $0x1044] ss:$16 sps:$4 sm:$0xff]  }
 0x25c   :  { %6649 = vmatprep.mubr.bf16.mxu0 %v9754_v48  ;;  %8005 = vmatprep.mubr.bf16.mxu1 %v9754_v48  ;;  %v12415_v48 = vld [vmem:[#allocation5 + $0x104c] ss:$16 sps:$4 sm:$0xff]  }
 0x25e   :  { %6705 = vmatpush1.bf16.msra.mxu0 %v12344_v49  ;;  %8061 = vmatpush1.bf16.msra.mxu1 %v12347_v50  ;;  %v12410_v49 = vld [vmem:[#allocation5 + $0x1040] ss:$16 sps:$4 sm:$0xff]   ;;  %v12413_v50 = vld [vmem:[#allocation5 + $0x1048] ss:$16 sps:$4 sm:$0xff]  }
 0x25f   :  { %6706 = vmatprep.subr.bf16.mxu0 %v12352_v51  ;;  %8062 = vmatprep.subr.bf16.mxu1 %v12355_v52  ;;  %v9683_v51 = vcombine.low %v148_v40, %v160_v41  ;;  %v172_v52 = vld [vmem:[#allocation2 + $0x1b8] sm:$0xff]  ;;  %v12464_v41 = vld [vmem:[#allocation5 + $0x1160] ss:$16 sps:$4 sm:$0xff]  }
 0x261   :  { %6650 = vmatmul.mubr.bf16.gmra.mrb[16].mxu0 %v9753_v55  ;;  %8006 = vmatmul.mubr.bf16.gmra.mrb[16].mxu1 %v9753_v55  ;;  %v12421_v55 = vld [vmem:[#allocation5 + $0x106c] ss:$16 sps:$4 sm:$0xff]  }
 0x262   :  { %6707 = vmatpush1.bf16.msra.mxu0 %v12350_v53  ;;  %8063 = vmatpush1.bf16.msra.mxu1 %v12353_v54  ;;  %v184_v53 = vld [vmem:[#allocation2 + $0x218] sm:$0xff]  ;;  %v12418_v54 = vld [vmem:[#allocation5 + $0x1064] ss:$16 sps:$4 sm:$0xff]  }
 0x263   :  { %6708 = vmatprep.subr.bf16.mxu0 %v12358_v58  ;;  %8064 = vmatprep.subr.bf16.mxu1 %v12361_v59  ;;  %v9708_v56 = vcombine.high %v172_v52, %v184_v53  ;;  %v12419_v58 = vld [vmem:[#allocation5 + $0x1068] ss:$16 sps:$4 sm:$0xff]   ;;  %v12424_v59 = vld [vmem:[#allocation5 + $0x1084] ss:$16 sps:$4 sm:$0xff]  }
 0x264   :  { %6659 = vmatprep.mubr.bf16.mxu0 %v9778_v60  ;;  %8015 = vmatprep.mubr.bf16.mxu1 %v9778_v60  ;;  %v12427_v60 = vld [vmem:[#allocation5 + $0x108c] ss:$16 sps:$4 sm:$0xff]  }
 0x266   :  { %6709 = vmatpush1.bf16.msra.mxu0 %v12356_v61  ;;  %8065 = vmatpush1.bf16.msra.mxu1 %v12359_v62  ;;  %v12422_v61 = vld [vmem:[#allocation5 + $0x1080] ss:$16 sps:$4 sm:$0xff]   ;;  %v12425_v62 = vld [vmem:[#allocation5 + $0x1088] ss:$16 sps:$4 sm:$0xff]  }
 0x267   :  { %6710 = vmatprep.subr.bf16.mxu0 %v12364_v63  ;;  %8066 = vmatprep.subr.bf16.mxu1 %v12367_v0  ;;  %v9707_v63 = vcombine.low %v172_v52, %v184_v53  ;;  %v196_v0 = vld [vmem:[#allocation2 + $0x278] sm:$0xff]  ;;  %v12476_v53 = vld [vmem:[#allocation5 + $0x11a0] ss:$16 sps:$4 sm:$0xff]  }
 0x269   :  { %6660 = vmatmul.mubr.bf16.gmra.mrb[20].mxu0 %v9777_v3  ;;  %8016 = vmatmul.mubr.bf16.gmra.mrb[20].mxu1 %v9777_v3  ;;  %v12433_v3 = vld [vmem:[#allocation5 + $0x10ac] ss:$16 sps:$4 sm:$0xff]  }
 0x26a   :  { %6711 = vmatpush1.bf16.msra.mxu0 %v12362_v1  ;;  %8067 = vmatpush1.bf16.msra.mxu1 %v12365_v2  ;;  %v208_v1 = vld [vmem:[#allocation2 + $0x2d8] sm:$0xff]  ;;  %v12430_v2 = vld [vmem:[#allocation5 + $0x10a4] ss:$16 sps:$4 sm:$0xff]  }
 0x26b   :  { %6712 = vmatprep.subr.bf16.mxu0 %v12370_v6  ;;  %8068 = vmatprep.subr.bf16.mxu1 %v12373_v7  ;;  %v9732_v4 = vcombine.high %v196_v0, %v208_v1  ;;  %v12431_v6 = vld [vmem:[#allocation5 + $0x10a8] ss:$16 sps:$4 sm:$0xff]   ;;  %v12436_v7 = vld [vmem:[#allocation5 + $0x10c4] ss:$16 sps:$4 sm:$0xff]  }
 0x26c   :  { %6669 = vmatprep.mubr.bf16.mxu0 %v9802_v8  ;;  %8025 = vmatprep.mubr.bf16.mxu1 %v9802_v8  ;;  %v12439_v8 = vld [vmem:[#allocation5 + $0x10cc] ss:$16 sps:$4 sm:$0xff]  }
 0x26e   :  { %6713 = vmatpush1.bf16.msra.mxu0 %v12368_v9  ;;  %8069 = vmatpush1.bf16.msra.mxu1 %v12371_v10  ;;  %v12434_v9 = vld [vmem:[#allocation5 + $0x10c0] ss:$16 sps:$4 sm:$0xff]   ;;  %v12437_v10 = vld [vmem:[#allocation5 + $0x10c8] ss:$16 sps:$4 sm:$0xff]  }
 0x26f   :  { %6714 = vmatprep.subr.bf16.mxu0 %v12376_v11  ;;  %8070 = vmatprep.subr.bf16.mxu1 %v12379_v12  ;;  %v9731_v11 = vcombine.low %v196_v0, %v208_v1  ;;  %v220_v12 = vld [vmem:[#allocation2 + $0x338] sm:$0xff]  ;;  %v12488_v1 = vld [vmem:[#allocation5 + $0x11e0] ss:$16 sps:$4 sm:$0xff]  }
 0x271   :  { %6670 = vmatmul.mubr.bf16.gmra.mrb[24].mxu0 %v9801_v15  ;;  %8026 = vmatmul.mubr.bf16.gmra.mrb[24].mxu1 %v9801_v15  ;;  %v12445_v15 = vld [vmem:[#allocation5 + $0x10ec] ss:$16 sps:$4 sm:$0xff]  }
 0x272   :  { %6715 = vmatpush1.bf16.msra.mxu0 %v12374_v13  ;;  %8071 = vmatpush1.bf16.msra.mxu1 %v12377_v14  ;;  %v232_v13 = vld [vmem:[#allocation2 + $0x398] sm:$0xff]  ;;  %v12442_v14 = vld [vmem:[#allocation5 + $0x10e4] ss:$16 sps:$4 sm:$0xff]  }
 0x273   :  { %6716 = vmatprep.subr.bf16.mxu0 %v12382_v18  ;;  %8072 = vmatprep.subr.bf16.mxu1 %v12385_v19  ;;  %v9756_v16 = vcombine.high %v220_v12, %v232_v13  ;;  %v12443_v18 = vld [vmem:[#allocation5 + $0x10e8] ss:$16 sps:$4 sm:$0xff]   ;;  %v12448_v19 = vld [vmem:[#allocation5 + $0x1104] ss:$16 sps:$4 sm:$0xff]  }
 0x274   :  { %6679 = vmatprep.mubr.bf16.mxu0 %v9826_v20  ;;  %8035 = vmatprep.mubr.bf16.mxu1 %v9826_v20  ;;  %v12451_v20 = vld [vmem:[#allocation5 + $0x110c] ss:$16 sps:$4 sm:$0xff]  }
 0x276   :  { %6717 = vmatpush1.bf16.msra.mxu0 %v12380_v21  ;;  %8073 = vmatpush1.bf16.msra.mxu1 %v12383_v22  ;;  %v12446_v21 = vld [vmem:[#allocation5 + $0x1100] ss:$16 sps:$4 sm:$0xff]   ;;  %v12449_v22 = vld [vmem:[#allocation5 + $0x1108] ss:$16 sps:$4 sm:$0xff]  }
 0x277   :  { %6718 = vmatprep.subr.bf16.mxu0 %v12388_v23  ;;  %8074 = vmatprep.subr.bf16.mxu1 %v12391_v24  ;;  %v9755_v23 = vcombine.low %v220_v12, %v232_v13  ;;  %v244_v24 = vld [vmem:[#allocation2 + $0x3f8] sm:$0xff]  ;;  %v12500_v13 = vld [vmem:[#allocation5 + $0x1220] ss:$16 sps:$4 sm:$0xff]  }
 0x279   :  { %6680 = vmatmul.mubr.bf16.gmra.mrb[28].mxu0 %v9825_v27  ;;  %8036 = vmatmul.mubr.bf16.gmra.mrb[28].mxu1 %v9825_v27  ;;  %v12457_v27 = vld [vmem:[#allocation5 + $0x112c] ss:$16 sps:$4 sm:$0xff]  }
 0x27a   :  { %6719 = vmatpush1.bf16.msra.mxu0 %v12386_v25  ;;  %8075 = vmatpush1.bf16.msra.mxu1 %v12389_v26  ;;  %v256_v25 = vld [vmem:[#allocation2 + $0x458] sm:$0xff]  ;;  %v12454_v26 = vld [vmem:[#allocation5 + $0x1124] ss:$16 sps:$4 sm:$0xff]  }
 0x27b   :  { %6720 = vmatprep.subr.bf16.mxu0 %v12394_v30  ;;  %8076 = vmatprep.subr.bf16.mxu1 %v12397_v31  ;;  %v9780_v28 = vcombine.high %v244_v24, %v256_v25  ;;  %v12455_v30 = vld [vmem:[#allocation5 + $0x1128] ss:$16 sps:$4 sm:$0xff]   ;;  %v12460_v31 = vld [vmem:[#allocation5 + $0x1144] ss:$16 sps:$4 sm:$0xff]  }
 0x27c   :  { %6722 = vmatprep.mubr.bf16.mxu0 %v9660_v32  ;;  %8078 = vmatprep.mubr.bf16.mxu1 %v9660_v32  ;;  %v12463_v32 = vld [vmem:[#allocation5 + $0x114c] ss:$16 sps:$4 sm:$0xff]  }
 0x27e   :  { %6721 = vmatpush1.bf16.msra.mxu0 %v12392_v33  ;;  %8077 = vmatpush1.bf16.msra.mxu1 %v12395_v34  ;;  %v12458_v33 = vld [vmem:[#allocation5 + $0x1140] ss:$16 sps:$4 sm:$0xff]   ;;  %v12461_v34 = vld [vmem:[#allocation5 + $0x1148] ss:$16 sps:$4 sm:$0xff]  }
 0x27f   :  { %6803 = vmatprep.subr.bf16.mxu0 %v12400_v35  ;;  %8159 = vmatprep.subr.bf16.mxu1 %v12403_v36  ;;  %v9779_v35 = vcombine.low %v244_v24, %v256_v25  ;;  %v268_v36 = vld [vmem:[#allocation2 + $0x4b8] sm:$0xff]  ;;  %v12512_v25 = vld [vmem:[#allocation5 + $0x1260] ss:$16 sps:$4 sm:$0xff]  }
 0x281   :  { %6723 = vmatmul.mubr.bf16.vlgmr.msra.gmra.mrb[0].mxu0 %v9659_v39  ;;  %8079 = vmatmul.mubr.bf16.vlgmr.msra.gmra.mrb[0].mxu1 %v9659_v39  ;;  %v12469_v39 = vld [vmem:[#allocation5 + $0x116c] ss:$16 sps:$4 sm:$0xff]  }
 0x282   :  { %6804 = vmatpush1.bf16.msra.mxu0 %v12398_v37  ;;  %8160 = vmatpush1.bf16.msra.mxu1 %v12401_v38  ;;  %v280_v37 = vld [vmem:[#allocation2 + $0x518] sm:$0xff]  ;;  %v12466_v38 = vld [vmem:[#allocation5 + $0x1164] ss:$16 sps:$4 sm:$0xff]  }
 0x283   :  { %6805 = vmatprep.subr.bf16.mxu0 %v12406_v42  ;;  %8161 = vmatprep.subr.bf16.mxu1 %v12409_v43  ;;  %v9804_v40 = vcombine.high %v268_v36, %v280_v37  ;;  %v12467_v42 = vld [vmem:[#allocation5 + $0x1168] ss:$16 sps:$4 sm:$0xff]   ;;  %v12472_v43 = vld [vmem:[#allocation5 + $0x1184] ss:$16 sps:$4 sm:$0xff]  }
 0x284   :  { %6732 = vmatprep.mubr.bf16.mxu0 %v9684_v44  ;;  %8088 = vmatprep.mubr.bf16.mxu1 %v9684_v44  ;;  %v12475_v44 = vld [vmem:[#allocation5 + $0x118c] ss:$16 sps:$4 sm:$0xff]  }
 0x286   :  { %6806 = vmatpush1.bf16.msra.mxu0 %v12404_v45  ;;  %8162 = vmatpush1.bf16.msra.mxu1 %v12407_v46  ;;  %v12470_v45 = vld [vmem:[#allocation5 + $0x1180] ss:$16 sps:$4 sm:$0xff]   ;;  %v12473_v46 = vld [vmem:[#allocation5 + $0x1188] ss:$16 sps:$4 sm:$0xff]  }
 0x287   :  { %6807 = vmatprep.subr.bf16.mxu0 %v12412_v47  ;;  %8163 = vmatprep.subr.bf16.mxu1 %v12415_v48  ;;  %v9803_v47 = vcombine.low %v268_v36, %v280_v37  ;;  %v292_v48 = vld [vmem:[#allocation2 + $0x578] sm:$0xff]  ;;  %v12524_v37 = vld [vmem:[#allocation5 + $0x12a0] ss:$16 sps:$4 sm:$0xff]  }
 0x289   :  { %6733 = vmatmul.mubr.bf16.gmra.mrb[4].mxu0 %v9683_v51  ;;  %8089 = vmatmul.mubr.bf16.gmra.mrb[4].mxu1 %v9683_v51  ;;  %v12481_v51 = vld [vmem:[#allocation5 + $0x11ac] ss:$16 sps:$4 sm:$0xff]  }
 0x28a   :  { %6808 = vmatpush1.bf16.msra.mxu0 %v12410_v49  ;;  %8164 = vmatpush1.bf16.msra.mxu1 %v12413_v50  ;;  %v304_v49 = vld [vmem:[#allocation2 + $0x5d8] sm:$0xff]  ;;  %v12478_v50 = vld [vmem:[#allocation5 + $0x11a4] ss:$16 sps:$4 sm:$0xff]  }
 0x28b   :  { %6809 = vmatprep.subr.bf16.mxu0 %v12418_v54  ;;  %8165 = vmatprep.subr.bf16.mxu1 %v12421_v55  ;;  %v9828_v52 = vcombine.high %v292_v48, %v304_v49  ;;  %v12479_v54 = vld [vmem:[#allocation5 + $0x11a8] ss:$16 sps:$4 sm:$0xff]   ;;  %v12484_v55 = vld [vmem:[#allocation5 + $0x11c4] ss:$16 sps:$4 sm:$0xff]  }
 0x28c   :  { %6742 = vmatprep.mubr.bf16.mxu0 %v9708_v56  ;;  %8098 = vmatprep.mubr.bf16.mxu1 %v9708_v56  ;;  %v12487_v56 = vld [vmem:[#allocation5 + $0x11cc] ss:$16 sps:$4 sm:$0xff]  }
 0x28e   :  { %6810 = vmatpush1.bf16.msra.mxu0 %v12416_v57  ;;  %8166 = vmatpush1.bf16.msra.mxu1 %v12419_v58  ;;  %v12482_v57 = vld [vmem:[#allocation5 + $0x11c0] ss:$16 sps:$4 sm:$0xff]   ;;  %v12485_v58 = vld [vmem:[#allocation5 + $0x11c8] ss:$16 sps:$4 sm:$0xff]  }
 0x28f   :  { %6811 = vmatprep.subr.bf16.mxu0 %v12424_v59  ;;  %8167 = vmatprep.subr.bf16.mxu1 %v12427_v60  ;;  %v9827_v59 = vcombine.low %v292_v48, %v304_v49  ;;  %v125_v60 = vld [vmem:[#allocation2 + $0x40] sm:$0xff] }
 0x290   :  { %v12536_v49 = vld [vmem:[#allocation5 + $0x12e0] ss:$16 sps:$4 sm:$0xff]  }
 0x291   :  { %6743 = vmatmul.mubr.bf16.gmra.mrb[8].mxu0 %v9707_v63  ;;  %8099 = vmatmul.mubr.bf16.gmra.mrb[8].mxu1 %v9707_v63  ;;  %v12493_v63 = vld [vmem:[#allocation5 + $0x11ec] ss:$16 sps:$4 sm:$0xff]  }
 0x292   :  { %6812 = vmatpush1.bf16.msra.mxu0 %v12422_v61  ;;  %8168 = vmatpush1.bf16.msra.mxu1 %v12425_v62  ;;  %v137_v61 = vld [vmem:[#allocation2 + $0xa0] sm:$0xff] }
 0x293   :  { %6813 = vmatprep.subr.bf16.mxu0 %v12430_v2  ;;  %8169 = vmatprep.subr.bf16.mxu1 %v12433_v3  ;;  %v12490_v62 = vld [vmem:[#allocation5 + $0x11e4] ss:$16 sps:$4 sm:$0xff]   ;;  %v9662_v0 = vcombine.high %v125_v60, %v137_v61  ;;  %v12491_v2 = vld [vmem:[#allocation5 + $0x11e8] ss:$16 sps:$4 sm:$0xff]  }
 0x294   :  { %6752 = vmatprep.mubr.bf16.mxu0 %v9732_v4  ;;  %8108 = vmatprep.mubr.bf16.mxu1 %v9732_v4  ;;  %v12496_v3 = vld [vmem:[#allocation5 + $0x1204] ss:$16 sps:$4 sm:$0xff]   ;;  %v12499_v4 = vld [vmem:[#allocation5 + $0x120c] ss:$16 sps:$4 sm:$0xff]  }
 0x296   :  { %6814 = vmatpush1.bf16.msra.mxu0 %v12428_v5  ;;  %8170 = vmatpush1.bf16.msra.mxu1 %v12431_v6  ;;  %v12494_v5 = vld [vmem:[#allocation5 + $0x1200] ss:$16 sps:$4 sm:$0xff]   ;;  %v9661_v6 = vcombine.low %v125_v60, %v137_v61 }
 0x297   :  { %6815 = vmatprep.subr.bf16.mxu0 %v12436_v7  ;;  %8171 = vmatprep.subr.bf16.mxu1 %v12439_v8  ;;  %v149_v7 = vld [vmem:[#allocation2 + $0x100] sm:$0xff] }
 0x298   :  { %v161_v8 = vld [vmem:[#allocation2 + $0x160] sm:$0xff] }
 0x299   :  { %6753 = vmatmul.mubr.bf16.gmra.mrb[12].mxu0 %v9731_v11  ;;  %8109 = vmatmul.mubr.bf16.gmra.mrb[12].mxu1 %v9731_v11  ;;  %v12505_v11 = vld [vmem:[#allocation5 + $0x122c] ss:$16 sps:$4 sm:$0xff]   ;;  %v9686_v12 = vcombine.high %v149_v7, %v161_v8  ;;  %v12548_v61 = vld [vmem:[#allocation5 + $0x1320] ss:$16 sps:$4 sm:$0xff]  }
 0x29a   :  { %6816 = vmatpush1.bf16.msra.mxu0 %v12434_v9  ;;  %8172 = vmatpush1.bf16.msra.mxu1 %v12437_v10  ;;  %v12497_v9 = vld [vmem:[#allocation5 + $0x1208] ss:$16 sps:$4 sm:$0xff]   ;;  %v12502_v10 = vld [vmem:[#allocation5 + $0x1224] ss:$16 sps:$4 sm:$0xff]  }
 0x29b   :  { %6817 = vmatprep.subr.bf16.mxu0 %v12442_v14  ;;  %8173 = vmatprep.subr.bf16.mxu1 %v12445_v15  ;;  %v12503_v14 = vld [vmem:[#allocation5 + $0x1228] ss:$16 sps:$4 sm:$0xff]   ;;  %v12508_v15 = vld [vmem:[#allocation5 + $0x1244] ss:$16 sps:$4 sm:$0xff]  }
 0x29c   :  { %6762 = vmatprep.mubr.bf16.mxu0 %v9756_v16  ;;  %8118 = vmatprep.mubr.bf16.mxu1 %v9756_v16  ;;  %v12511_v16 = vld [vmem:[#allocation5 + $0x124c] ss:$16 sps:$4 sm:$0xff]  }
 0x29e   :  { %6818 = vmatpush1.bf16.msra.mxu0 %v12440_v17  ;;  %8174 = vmatpush1.bf16.msra.mxu1 %v12443_v18  ;;  %v9685_v17 = vcombine.low %v149_v7, %v161_v8  ;;  %v173_v18 = vld [vmem:[#allocation2 + $0x1c0] sm:$0xff]  ;;  %v12565_v7 = vld [vmem:[#allocation5 + $0x136c] ss:$16 sps:$4 sm:$0xff]  }
 0x29f   :  { %6819 = vmatprep.subr.bf16.mxu0 %v12448_v19  ;;  %8175 = vmatprep.subr.bf16.mxu1 %v12451_v20  ;;  %v185_v19 = vld [vmem:[#allocation2 + $0x220] sm:$0xff] }
 0x2a0   :  { %v12506_v20 = vld [vmem:[#allocation5 + $0x1240] ss:$16 sps:$4 sm:$0xff]   ;;  %v9710_v24 = vcombine.high %v173_v18, %v185_v19 }
 0x2a1   :  { %6763 = vmatmul.mubr.bf16.gmra.mrb[16].mxu0 %v9755_v23  ;;  %8119 = vmatmul.mubr.bf16.gmra.mrb[16].mxu1 %v9755_v23  ;;  %v12517_v23 = vld [vmem:[#allocation5 + $0x126c] ss:$16 sps:$4 sm:$0xff]  }
 0x2a2   :  { %6820 = vmatpush1.bf16.msra.mxu0 %v12446_v21  ;;  %8176 = vmatpush1.bf16.msra.mxu1 %v12449_v22  ;;  %v12509_v21 = vld [vmem:[#allocation5 + $0x1248] ss:$16 sps:$4 sm:$0xff]   ;;  %v12514_v22 = vld [vmem:[#allocation5 + $0x1264] ss:$16 sps:$4 sm:$0xff]  }
 0x2a3   :  { %6821 = vmatprep.subr.bf16.mxu0 %v12454_v26  ;;  %8177 = vmatprep.subr.bf16.mxu1 %v12457_v27  ;;  %v12515_v26 = vld [vmem:[#allocation5 + $0x1268] ss:$16 sps:$4 sm:$0xff]   ;;  %v12520_v27 = vld [vmem:[#allocation5 + $0x1284] ss:$16 sps:$4 sm:$0xff]  }
 0x2a4   :  { %6772 = vmatprep.mubr.bf16.mxu0 %v9780_v28  ;;  %8128 = vmatprep.mubr.bf16.mxu1 %v9780_v28  ;;  %v12523_v28 = vld [vmem:[#allocation5 + $0x128c] ss:$16 sps:$4 sm:$0xff]  }
 0x2a6   :  { %6822 = vmatpush1.bf16.msra.mxu0 %v12452_v29  ;;  %8178 = vmatpush1.bf16.msra.mxu1 %v12455_v30  ;;  %v9709_v29 = vcombine.low %v173_v18, %v185_v19  ;;  %v197_v30 = vld [vmem:[#allocation2 + $0x280] sm:$0xff]  ;;  %v12577_v19 = vld [vmem:[#allocation5 + $0x13ac] ss:$16 sps:$4 sm:$0xff]  }
 0x2a7   :  { %6823 = vmatprep.subr.bf16.mxu0 %v12460_v31  ;;  %8179 = vmatprep.subr.bf16.mxu1 %v12463_v32  ;;  %v209_v31 = vld [vmem:[#allocation2 + $0x2e0] sm:$0xff] }
 0x2a8   :  { %v12518_v32 = vld [vmem:[#allocation5 + $0x1280] ss:$16 sps:$4 sm:$0xff]   ;;  %v9734_v36 = vcombine.high %v197_v30, %v209_v31  ;;  %v12574_v18 = vld [vmem:[#allocation5 + $0x13a4] ss:$16 sps:$4 sm:$0xff]  }
 0x2a9   :  { %6773 = vmatmul.mubr.bf16.gmra.mrb[20].mxu0 %v9779_v35  ;;  %8129 = vmatmul.mubr.bf16.gmra.mrb[20].mxu1 %v9779_v35  ;;  %v12529_v35 = vld [vmem:[#allocation5 + $0x12ac] ss:$16 sps:$4 sm:$0xff]  }
 0x2aa   :  { %6824 = vmatpush1.bf16.msra.mxu0 %v12458_v33  ;;  %8180 = vmatpush1.bf16.msra.mxu1 %v12461_v34  ;;  %v12521_v33 = vld [vmem:[#allocation5 + $0x1288] ss:$16 sps:$4 sm:$0xff]   ;;  %v12526_v34 = vld [vmem:[#allocation5 + $0x12a4] ss:$16 sps:$4 sm:$0xff]  }
 0x2ab   :  { %6825 = vmatprep.subr.bf16.mxu0 %v12466_v38  ;;  %8181 = vmatprep.subr.bf16.mxu1 %v12469_v39  ;;  %v12527_v38 = vld [vmem:[#allocation5 + $0x12a8] ss:$16 sps:$4 sm:$0xff]   ;;  %v12532_v39 = vld [vmem:[#allocation5 + $0x12c4] ss:$16 sps:$4 sm:$0xff]  }
 0x2ac   :  { %6782 = vmatprep.mubr.bf16.mxu0 %v9804_v40  ;;  %8138 = vmatprep.mubr.bf16.mxu1 %v9804_v40  ;;  %v12535_v40 = vld [vmem:[#allocation5 + $0x12cc] ss:$16 sps:$4 sm:$0xff]  }
 0x2ae   :  { %6826 = vmatpush1.bf16.msra.mxu0 %v12464_v41  ;;  %8182 = vmatpush1.bf16.msra.mxu1 %v12467_v42  ;;  %v9733_v41 = vcombine.low %v197_v30, %v209_v31  ;;  %v221_v42 = vld [vmem:[#allocation2 + $0x340] sm:$0xff]  ;;  %v12589_v31 = vld [vmem:[#allocation5 + $0x13ec] ss:$16 sps:$4 sm:$0xff]  }
 0x2af   :  { %6827 = vmatprep.subr.bf16.mxu0 %v12472_v43  ;;  %8183 = vmatprep.subr.bf16.mxu1 %v12475_v44  ;;  %v233_v43 = vld [vmem:[#allocation2 + $0x3a0] sm:$0xff] }
 0x2b0   :  { %v12530_v44 = vld [vmem:[#allocation5 + $0x12c0] ss:$16 sps:$4 sm:$0xff]   ;;  %v9758_v48 = vcombine.high %v221_v42, %v233_v43  ;;  %v12586_v30 = vld [vmem:[#allocation5 + $0x13e4] ss:$16 sps:$4 sm:$0xff]  }
 0x2b1   :  { %6783 = vmatmul.mubr.bf16.gmra.mrb[24].mxu0 %v9803_v47  ;;  %8139 = vmatmul.mubr.bf16.gmra.mrb[24].mxu1 %v9803_v47  ;;  %v12541_v47 = vld [vmem:[#allocation5 + $0x12ec] ss:$16 sps:$4 sm:$0xff]  }
 0x2b2   :  { %6828 = vmatpush1.bf16.msra.mxu0 %v12470_v45  ;;  %8184 = vmatpush1.bf16.msra.mxu1 %v12473_v46  ;;  %v12533_v45 = vld [vmem:[#allocation5 + $0x12c8] ss:$16 sps:$4 sm:$0xff]   ;;  %v12538_v46 = vld [vmem:[#allocation5 + $0x12e4] ss:$16 sps:$4 sm:$0xff]  }
 0x2b3   :  { %6829 = vmatprep.subr.bf16.mxu0 %v12478_v50  ;;  %8185 = vmatprep.subr.bf16.mxu1 %v12481_v51  ;;  %v12539_v50 = vld [vmem:[#allocation5 + $0x12e8] ss:$16 sps:$4 sm:$0xff]   ;;  %v12544_v51 = vld [vmem:[#allocation5 + $0x1304] ss:$16 sps:$4 sm:$0xff]  }
 0x2b4   :  { %6792 = vmatprep.mubr.bf16.mxu0 %v9828_v52  ;;  %8148 = vmatprep.mubr.bf16.mxu1 %v9828_v52  ;;  %v12547_v52 = vld [vmem:[#allocation5 + $0x130c] ss:$16 sps:$4 sm:$0xff]  }
 0x2b6   :  { %6830 = vmatpush1.bf16.msra.mxu0 %v12476_v53  ;;  %8186 = vmatpush1.bf16.msra.mxu1 %v12479_v54  ;;  %v9757_v53 = vcombine.low %v221_v42, %v233_v43  ;;  %v245_v54 = vld [vmem:[#allocation2 + $0x400] sm:$0xff]  ;;  %v12601_v43 = vld [vmem:[#allocation5 + $0x142c] ss:$16 sps:$4 sm:$0xff]  }
 0x2b7   :  { %6831 = vmatprep.subr.bf16.mxu0 %v12484_v55  ;;  %8187 = vmatprep.subr.bf16.mxu1 %v12487_v56  ;;  %v257_v55 = vld [vmem:[#allocation2 + $0x460] sm:$0xff] }
 0x2b8   :  { %v12542_v56 = vld [vmem:[#allocation5 + $0x1300] ss:$16 sps:$4 sm:$0xff]   ;;  %v9782_v60 = vcombine.high %v245_v54, %v257_v55  ;;  %v12598_v42 = vld [vmem:[#allocation5 + $0x1424] ss:$16 sps:$4 sm:$0xff]  }
 0x2b9   :  { %6793 = vmatmul.mubr.bf16.gmra.mrb[28].mxu0 %v9827_v59  ;;  %8149 = vmatmul.mubr.bf16.gmra.mrb[28].mxu1 %v9827_v59  ;;  %v12553_v59 = vld [vmem:[#allocation5 + $0x132c] ss:$16 sps:$4 sm:$0xff]  }
 0x2ba   :  { %6832 = vmatpush1.bf16.msra.mxu0 %v12482_v57  ;;  %8188 = vmatpush1.bf16.msra.mxu1 %v12485_v58  ;;  %v12545_v57 = vld [vmem:[#allocation5 + $0x1308] ss:$16 sps:$4 sm:$0xff]   ;;  %v12550_v58 = vld [vmem:[#allocation5 + $0x1324] ss:$16 sps:$4 sm:$0xff]  }
 0x2bb   :  { %6833 = vmatprep.subr.bf16.mxu0 %v12490_v62  ;;  %8189 = vmatprep.subr.bf16.mxu1 %v12493_v63  ;;  %v12551_v62 = vld [vmem:[#allocation5 + $0x1328] ss:$16 sps:$4 sm:$0xff]   ;;  %v12556_v63 = vld [vmem:[#allocation5 + $0x1344] ss:$16 sps:$4 sm:$0xff]  }
 0x2bc   :  { %6835 = vmatprep.mubr.bf16.mxu0 %v9662_v0  ;;  %8191 = vmatprep.mubr.bf16.mxu1 %v9662_v0  ;;  %v12559_v0 = vld [vmem:[#allocation5 + $0x134c] ss:$16 sps:$4 sm:$0xff]  }
 0x2be   :  { %6834 = vmatpush1.bf16.msra.mxu0 %v12488_v1  ;;  %8190 = vmatpush1.bf16.msra.mxu1 %v12491_v2  ;;  %v9781_v1 = vcombine.low %v245_v54, %v257_v55  ;;  %v269_v2 = vld [vmem:[#allocation2 + $0x4c0] sm:$0xff]  ;;  %v12613_v55 = vld [vmem:[#allocation5 + $0x146c] ss:$16 sps:$4 sm:$0xff]  }
 0x2bf   :  { %6916 = vmatprep.subr.bf16.mxu0 %v12496_v3  ;;  %8272 = vmatprep.subr.bf16.mxu1 %v12499_v4  ;;  %v281_v3 = vld [vmem:[#allocation2 + $0x520] sm:$0xff] }
 0x2c0   :  { %v12554_v4 = vld [vmem:[#allocation5 + $0x1340] ss:$16 sps:$4 sm:$0xff]   ;;  %v9806_v8 = vcombine.high %v269_v2, %v281_v3  ;;  %v12610_v54 = vld [vmem:[#allocation5 + $0x1464] ss:$16 sps:$4 sm:$0xff]  }
 0x2c1   :  { %6836 = vmatmul.mubr.bf16.vlgmr.msra.gmra.mrb[0].mxu0 %v9661_v6  ;;  %8192 = vmatmul.mubr.bf16.vlgmr.msra.gmra.mrb[0].mxu1 %v9661_v6  ;;  %v12562_v6 = vld [vmem:[#allocation5 + $0x1364] ss:$16 sps:$4 sm:$0xff]  }
 0x2c2   :  { %6917 = vmatpush1.bf16.msra.mxu0 %v12494_v5  ;;  %8273 = vmatpush1.bf16.msra.mxu1 %v12497_v9  ;;  %v12557_v5 = vld [vmem:[#allocation5 + $0x1348] ss:$16 sps:$4 sm:$0xff]   ;;  %v12560_v9 = vld [vmem:[#allocation5 + $0x1360] ss:$16 sps:$4 sm:$0xff]  }
 0x2c3   :  { %6918 = vmatprep.subr.bf16.mxu0 %v12502_v10  ;;  %8274 = vmatprep.subr.bf16.mxu1 %v12505_v11  ;;  %v12563_v10 = vld [vmem:[#allocation5 + $0x1368] ss:$16 sps:$4 sm:$0xff]   ;;  %v12568_v11 = vld [vmem:[#allocation5 + $0x1384] ss:$16 sps:$4 sm:$0xff]  }
 0x2c4   :  { %6845 = vmatprep.mubr.bf16.mxu0 %v9686_v12  ;;  %8201 = vmatprep.mubr.bf16.mxu1 %v9686_v12  ;;  %v12571_v12 = vld [vmem:[#allocation5 + $0x138c] ss:$16 sps:$4 sm:$0xff]  }
 0x2c6   :  { %6919 = vmatpush1.bf16.msra.mxu0 %v12500_v13  ;;  %8275 = vmatpush1.bf16.msra.mxu1 %v12503_v14  ;;  %v9805_v13 = vcombine.low %v269_v2, %v281_v3  ;;  %v293_v14 = vld [vmem:[#allocation2 + $0x580] sm:$0xff]  ;;  %v12625_v3 = vld [vmem:[#allocation5 + $0x14ac] ss:$16 sps:$4 sm:$0xff]  }
 0x2c7   :  { %6920 = vmatprep.subr.bf16.mxu0 %v12508_v15  ;;  %8276 = vmatprep.subr.bf16.mxu1 %v12511_v16  ;;  %v305_v15 = vld [vmem:[#allocation2 + $0x5e0] sm:$0xff] }
 0x2c8   :  { %v12566_v16 = vld [vmem:[#allocation5 + $0x1380] ss:$16 sps:$4 sm:$0xff]   ;;  %v12622_v2 = vld [vmem:[#allocation5 + $0x14a4] ss:$16 sps:$4 sm:$0xff]  }
 0x2c9   :  { %6846 = vmatmul.mubr.bf16.gmra.mrb[4].mxu0 %v9685_v17  ;;  %8202 = vmatmul.mubr.bf16.gmra.mrb[4].mxu1 %v9685_v17  ;;  %v12569_v17 = vld [vmem:[#allocation5 + $0x1388] ss:$16 sps:$4 sm:$0xff]  }
 0x2ca   :  { %6921 = vmatpush1.bf16.msra.mxu0 %v12506_v20  ;;  %8277 = vmatpush1.bf16.msra.mxu1 %v12509_v21  ;;  %v9830_v20 = vcombine.high %v293_v14, %v305_v15  ;;  %v12572_v21 = vld [vmem:[#allocation5 + $0x13a0] ss:$16 sps:$4 sm:$0xff]  }
 0x2cb   :  { %6922 = vmatprep.subr.bf16.mxu0 %v12514_v22  ;;  %8278 = vmatprep.subr.bf16.mxu1 %v12517_v23  ;;  %v12575_v22 = vld [vmem:[#allocation5 + $0x13a8] ss:$16 sps:$4 sm:$0xff]   ;;  %v12580_v23 = vld [vmem:[#allocation5 + $0x13c4] ss:$16 sps:$4 sm:$0xff]  }
 0x2cc   :  { %6855 = vmatprep.mubr.bf16.mxu0 %v9710_v24  ;;  %8211 = vmatprep.mubr.bf16.mxu1 %v9710_v24  ;;  %v12583_v24 = vld [vmem:[#allocation5 + $0x13cc] ss:$16 sps:$4 sm:$0xff]  }
 0x2ce   :  { %6923 = vmatpush1.bf16.msra.mxu0 %v12512_v25  ;;  %8279 = vmatpush1.bf16.msra.mxu1 %v12515_v26  ;;  %v9829_v25 = vcombine.low %v293_v14, %v305_v15  ;;  %v126_v26 = vld [vmem:[#allocation2 + $0x48] sm:$0xff]  ;;  %v12634_v14 = vld [vmem:[#allocation5 + $0x14e4] ss:$16 sps:$4 sm:$0xff]  }
 0x2cf   :  { %6924 = vmatprep.subr.bf16.mxu0 %v12520_v27  ;;  %8280 = vmatprep.subr.bf16.mxu1 %v12523_v28  ;;  %v138_v27 = vld [vmem:[#allocation2 + $0xa8] sm:$0xff]  ;;  %v12578_v28 = vld [vmem:[#allocation5 + $0x13c0] ss:$16 sps:$4 sm:$0xff]  }
 0x2d0   :  { %v12637_v15 = vld [vmem:[#allocation5 + $0x14ec] ss:$16 sps:$4 sm:$0xff]  }
 0x2d1   :  { %6856 = vmatmul.mubr.bf16.gmra.mrb[8].mxu0 %v9709_v29  ;;  %8212 = vmatmul.mubr.bf16.gmra.mrb[8].mxu1 %v9709_v29  ;;  %v12581_v29 = vld [vmem:[#allocation5 + $0x13c8] ss:$16 sps:$4 sm:$0xff]  }
 0x2d2   :  { %6925 = vmatpush1.bf16.msra.mxu0 %v12518_v32  ;;  %8281 = vmatpush1.bf16.msra.mxu1 %v12521_v33  ;;  %v9664_v32 = vcombine.high %v126_v26, %v138_v27  ;;  %v12584_v33 = vld [vmem:[#allocation5 + $0x13e0] ss:$16 sps:$4 sm:$0xff]  }
 0x2d3   :  { %6926 = vmatprep.subr.bf16.mxu0 %v12526_v34  ;;  %8282 = vmatprep.subr.bf16.mxu1 %v12529_v35  ;;  %v12587_v34 = vld [vmem:[#allocation5 + $0x13e8] ss:$16 sps:$4 sm:$0xff]   ;;  %v12592_v35 = vld [vmem:[#allocation5 + $0x1404] ss:$16 sps:$4 sm:$0xff]  }
 0x2d4   :  { %6865 = vmatprep.mubr.bf16.mxu0 %v9734_v36  ;;  %8221 = vmatprep.mubr.bf16.mxu1 %v9734_v36  ;;  %v12595_v36 = vld [vmem:[#allocation5 + $0x140c] ss:$16 sps:$4 sm:$0xff]  }
 0x2d6   :  { %6927 = vmatpush1.bf16.msra.mxu0 %v12524_v37  ;;  %8283 = vmatpush1.bf16.msra.mxu1 %v12527_v38  ;;  %v9663_v37 = vcombine.low %v126_v26, %v138_v27  ;;  %v150_v38 = vld [vmem:[#allocation2 + $0x108] sm:$0xff]  ;;  %v12646_v26 = vld [vmem:[#allocation5 + $0x1524] ss:$16 sps:$4 sm:$0xff]  }
 0x2d7   :  { %6928 = vmatprep.subr.bf16.mxu0 %v12532_v39  ;;  %8284 = vmatprep.subr.bf16.mxu1 %v12535_v40  ;;  %v162_v39 = vld [vmem:[#allocation2 + $0x168] sm:$0xff]  ;;  %v12590_v40 = vld [vmem:[#allocation5 + $0x1400] ss:$16 sps:$4 sm:$0xff]  }
 0x2d8   :  { %v12649_v27 = vld [vmem:[#allocation5 + $0x152c] ss:$16 sps:$4 sm:$0xff]  }
 0x2d9   :  { %6866 = vmatmul.mubr.bf16.gmra.mrb[12].mxu0 %v9733_v41  ;;  %8222 = vmatmul.mubr.bf16.gmra.mrb[12].mxu1 %v9733_v41  ;;  %v12593_v41 = vld [vmem:[#allocation5 + $0x1408] ss:$16 sps:$4 sm:$0xff]  }
 0x2da   :  { %6929 = vmatpush1.bf16.msra.mxu0 %v12530_v44  ;;  %8285 = vmatpush1.bf16.msra.mxu1 %v12533_v45  ;;  %v9688_v44 = vcombine.high %v150_v38, %v162_v39  ;;  %v12596_v45 = vld [vmem:[#allocation5 + $0x1420] ss:$16 sps:$4 sm:$0xff]  }
 0x2db   :  { %6930 = vmatprep.subr.bf16.mxu0 %v12538_v46  ;;  %8286 = vmatprep.subr.bf16.mxu1 %v12541_v47  ;;  %v12599_v46 = vld [vmem:[#allocation5 + $0x1428] ss:$16 sps:$4 sm:$0xff]   ;;  %v12604_v47 = vld [vmem:[#allocation5 + $0x1444] ss:$16 sps:$4 sm:$0xff]  }
 0x2dc   :  { %6875 = vmatprep.mubr.bf16.mxu0 %v9758_v48  ;;  %8231 = vmatprep.mubr.bf16.mxu1 %v9758_v48  ;;  %v12607_v48 = vld [vmem:[#allocation5 + $0x144c] ss:$16 sps:$4 sm:$0xff]  }
 0x2de   :  { %6931 = vmatpush1.bf16.msra.mxu0 %v12536_v49  ;;  %8287 = vmatpush1.bf16.msra.mxu1 %v12539_v50  ;;  %v9687_v49 = vcombine.low %v150_v38, %v162_v39  ;;  %v174_v50 = vld [vmem:[#allocation2 + $0x1c8] sm:$0xff]  ;;  %v12658_v38 = vld [vmem:[#allocation5 + $0x1564] ss:$16 sps:$4 sm:$0xff]  }
 0x2df   :  { %6932 = vmatprep.subr.bf16.mxu0 %v12544_v51  ;;  %8288 = vmatprep.subr.bf16.mxu1 %v12547_v52  ;;  %v186_v51 = vld [vmem:[#allocation2 + $0x228] sm:$0xff]  ;;  %v12602_v52 = vld [vmem:[#allocation5 + $0x1440] ss:$16 sps:$4 sm:$0xff]  }
 0x2e0   :  { %v12661_v39 = vld [vmem:[#allocation5 + $0x156c] ss:$16 sps:$4 sm:$0xff]  }
 0x2e1   :  { %6876 = vmatmul.mubr.bf16.gmra.mrb[16].mxu0 %v9757_v53  ;;  %8232 = vmatmul.mubr.bf16.gmra.mrb[16].mxu1 %v9757_v53  ;;  %v12605_v53 = vld [vmem:[#allocation5 + $0x1448] ss:$16 sps:$4 sm:$0xff]  }
 0x2e2   :  { %6933 = vmatpush1.bf16.msra.mxu0 %v12542_v56  ;;  %8289 = vmatpush1.bf16.msra.mxu1 %v12545_v57  ;;  %v9712_v56 = vcombine.high %v174_v50, %v186_v51  ;;  %v12608_v57 = vld [vmem:[#allocation5 + $0x1460] ss:$16 sps:$4 sm:$0xff]  }
 0x2e3   :  { %6934 = vmatprep.subr.bf16.mxu0 %v12550_v58  ;;  %8290 = vmatprep.subr.bf16.mxu1 %v12553_v59  ;;  %v12611_v58 = vld [vmem:[#allocation5 + $0x1468] ss:$16 sps:$4 sm:$0xff]   ;;  %v12616_v59 = vld [vmem:[#allocation5 + $0x1484] ss:$16 sps:$4 sm:$0xff]  }
 0x2e4   :  { %6885 = vmatprep.mubr.bf16.mxu0 %v9782_v60  ;;  %8241 = vmatprep.mubr.bf16.mxu1 %v9782_v60  ;;  %v12619_v60 = vld [vmem:[#allocation5 + $0x148c] ss:$16 sps:$4 sm:$0xff]  }
 0x2e6   :  { %6935 = vmatpush1.bf16.msra.mxu0 %v12548_v61  ;;  %8291 = vmatpush1.bf16.msra.mxu1 %v12551_v62  ;;  %v9711_v61 = vcombine.low %v174_v50, %v186_v51  ;;  %v198_v62 = vld [vmem:[#allocation2 + $0x288] sm:$0xff]  ;;  %v12670_v50 = vld [vmem:[#allocation5 + $0x15a4] ss:$16 sps:$4 sm:$0xff]  }
 0x2e7   :  { %6936 = vmatprep.subr.bf16.mxu0 %v12556_v63  ;;  %8292 = vmatprep.subr.bf16.mxu1 %v12559_v0  ;;  %v210_v63 = vld [vmem:[#allocation2 + $0x2e8] sm:$0xff]  ;;  %v12614_v0 = vld [vmem:[#allocation5 + $0x1480] ss:$16 sps:$4 sm:$0xff]  }
 0x2e8   :  { %v12673_v51 = vld [vmem:[#allocation5 + $0x15ac] ss:$16 sps:$4 sm:$0xff]  }
 0x2e9   :  { %6886 = vmatmul.mubr.bf16.gmra.mrb[20].mxu0 %v9781_v1  ;;  %8242 = vmatmul.mubr.bf16.gmra.mrb[20].mxu1 %v9781_v1  ;;  %v12617_v1 = vld [vmem:[#allocation5 + $0x1488] ss:$16 sps:$4 sm:$0xff]  }
 0x2ea   :  { %6937 = vmatpush1.bf16.msra.mxu0 %v12554_v4  ;;  %8293 = vmatpush1.bf16.msra.mxu1 %v12557_v5  ;;  %v9736_v4 = vcombine.high %v198_v62, %v210_v63  ;;  %v12620_v5 = vld [vmem:[#allocation5 + $0x14a0] ss:$16 sps:$4 sm:$0xff]  }
 0x2eb   :  { %6938 = vmatprep.subr.bf16.mxu0 %v12562_v6  ;;  %8294 = vmatprep.subr.bf16.mxu1 %v12565_v7  ;;  %v12623_v6 = vld [vmem:[#allocation5 + $0x14a8] ss:$16 sps:$4 sm:$0xff]   ;;  %v12628_v7 = vld [vmem:[#allocation5 + $0x14c4] ss:$16 sps:$4 sm:$0xff]  }
 0x2ec   :  { %6895 = vmatprep.mubr.bf16.mxu0 %v9806_v8  ;;  %8251 = vmatprep.mubr.bf16.mxu1 %v9806_v8  ;;  %v12631_v8 = vld [vmem:[#allocation5 + $0x14cc] ss:$16 sps:$4 sm:$0xff]  }
 0x2ee   :  { %6939 = vmatpush1.bf16.msra.mxu0 %v12560_v9  ;;  %8295 = vmatpush1.bf16.msra.mxu1 %v12563_v10  ;;  %v9735_v9 = vcombine.low %v198_v62, %v210_v63  ;;  %v222_v10 = vld [vmem:[#allocation2 + $0x348] sm:$0xff]  ;;  %v12682_v62 = vld [vmem:[#allocation5 + $0x15e4] ss:$16 sps:$4 sm:$0xff]  }
 0x2ef   :  { %6940 = vmatprep.subr.bf16.mxu0 %v12568_v11  ;;  %8296 = vmatprep.subr.bf16.mxu1 %v12571_v12  ;;  %v234_v11 = vld [vmem:[#allocation2 + $0x3a8] sm:$0xff]  ;;  %v12626_v12 = vld [vmem:[#allocation5 + $0x14c0] ss:$16 sps:$4 sm:$0xff]  }
 0x2f0   :  { %v12685_v63 = vld [vmem:[#allocation5 + $0x15ec] ss:$16 sps:$4 sm:$0xff]  }
 0x2f1   :  { %6896 = vmatmul.mubr.bf16.gmra.mrb[24].mxu0 %v9805_v13  ;;  %8252 = vmatmul.mubr.bf16.gmra.mrb[24].mxu1 %v9805_v13  ;;  %v12629_v13 = vld [vmem:[#allocation5 + $0x14c8] ss:$16 sps:$4 sm:$0xff]  }
 0x2f2   :  { %6941 = vmatpush1.bf16.msra.mxu0 %v12566_v16  ;;  %8297 = vmatpush1.bf16.msra.mxu1 %v12569_v17  ;;  %v9760_v16 = vcombine.high %v222_v10, %v234_v11  ;;  %v12632_v17 = vld [vmem:[#allocation5 + $0x14e0] ss:$16 sps:$4 sm:$0xff]  }
 0x2f3   :  { %6942 = vmatprep.subr.bf16.mxu0 %v12574_v18  ;;  %8298 = vmatprep.subr.bf16.mxu1 %v12577_v19  ;;  %v12635_v18 = vld [vmem:[#allocation5 + $0x14e8] ss:$16 sps:$4 sm:$0xff]   ;;  %v12640_v19 = vld [vmem:[#allocation5 + $0x1504] ss:$16 sps:$4 sm:$0xff]  }
 0x2f4   :  { %6905 = vmatprep.mubr.bf16.mxu0 %v9830_v20  ;;  %8261 = vmatprep.mubr.bf16.mxu1 %v9830_v20  ;;  %v12643_v20 = vld [vmem:[#allocation5 + $0x150c] ss:$16 sps:$4 sm:$0xff]  }
 0x2f6   :  { %6943 = vmatpush1.bf16.msra.mxu0 %v12572_v21  ;;  %8299 = vmatpush1.bf16.msra.mxu1 %v12575_v22  ;;  %v9759_v21 = vcombine.low %v222_v10, %v234_v11  ;;  %v246_v22 = vld [vmem:[#allocation2 + $0x408] sm:$0xff]  ;;  %v12694_v10 = vld [vmem:[#allocation5 + $0x1624] ss:$16 sps:$4 sm:$0xff]  }
 0x2f7   :  { %6944 = vmatprep.subr.bf16.mxu0 %v12580_v23  ;;  %8300 = vmatprep.subr.bf16.mxu1 %v12583_v24  ;;  %v258_v23 = vld [vmem:[#allocation2 + $0x468] sm:$0xff]  ;;  %v12638_v24 = vld [vmem:[#allocation5 + $0x1500] ss:$16 sps:$4 sm:$0xff]  }
 0x2f8   :  { %v12697_v11 = vld [vmem:[#allocation5 + $0x162c] ss:$16 sps:$4 sm:$0xff]  }
 0x2f9   :  { %6906 = vmatmul.mubr.bf16.gmra.mrb[28].mxu0 %v9829_v25  ;;  %8262 = vmatmul.mubr.bf16.gmra.mrb[28].mxu1 %v9829_v25  ;;  %v12641_v25 = vld [vmem:[#allocation5 + $0x1508] ss:$16 sps:$4 sm:$0xff]  }
 0x2fa   :  { %6945 = vmatpush1.bf16.msra.mxu0 %v12578_v28  ;;  %8301 = vmatpush1.bf16.msra.mxu1 %v12581_v29  ;;  %v9784_v28 = vcombine.high %v246_v22, %v258_v23  ;;  %v12644_v29 = vld [vmem:[#allocation5 + $0x1520] ss:$16 sps:$4 sm:$0xff]  }
 0x2fb   :  { %6946 = vmatprep.subr.bf16.mxu0 %v12586_v30  ;;  %8302 = vmatprep.subr.bf16.mxu1 %v12589_v31  ;;  %v12647_v30 = vld [vmem:[#allocation5 + $0x1528] ss:$16 sps:$4 sm:$0xff]   ;;  %v12652_v31 = vld [vmem:[#allocation5 + $0x1544] ss:$16 sps:$4 sm:$0xff]  }
 0x2fc   :  { %6948 = vmatprep.mubr.bf16.mxu0 %v9664_v32  ;;  %8304 = vmatprep.mubr.bf16.mxu1 %v9664_v32  ;;  %v12655_v32 = vld [vmem:[#allocation5 + $0x154c] ss:$16 sps:$4 sm:$0xff]  }
 0x2fe   :  { %6947 = vmatpush1.bf16.msra.mxu0 %v12584_v33  ;;  %8303 = vmatpush1.bf16.msra.mxu1 %v12587_v34  ;;  %v9783_v33 = vcombine.low %v246_v22, %v258_v23  ;;  %v270_v34 = vld [vmem:[#allocation2 + $0x4c8] sm:$0xff]  ;;  %v12706_v22 = vld [vmem:[#allocation5 + $0x1664] ss:$16 sps:$4 sm:$0xff]  }
 0x2ff   :  { %7029 = vmatprep.subr.bf16.mxu0 %v12592_v35  ;;  %8385 = vmatprep.subr.bf16.mxu1 %v12595_v36  ;;  %v282_v35 = vld [vmem:[#allocation2 + $0x528] sm:$0xff]  ;;  %v12650_v36 = vld [vmem:[#allocation5 + $0x1540] ss:$16 sps:$4 sm:$0xff]  }
 0x300   :  { %v12709_v23 = vld [vmem:[#allocation5 + $0x166c] ss:$16 sps:$4 sm:$0xff]  }
 0x301   :  { %6949 = vmatmul.mubr.bf16.vlgmr.msra.gmra.mrb[0].mxu0 %v9663_v37  ;;  %8305 = vmatmul.mubr.bf16.vlgmr.msra.gmra.mrb[0].mxu1 %v9663_v37  ;;  %v12653_v37 = vld [vmem:[#allocation5 + $0x1548] ss:$16 sps:$4 sm:$0xff]  }
 0x302   :  { %7030 = vmatpush1.bf16.msra.mxu0 %v12590_v40  ;;  %8386 = vmatpush1.bf16.msra.mxu1 %v12593_v41  ;;  %v9808_v40 = vcombine.high %v270_v34, %v282_v35  ;;  %v12656_v41 = vld [vmem:[#allocation5 + $0x1560] ss:$16 sps:$4 sm:$0xff]  }
 0x303   :  { %7031 = vmatprep.subr.bf16.mxu0 %v12598_v42  ;;  %8387 = vmatprep.subr.bf16.mxu1 %v12601_v43  ;;  %v12659_v42 = vld [vmem:[#allocation5 + $0x1568] ss:$16 sps:$4 sm:$0xff]   ;;  %v12664_v43 = vld [vmem:[#allocation5 + $0x1584] ss:$16 sps:$4 sm:$0xff]  }
 0x304   :  { %6958 = vmatprep.mubr.bf16.mxu0 %v9688_v44  ;;  %8314 = vmatprep.mubr.bf16.mxu1 %v9688_v44  ;;  %v12667_v44 = vld [vmem:[#allocation5 + $0x158c] ss:$16 sps:$4 sm:$0xff]  }
 0x306   :  { %7032 = vmatpush1.bf16.msra.mxu0 %v12596_v45  ;;  %8388 = vmatpush1.bf16.msra.mxu1 %v12599_v46  ;;  %v9807_v45 = vcombine.low %v270_v34, %v282_v35  ;;  %v294_v46 = vld [vmem:[#allocation2 + $0x588] sm:$0xff]  ;;  %v12718_v34 = vld [vmem:[#allocation5 + $0x16a4] ss:$16 sps:$4 sm:$0xff]  }
 0x307   :  { %7033 = vmatprep.subr.bf16.mxu0 %v12604_v47  ;;  %8389 = vmatprep.subr.bf16.mxu1 %v12607_v48  ;;  %v306_v47 = vld [vmem:[#allocation2 + $0x5e8] sm:$0xff]  ;;  %v12662_v48 = vld [vmem:[#allocation5 + $0x1580] ss:$16 sps:$4 sm:$0xff]  }
 0x308   :  { %v12721_v35 = vld [vmem:[#allocation5 + $0x16ac] ss:$16 sps:$4 sm:$0xff]  }
 0x309   :  { %6959 = vmatmul.mubr.bf16.gmra.mrb[4].mxu0 %v9687_v49  ;;  %8315 = vmatmul.mubr.bf16.gmra.mrb[4].mxu1 %v9687_v49  ;;  %v12665_v49 = vld [vmem:[#allocation5 + $0x1588] ss:$16 sps:$4 sm:$0xff]  }
 0x30a   :  { %7034 = vmatpush1.bf16.msra.mxu0 %v12602_v52  ;;  %8390 = vmatpush1.bf16.msra.mxu1 %v12605_v53  ;;  %v9832_v52 = vcombine.high %v294_v46, %v306_v47  ;;  %v12668_v53 = vld [vmem:[#allocation5 + $0x15a0] ss:$16 sps:$4 sm:$0xff]  }
 0x30b   :  { %7035 = vmatprep.subr.bf16.mxu0 %v12610_v54  ;;  %8391 = vmatprep.subr.bf16.mxu1 %v12613_v55  ;;  %v12671_v54 = vld [vmem:[#allocation5 + $0x15a8] ss:$16 sps:$4 sm:$0xff]   ;;  %v12676_v55 = vld [vmem:[#allocation5 + $0x15c4] ss:$16 sps:$4 sm:$0xff]  }
 0x30c   :  { %6968 = vmatprep.mubr.bf16.mxu0 %v9712_v56  ;;  %8324 = vmatprep.mubr.bf16.mxu1 %v9712_v56  ;;  %v12679_v56 = vld [vmem:[#allocation5 + $0x15cc] ss:$16 sps:$4 sm:$0xff]  }
 0x30e   :  { %7036 = vmatpush1.bf16.msra.mxu0 %v12608_v57  ;;  %8392 = vmatpush1.bf16.msra.mxu1 %v12611_v58  ;;  %v9831_v57 = vcombine.low %v294_v46, %v306_v47  ;;  %v127_v58 = vld [vmem:[#allocation2 + $0x50] sm:$0xff]  ;;  %v12733_v47 = vld [vmem:[#allocation5 + $0x16ec] ss:$16 sps:$4 sm:$0xff]  }
 0x30f   :  { %7037 = vmatprep.subr.bf16.mxu0 %v12616_v59  ;;  %8393 = vmatprep.subr.bf16.mxu1 %v12619_v60  ;;  %v139_v59 = vld [vmem:[#allocation2 + $0xb0] sm:$0xff] }
 0x310   :  { %v12674_v60 = vld [vmem:[#allocation5 + $0x15c0] ss:$16 sps:$4 sm:$0xff]   ;;  %v12730_v46 = vld [vmem:[#allocation5 + $0x16e4] ss:$16 sps:$4 sm:$0xff]  }
 0x311   :  { %6969 = vmatmul.mubr.bf16.gmra.mrb[8].mxu0 %v9711_v61  ;;  %8325 = vmatmul.mubr.bf16.gmra.mrb[8].mxu1 %v9711_v61  ;;  %v12677_v61 = vld [vmem:[#allocation5 + $0x15c8] ss:$16 sps:$4 sm:$0xff]  }
 0x312   :  { %7038 = vmatpush1.bf16.msra.mxu0 %v12614_v0  ;;  %8394 = vmatpush1.bf16.msra.mxu1 %v12617_v1  ;;  %v9666_v0 = vcombine.high %v127_v58, %v139_v59  ;;  %v12680_v1 = vld [vmem:[#allocation5 + $0x15e0] ss:$16 sps:$4 sm:$0xff]  }
 0x313   :  { %7039 = vmatprep.subr.bf16.mxu0 %v12622_v2  ;;  %8395 = vmatprep.subr.bf16.mxu1 %v12625_v3  ;;  %v12683_v2 = vld [vmem:[#allocation5 + $0x15e8] ss:$16 sps:$4 sm:$0xff]   ;;  %v12688_v3 = vld [vmem:[#allocation5 + $0x1604] ss:$16 sps:$4 sm:$0xff]  }
 0x314   :  { %6978 = vmatprep.mubr.bf16.mxu0 %v9736_v4  ;;  %8334 = vmatprep.mubr.bf16.mxu1 %v9736_v4  ;;  %v12691_v4 = vld [vmem:[#allocation5 + $0x160c] ss:$16 sps:$4 sm:$0xff]  }
 0x316   :  { %7040 = vmatpush1.bf16.msra.mxu0 %v12620_v5  ;;  %8396 = vmatpush1.bf16.msra.mxu1 %v12623_v6  ;;  %v9665_v5 = vcombine.low %v127_v58, %v139_v59  ;;  %v151_v6 = vld [vmem:[#allocation2 + $0x110] sm:$0xff]  ;;  %v12745_v59 = vld [vmem:[#allocation5 + $0x172c] ss:$16 sps:$4 sm:$0xff]  }
 0x317   :  { %7041 = vmatprep.subr.bf16.mxu0 %v12628_v7  ;;  %8397 = vmatprep.subr.bf16.mxu1 %v12631_v8  ;;  %v163_v7 = vld [vmem:[#allocation2 + $0x170] sm:$0xff] }
 0x318   :  { %v12686_v8 = vld [vmem:[#allocation5 + $0x1600] ss:$16 sps:$4 sm:$0xff]   ;;  %v12742_v58 = vld [vmem:[#allocation5 + $0x1724] ss:$16 sps:$4 sm:$0xff]  }
 0x319   :  { %6979 = vmatmul.mubr.bf16.gmra.mrb[12].mxu0 %v9735_v9  ;;  %8335 = vmatmul.mubr.bf16.gmra.mrb[12].mxu1 %v9735_v9  ;;  %v12689_v9 = vld [vmem:[#allocation5 + $0x1608] ss:$16 sps:$4 sm:$0xff]  }
 0x31a   :  { %7042 = vmatpush1.bf16.msra.mxu0 %v12626_v12  ;;  %8398 = vmatpush1.bf16.msra.mxu1 %v12629_v13  ;;  %v9690_v12 = vcombine.high %v151_v6, %v163_v7  ;;  %v12692_v13 = vld [vmem:[#allocation5 + $0x1620] ss:$16 sps:$4 sm:$0xff]  }
 0x31b   :  { %7043 = vmatprep.subr.bf16.mxu0 %v12634_v14  ;;  %8399 = vmatprep.subr.bf16.mxu1 %v12637_v15  ;;  %v12695_v14 = vld [vmem:[#allocation5 + $0x1628] ss:$16 sps:$4 sm:$0xff]   ;;  %v12700_v15 = vld [vmem:[#allocation5 + $0x1644] ss:$16 sps:$4 sm:$0xff]  }
 0x31c   :  { %6988 = vmatprep.mubr.bf16.mxu0 %v9760_v16  ;;  %8344 = vmatprep.mubr.bf16.mxu1 %v9760_v16  ;;  %v12703_v16 = vld [vmem:[#allocation5 + $0x164c] ss:$16 sps:$4 sm:$0xff]  }
 0x31e   :  { %7044 = vmatpush1.bf16.msra.mxu0 %v12632_v17  ;;  %8400 = vmatpush1.bf16.msra.mxu1 %v12635_v18  ;;  %v9689_v17 = vcombine.low %v151_v6, %v163_v7  ;;  %v175_v18 = vld [vmem:[#allocation2 + $0x1d0] sm:$0xff]  ;;  %v12757_v7 = vld [vmem:[#allocation5 + $0x176c] ss:$16 sps:$4 sm:$0xff]  }
 0x31f   :  { %7045 = vmatprep.subr.bf16.mxu0 %v12640_v19  ;;  %8401 = vmatprep.subr.bf16.mxu1 %v12643_v20  ;;  %v187_v19 = vld [vmem:[#allocation2 + $0x230] sm:$0xff] }
 0x320   :  { %v12698_v20 = vld [vmem:[#allocation5 + $0x1640] ss:$16 sps:$4 sm:$0xff]   ;;  %v12754_v6 = vld [vmem:[#allocation5 + $0x1764] ss:$16 sps:$4 sm:$0xff]  }
 0x321   :  { %6989 = vmatmul.mubr.bf16.gmra.mrb[16].mxu0 %v9759_v21  ;;  %8345 = vmatmul.mubr.bf16.gmra.mrb[16].mxu1 %v9759_v21  ;;  %v12701_v21 = vld [vmem:[#allocation5 + $0x1648] ss:$16 sps:$4 sm:$0xff]  }
 0x322   :  { %7046 = vmatpush1.bf16.msra.mxu0 %v12638_v24  ;;  %8402 = vmatpush1.bf16.msra.mxu1 %v12641_v25  ;;  %v9714_v24 = vcombine.high %v175_v18, %v187_v19  ;;  %v12704_v25 = vld [vmem:[#allocation5 + $0x1660] ss:$16 sps:$4 sm:$0xff]  }
 0x323   :  { %7047 = vmatprep.subr.bf16.mxu0 %v12646_v26  ;;  %8403 = vmatprep.subr.bf16.mxu1 %v12649_v27  ;;  %v12707_v26 = vld [vmem:[#allocation5 + $0x1668] ss:$16 sps:$4 sm:$0xff]   ;;  %v12712_v27 = vld [vmem:[#allocation5 + $0x1684] ss:$16 sps:$4 sm:$0xff]  }
 0x324   :  { %6998 = vmatprep.mubr.bf16.mxu0 %v9784_v28  ;;  %8354 = vmatprep.mubr.bf16.mxu1 %v9784_v28  ;;  %v12715_v28 = vld [vmem:[#allocation5 + $0x168c] ss:$16 sps:$4 sm:$0xff]  }
 0x326   :  { %7048 = vmatpush1.bf16.msra.mxu0 %v12644_v29  ;;  %8404 = vmatpush1.bf16.msra.mxu1 %v12647_v30  ;;  %v9713_v29 = vcombine.low %v175_v18, %v187_v19  ;;  %v199_v30 = vld [vmem:[#allocation2 + $0x290] sm:$0xff]  ;;  %v12769_v19 = vld [vmem:[#allocation5 + $0x17ac] ss:$16 sps:$4 sm:$0xff]  }
 0x327   :  { %7049 = vmatprep.subr.bf16.mxu0 %v12652_v31  ;;  %8405 = vmatprep.subr.bf16.mxu1 %v12655_v32  ;;  %v211_v31 = vld [vmem:[#allocation2 + $0x2f0] sm:$0xff] }
 0x328   :  { %v12710_v32 = vld [vmem:[#allocation5 + $0x1680] ss:$16 sps:$4 sm:$0xff]   ;;  %v12766_v18 = vld [vmem:[#allocation5 + $0x17a4] ss:$16 sps:$4 sm:$0xff]  }
 0x329   :  { %6999 = vmatmul.mubr.bf16.gmra.mrb[20].mxu0 %v9783_v33  ;;  %8355 = vmatmul.mubr.bf16.gmra.mrb[20].mxu1 %v9783_v33  ;;  %v12713_v33 = vld [vmem:[#allocation5 + $0x1688] ss:$16 sps:$4 sm:$0xff]  }
 0x32a   :  { %7050 = vmatpush1.bf16.msra.mxu0 %v12650_v36  ;;  %8406 = vmatpush1.bf16.msra.mxu1 %v12653_v37  ;;  %v9738_v36 = vcombine.high %v199_v30, %v211_v31  ;;  %v12716_v37 = vld [vmem:[#allocation5 + $0x16a0] ss:$16 sps:$4 sm:$0xff]  }
 0x32b   :  { %7051 = vmatprep.subr.bf16.mxu0 %v12658_v38  ;;  %8407 = vmatprep.subr.bf16.mxu1 %v12661_v39  ;;  %v12719_v38 = vld [vmem:[#allocation5 + $0x16a8] ss:$16 sps:$4 sm:$0xff]   ;;  %v12724_v39 = vld [vmem:[#allocation5 + $0x16c4] ss:$16 sps:$4 sm:$0xff]  }
 0x32c   :  { %7008 = vmatprep.mubr.bf16.mxu0 %v9808_v40  ;;  %8364 = vmatprep.mubr.bf16.mxu1 %v9808_v40  ;;  %v12727_v40 = vld [vmem:[#allocation5 + $0x16cc] ss:$16 sps:$4 sm:$0xff]  }
 0x32e   :  { %7052 = vmatpush1.bf16.msra.mxu0 %v12656_v41  ;;  %8408 = vmatpush1.bf16.msra.mxu1 %v12659_v42  ;;  %v9737_v41 = vcombine.low %v199_v30, %v211_v31  ;;  %v223_v42 = vld [vmem:[#allocation2 + $0x350] sm:$0xff]  ;;  %v12781_v31 = vld [vmem:[#allocation5 + $0x17ec] ss:$16 sps:$4 sm:$0xff]  }
 0x32f   :  { %7053 = vmatprep.subr.bf16.mxu0 %v12664_v43  ;;  %8409 = vmatprep.subr.bf16.mxu1 %v12667_v44  ;;  %v235_v43 = vld [vmem:[#allocation2 + $0x3b0] sm:$0xff] }
 0x330   :  { %v12722_v44 = vld [vmem:[#allocation5 + $0x16c0] ss:$16 sps:$4 sm:$0xff]   ;;  %v12778_v30 = vld [vmem:[#allocation5 + $0x17e4] ss:$16 sps:$4 sm:$0xff]  }
 0x331   :  { %7009 = vmatmul.mubr.bf16.gmra.mrb[24].mxu0 %v9807_v45  ;;  %8365 = vmatmul.mubr.bf16.gmra.mrb[24].mxu1 %v9807_v45  ;;  %v12725_v45 = vld [vmem:[#allocation5 + $0x16c8] ss:$16 sps:$4 sm:$0xff]  }
 0x332   :  { %7054 = vmatpush1.bf16.msra.mxu0 %v12662_v48  ;;  %8410 = vmatpush1.bf16.msra.mxu1 %v12665_v49  ;;  %v9762_v48 = vcombine.high %v223_v42, %v235_v43  ;;  %v12728_v49 = vld [vmem:[#allocation5 + $0x16e0] ss:$16 sps:$4 sm:$0xff]  }
 0x333   :  { %7055 = vmatprep.subr.bf16.mxu0 %v12670_v50  ;;  %8411 = vmatprep.subr.bf16.mxu1 %v12673_v51  ;;  %v12731_v50 = vld [vmem:[#allocation5 + $0x16e8] ss:$16 sps:$4 sm:$0xff]   ;;  %v12736_v51 = vld [vmem:[#allocation5 + $0x1704] ss:$16 sps:$4 sm:$0xff]  }
 0x334   :  { %7018 = vmatprep.mubr.bf16.mxu0 %v9832_v52  ;;  %8374 = vmatprep.mubr.bf16.mxu1 %v9832_v52  ;;  %v12739_v52 = vld [vmem:[#allocation5 + $0x170c] ss:$16 sps:$4 sm:$0xff]  }
 0x336   :  { %7056 = vmatpush1.bf16.msra.mxu0 %v12668_v53  ;;  %8412 = vmatpush1.bf16.msra.mxu1 %v12671_v54  ;;  %v9761_v53 = vcombine.low %v223_v42, %v235_v43  ;;  %v247_v54 = vld [vmem:[#allocation2 + $0x410] sm:$0xff]  ;;  %v13225_v42 = vld [vmem:[#allocation8 + $0x100] ss:$8 sps:$4 sm:$0xff]   ;;  %v12787_v43 = vld [vmem:[#allocation8 + $0x14] ss:$8 sps:$4 sm:$0xff]  }
 0x337   :  { %7057 = vmatprep.subr.bf16.mxu0 %v12676_v55  ;;  %8413 = vmatprep.subr.bf16.mxu1 %v12679_v56  ;;  %v259_v55 = vld [vmem:[#allocation2 + $0x470] sm:$0xff] }
 0x338   :  { %v12734_v56 = vld [vmem:[#allocation5 + $0x1700] ss:$16 sps:$4 sm:$0xff]  }
 0x339   :  { %7019 = vmatmul.mubr.bf16.gmra.mrb[28].mxu0 %v9831_v57  ;;  %8375 = vmatmul.mubr.bf16.gmra.mrb[28].mxu1 %v9831_v57  ;;  %v12737_v57 = vld [vmem:[#allocation5 + $0x1708] ss:$16 sps:$4 sm:$0xff]  }
 0x33a   :  { %7058 = vmatpush1.bf16.msra.mxu0 %v12674_v60  ;;  %8414 = vmatpush1.bf16.msra.mxu1 %v12677_v61  ;;  %v9786_v60 = vcombine.high %v247_v54, %v259_v55  ;;  %v12740_v61 = vld [vmem:[#allocation5 + $0x1720] ss:$16 sps:$4 sm:$0xff]  }
 0x33b   :  { %7059 = vmatprep.subr.bf16.mxu0 %v12682_v62  ;;  %8415 = vmatprep.subr.bf16.mxu1 %v12685_v63  ;;  %v12743_v62 = vld [vmem:[#allocation5 + $0x1728] ss:$16 sps:$4 sm:$0xff]   ;;  %v12748_v63 = vld [vmem:[#allocation5 + $0x1744] ss:$16 sps:$4 sm:$0xff]  }
 0x33c   :  { %7061 = vmatprep.mubr.bf16.mxu0 %v9666_v0  ;;  %8417 = vmatprep.mubr.bf16.mxu1 %v9666_v0  ;;  %v12751_v0 = vld [vmem:[#allocation5 + $0x174c] ss:$16 sps:$4 sm:$0xff]  }
 0x33e   :  { %7060 = vmatpush1.bf16.msra.mxu0 %v12680_v1  ;;  %8416 = vmatpush1.bf16.msra.mxu1 %v12683_v2  ;;  %v9785_v1 = vcombine.low %v247_v54, %v259_v55  ;;  %v271_v2 = vld [vmem:[#allocation2 + $0x4d0] sm:$0xff]  ;;  %v13237_v54 = vld [vmem:[#allocation8 + $0x120] ss:$8 sps:$4 sm:$0xff]   ;;  %v12793_v55 = vld [vmem:[#allocation8 + $0x34] ss:$8 sps:$4 sm:$0xff]  }
 0x33f   :  { %7142 = vmatprep.subr.bf16.mxu0 %v12688_v3  ;;  %8498 = vmatprep.subr.bf16.mxu1 %v12691_v4  ;;  %v283_v3 = vld [vmem:[#allocation2 + $0x530] sm:$0xff] }
 0x340   :  { %v12746_v4 = vld [vmem:[#allocation5 + $0x1740] ss:$16 sps:$4 sm:$0xff]  }
 0x341   :  { %7062 = vmatmul.mubr.bf16.vlgmr.msra.gmra.mrb[0].mxu0 %v9665_v5  ;;  %8418 = vmatmul.mubr.bf16.vlgmr.msra.gmra.mrb[0].mxu1 %v9665_v5  ;;  %v12749_v5 = vld [vmem:[#allocation5 + $0x1748] ss:$16 sps:$4 sm:$0xff]  }
 0x342   :  { %7143 = vmatpush1.bf16.msra.mxu0 %v12686_v8  ;;  %8499 = vmatpush1.bf16.msra.mxu1 %v12689_v9  ;;  %v9810_v8 = vcombine.high %v271_v2, %v283_v3  ;;  %v12752_v9 = vld [vmem:[#allocation5 + $0x1760] ss:$16 sps:$4 sm:$0xff]  }
 0x343   :  { %7144 = vmatprep.subr.bf16.mxu0 %v12694_v10  ;;  %8500 = vmatprep.subr.bf16.mxu1 %v12697_v11  ;;  %v12755_v10 = vld [vmem:[#allocation5 + $0x1768] ss:$16 sps:$4 sm:$0xff]   ;;  %v12760_v11 = vld [vmem:[#allocation5 + $0x1784] ss:$16 sps:$4 sm:$0xff]  }
 0x344   :  { %7071 = vmatprep.mubr.bf16.mxu0 %v9690_v12  ;;  %8427 = vmatprep.mubr.bf16.mxu1 %v9690_v12  ;;  %v12763_v12 = vld [vmem:[#allocation5 + $0x178c] ss:$16 sps:$4 sm:$0xff]  }
 0x346   :  { %7145 = vmatpush1.bf16.msra.mxu0 %v12692_v13  ;;  %8501 = vmatpush1.bf16.msra.mxu1 %v12695_v14  ;;  %v9809_v13 = vcombine.low %v271_v2, %v283_v3  ;;  %v295_v14 = vld [vmem:[#allocation2 + $0x590] sm:$0xff]  ;;  %v13249_v2 = vld [vmem:[#allocation8 + $0x140] ss:$8 sps:$4 sm:$0xff]   ;;  %v12799_v3 = vld [vmem:[#allocation8 + $0x54] ss:$8 sps:$4 sm:$0xff]  }
 0x347   :  { %7146 = vmatprep.subr.bf16.mxu0 %v12700_v15  ;;  %8502 = vmatprep.subr.bf16.mxu1 %v12703_v16  ;;  %v307_v15 = vld [vmem:[#allocation2 + $0x5f0] sm:$0xff] }
 0x348   :  { %v12758_v16 = vld [vmem:[#allocation5 + $0x1780] ss:$16 sps:$4 sm:$0xff]  }
 0x349   :  { %7072 = vmatmul.mubr.bf16.gmra.mrb[4].mxu0 %v9689_v17  ;;  %8428 = vmatmul.mubr.bf16.gmra.mrb[4].mxu1 %v9689_v17  ;;  %v12761_v17 = vld [vmem:[#allocation5 + $0x1788] ss:$16 sps:$4 sm:$0xff]  }
 0x34a   :  { %7147 = vmatpush1.bf16.msra.mxu0 %v12698_v20  ;;  %8503 = vmatpush1.bf16.msra.mxu1 %v12701_v21  ;;  %v9834_v20 = vcombine.high %v295_v14, %v307_v15  ;;  %v12764_v21 = vld [vmem:[#allocation5 + $0x17a0] ss:$16 sps:$4 sm:$0xff]  }
 0x34b   :  { %7148 = vmatprep.subr.bf16.mxu0 %v12706_v22  ;;  %8504 = vmatprep.subr.bf16.mxu1 %v12709_v23  ;;  %v12767_v22 = vld [vmem:[#allocation5 + $0x17a8] ss:$16 sps:$4 sm:$0xff]   ;;  %v12772_v23 = vld [vmem:[#allocation5 + $0x17c4] ss:$16 sps:$4 sm:$0xff]  }
 0x34c   :  { %7081 = vmatprep.mubr.bf16.mxu0 %v9714_v24  ;;  %8437 = vmatprep.mubr.bf16.mxu1 %v9714_v24  ;;  %v12775_v24 = vld [vmem:[#allocation5 + $0x17cc] ss:$16 sps:$4 sm:$0xff]  }
 0x34e   :  { %7149 = vmatpush1.bf16.msra.mxu0 %v12704_v25  ;;  %8505 = vmatpush1.bf16.msra.mxu1 %v12707_v26  ;;  %v9833_v25 = vcombine.low %v295_v14, %v307_v15  ;;  %v128_v26 = vld [vmem:[#allocation2 + $0x58] sm:$0xff] }
 0x34f   :  { %7150 = vmatprep.subr.bf16.mxu0 %v12712_v27  ;;  %8506 = vmatprep.subr.bf16.mxu1 %v12715_v28  ;;  %v140_v27 = vld [vmem:[#allocation2 + $0xb8] sm:$0xff]  ;;  %v12770_v28 = vld [vmem:[#allocation5 + $0x17c0] ss:$16 sps:$4 sm:$0xff]  }
 0x350   :  { %v248_v14 = vld [vmem:[#allocation2 + $0x418] sm:$0xff] }
 0x351   :  { %7082 = vmatmul.mubr.bf16.gmra.mrb[8].mxu0 %v9713_v29  ;;  %8438 = vmatmul.mubr.bf16.gmra.mrb[8].mxu1 %v9713_v29  ;;  %v12773_v29 = vld [vmem:[#allocation5 + $0x17c8] ss:$16 sps:$4 sm:$0xff]  }
 0x352   :  { %7151 = vmatpush1.bf16.msra.mxu0 %v12710_v32  ;;  %8507 = vmatpush1.bf16.msra.mxu1 %v12713_v33  ;;  %v9668_v32 = vcombine.high %v128_v26, %v140_v27  ;;  %v12776_v33 = vld [vmem:[#allocation5 + $0x17e0] ss:$16 sps:$4 sm:$0xff]   ;;  %v260_v15 = vld [vmem:[#allocation2 + $0x478] sm:$0xff] }
 0x353   :  { %7152 = vmatprep.subr.bf16.mxu0 %v12718_v34  ;;  %8508 = vmatprep.subr.bf16.mxu1 %v12721_v35  ;;  %v12779_v34 = vld [vmem:[#allocation5 + $0x17e8] ss:$16 sps:$4 sm:$0xff]  }
 0x354   :  { %7091 = vmatprep.mubr.bf16.mxu0 %v9738_v36  ;;  %8447 = vmatprep.mubr.bf16.mxu1 %v9738_v36  ;;  %v152_v35 = vld [vmem:[#allocation2 + $0x118] sm:$0xff] }
 0x355   :  { %v164_v36 = vld [vmem:[#allocation2 + $0x178] sm:$0xff] }
 0x356   :  { %7153 = vmatpush1.bf16.msra.mxu0 %v12716_v37  ;;  %8509 = vmatpush1.bf16.msra.mxu1 %v12719_v38  ;;  %v12784_v37 = vld [vmem:[#allocation8 + $0x4] ss:$8 sps:$4 sm:$0xff]  }
 0x357   :  { %7154 = vmatprep.subr.bf16.mxu0 %v12724_v39  ;;  %8510 = vmatprep.subr.bf16.mxu1 %v12727_v40  ;;  %v13223_v38 = vld [vmem:[#allocation8 + $0x104] ss:$8 sps:$4 sm:$0xff]   ;;  %v9667_v39 = vcombine.low %v128_v26, %v140_v27  ;;  %v9692_v40 = vcombine.high %v152_v35, %v164_v36  ;;  %v9787_v26 = vcombine.low %v248_v14, %v260_v15 }
 0x359   :  { %7092 = vmatmul.mubr.bf16.gmra.mrb[12].mxu0 %v9737_v41  ;;  %8448 = vmatmul.mubr.bf16.gmra.mrb[12].mxu1 %v9737_v41  ;;  %v12782_v41 = vld [vmem:[#allocation8] ss:$8 sps:$4 sm:$0xff]  }
 0x35a   :  { %7155 = vmatpush1.bf16.msra.mxu0 %v12722_v44  ;;  %8511 = vmatpush1.bf16.msra.mxu1 %v12725_v45  ;;  %v13228_v44 = vld [vmem:[#allocation8 + $0x114] ss:$8 sps:$4 sm:$0xff]  }
 0x35b   :  { %7156 = vmatprep.subr.bf16.mxu0 %v12730_v46  ;;  %8512 = vmatprep.subr.bf16.mxu1 %v12733_v47  ;;  %v176_v45 = vld [vmem:[#allocation2 + $0x1d8] sm:$0xff] }
 0x35c   :  { %7101 = vmatprep.mubr.bf16.mxu0 %v9762_v48  ;;  %8457 = vmatprep.mubr.bf16.mxu1 %v9762_v48  ;;  %v188_v46 = vld [vmem:[#allocation2 + $0x238] sm:$0xff] }
 0x35d   :  { %v12785_v47 = vld [vmem:[#allocation8 + $0x10] ss:$8 sps:$4 sm:$0xff]  }
 0x35e   :  { %7157 = vmatpush1.bf16.msra.mxu0 %v12728_v49  ;;  %8513 = vmatpush1.bf16.msra.mxu1 %v12731_v50  ;;  %v13231_v48 = vld [vmem:[#allocation8 + $0x110] ss:$8 sps:$4 sm:$0xff]   ;;  %v12790_v49 = vld [vmem:[#allocation8 + $0x24] ss:$8 sps:$4 sm:$0xff]  }
 0x35f   :  { %7158 = vmatprep.subr.bf16.mxu0 %v12736_v51  ;;  %8514 = vmatprep.subr.bf16.mxu1 %v12739_v52  ;;  %v13234_v50 = vld [vmem:[#allocation8 + $0x124] ss:$8 sps:$4 sm:$0xff]   ;;  %v9691_v51 = vcombine.low %v152_v35, %v164_v36  ;;  %v9716_v52 = vcombine.high %v176_v45, %v188_v46  ;;  %v12830_v36 = vld [vmem:[#allocation8 + $0xc0] ss:$8 sps:$4 sm:$0xff]  }
 0x361   :  { %7102 = vmatmul.mubr.bf16.gmra.mrb[16].mxu0 %v9761_v53  ;;  %8458 = vmatmul.mubr.bf16.gmra.mrb[16].mxu1 %v9761_v53  ;;  %v12788_v53 = vld [vmem:[#allocation8 + $0x20] ss:$8 sps:$4 sm:$0xff]  }
 0x362   :  { %7159 = vmatpush1.bf16.msra.mxu0 %v12734_v56  ;;  %8515 = vmatpush1.bf16.msra.mxu1 %v12737_v57  ;;  %v13240_v56 = vld [vmem:[#allocation8 + $0x134] ss:$8 sps:$4 sm:$0xff]  }
 0x363   :  { %7160 = vmatprep.subr.bf16.mxu0 %v12742_v58  ;;  %8516 = vmatprep.subr.bf16.mxu1 %v12745_v59  ;;  %v200_v57 = vld [vmem:[#allocation2 + $0x298] sm:$0xff] }
 0x364   :  { %7111 = vmatprep.mubr.bf16.mxu0 %v9786_v60  ;;  %8467 = vmatprep.mubr.bf16.mxu1 %v9786_v60  ;;  %v212_v58 = vld [vmem:[#allocation2 + $0x2f8] sm:$0xff] }
 0x365   :  { %v12791_v59 = vld [vmem:[#allocation8 + $0x30] ss:$8 sps:$4 sm:$0xff]  }
 0x366   :  { %7161 = vmatpush1.bf16.msra.mxu0 %v12740_v61  ;;  %8517 = vmatpush1.bf16.msra.mxu1 %v12743_v62  ;;  %v13243_v60 = vld [vmem:[#allocation8 + $0x130] ss:$8 sps:$4 sm:$0xff]   ;;  %v12796_v61 = vld [vmem:[#allocation8 + $0x44] ss:$8 sps:$4 sm:$0xff]  }
 0x367   :  { %7162 = vmatprep.subr.bf16.mxu0 %v12748_v63  ;;  %8518 = vmatprep.subr.bf16.mxu1 %v12751_v0  ;;  %v13246_v62 = vld [vmem:[#allocation8 + $0x144] ss:$8 sps:$4 sm:$0xff]   ;;  %v9715_v63 = vcombine.low %v176_v45, %v188_v46  ;;  %v9740_v0 = vcombine.high %v200_v57, %v212_v58  ;;  %v12842_v45 = vld [vmem:[#allocation8 + $0xe0] ss:$8 sps:$4 sm:$0xff]  }
 0x368   :  { %v13261_v46 = vld [vmem:[#allocation8 + $0x160] ss:$8 sps:$4 sm:$0xff]  }
 0x369   :  { %7112 = vmatmul.mubr.bf16.gmra.mrb[20].mxu0 %v9785_v1  ;;  %8468 = vmatmul.mubr.bf16.gmra.mrb[20].mxu1 %v9785_v1  ;;  %v12794_v1 = vld [vmem:[#allocation8 + $0x40] ss:$8 sps:$4 sm:$0xff]  }
 0x36a   :  { %7163 = vmatpush1.bf16.msra.mxu0 %v12746_v4  ;;  %8519 = vmatpush1.bf16.msra.mxu1 %v12749_v5  ;;  %v13252_v4 = vld [vmem:[#allocation8 + $0x154] ss:$8 sps:$4 sm:$0xff]  }
 0x36b   :  { %7164 = vmatprep.subr.bf16.mxu0 %v12754_v6  ;;  %8520 = vmatprep.subr.bf16.mxu1 %v12757_v7  ;;  %v224_v5 = vld [vmem:[#allocation2 + $0x358] sm:$0xff] }
 0x36c   :  { %7121 = vmatprep.mubr.bf16.mxu0 %v9810_v8  ;;  %8477 = vmatprep.mubr.bf16.mxu1 %v9810_v8  ;;  %v236_v6 = vld [vmem:[#allocation2 + $0x3b8] sm:$0xff] }
 0x36d   :  { %v12797_v7 = vld [vmem:[#allocation8 + $0x50] ss:$8 sps:$4 sm:$0xff]  }
 0x36e   :  { %7165 = vmatpush1.bf16.msra.mxu0 %v12752_v9  ;;  %8521 = vmatpush1.bf16.msra.mxu1 %v12755_v10  ;;  %v13255_v8 = vld [vmem:[#allocation8 + $0x150] ss:$8 sps:$4 sm:$0xff]   ;;  %v12802_v9 = vld [vmem:[#allocation8 + $0x64] ss:$8 sps:$4 sm:$0xff]   ;;  %v9739_v10 = vcombine.low %v200_v57, %v212_v58  ;;  %v13278_v57 = vld [vmem:[#allocation8 + $0x194] ss:$8 sps:$4 sm:$0xff]  }
 0x36f   :  { %7166 = vmatprep.subr.bf16.mxu0 %v12760_v11  ;;  %8522 = vmatprep.subr.bf16.mxu1 %v12763_v12  ;;  %v9764_v11 = vcombine.high %v224_v5, %v236_v6  ;;  %v12800_v12 = vld [vmem:[#allocation8 + $0x60] ss:$8 sps:$4 sm:$0xff]   ;;  %v13280_v58 = vld [vmem:[#allocation8 + $0x190] ss:$8 sps:$4 sm:$0xff]  }
 0x371   :  { %7122 = vmatmul.mubr.bf16.gmra.mrb[24].mxu0 %v9809_v13  ;;  %8478 = vmatmul.mubr.bf16.gmra.mrb[24].mxu1 %v9809_v13  ;;  %v12805_v13 = vld [vmem:[#allocation8 + $0x74] ss:$8 sps:$4 sm:$0xff]  }
 0x372   :  { %7167 = vmatpush1.bf16.msra.mxu0 %v12758_v16  ;;  %8523 = vmatpush1.bf16.msra.mxu1 %v12761_v17  ;;  %v12803_v16 = vld [vmem:[#allocation8 + $0x70] ss:$8 sps:$4 sm:$0xff]   ;;  %v12808_v17 = vld [vmem:[#allocation8 + $0x84] ss:$8 sps:$4 sm:$0xff]  }
 0x373   :  { %7168 = vmatprep.subr.bf16.mxu0 %v12766_v18  ;;  %8524 = vmatprep.subr.bf16.mxu1 %v12769_v19  ;;  %v9763_v18 = vcombine.low %v224_v5, %v236_v6  ;;  %v9788_v19 = vcombine.high %v248_v14, %v260_v15  ;;  %v13304_v5 = vld [vmem:[#allocation8 + $0x1d0] ss:$8 sps:$4 sm:$0xff]   ;;  %v13308_v6 = vld [vmem:[#allocation8 + $0x1e4] ss:$8 sps:$4 sm:$0xff]   ;;  %v1077_v15 = vld [vmem:[#allocation7] sm:$0xf] }
 0x374   :  { %7131 = vmatprep.mubr.bf16.mxu0 %v9834_v20  ;;  %8487 = vmatprep.mubr.bf16.mxu1 %v9834_v20  ;;  %v12806_v20 = vld [vmem:[#allocation8 + $0x80] ss:$8 sps:$4 sm:$0xff]  }
 0x376   :  { %7169 = vmatpush1.bf16.msra.mxu0 %v12764_v21  ;;  %8525 = vmatpush1.bf16.msra.mxu1 %v12767_v22  ;;  %v12814_v21 = vld [vmem:[#allocation8 + $0x94] ss:$8 sps:$4 sm:$0xff]  }
 0x377   :  { %7170 = vmatprep.subr.bf16.mxu0 %v12772_v23  ;;  %8526 = vmatprep.subr.bf16.mxu1 %v12775_v24  ;;  %v272_v22 = vld [vmem:[#allocation2 + $0x4d8] sm:$0xff] }
 0x378   :  { %v284_v23 = vld [vmem:[#allocation2 + $0x538] sm:$0xff] }
 0x379   :  { %7132 = vmatmul.mubr.bf16.gmra.mrb[28].mxu0 %v9833_v25  ;;  %8488 = vmatmul.mubr.bf16.gmra.mrb[28].mxu1 %v9833_v25  ;;  %v12812_v24 = vld [vmem:[#allocation8 + $0x90] ss:$8 sps:$4 sm:$0xff]   ;;  %v12820_v25 = vld [vmem:[#allocation8 + $0xa4] ss:$8 sps:$4 sm:$0xff]   ;;  %v9812_v27 = vcombine.high %v272_v22, %v284_v23 }
 0x37a   :  { %7171 = vmatpush1.bf16.msra.mxu0 %v12770_v28  ;;  %8527 = vmatpush1.bf16.msra.mxu1 %v12773_v29  ;;  %v12818_v28 = vld [vmem:[#allocation8 + $0xa0] ss:$8 sps:$4 sm:$0xff]   ;;  %v12826_v29 = vld [vmem:[#allocation8 + $0xb4] ss:$8 sps:$4 sm:$0xff]  }
 0x37b   :  { %7172 = vmatprep.subr.bf16.mxu0 %v12778_v30  ;;  %8528 = vmatprep.subr.bf16.mxu1 %v12781_v31  ;;  %v296_v30 = vld [vmem:[#allocation2 + $0x598] sm:$0xff] }
 0x37c   :  { %7174 = vmatprep.mubr.bf16.mxu0 %v9668_v32  ;;  %8530 = vmatprep.mubr.bf16.mxu1 %v9668_v32  ;;  %v308_v31 = vld [vmem:[#allocation2 + $0x5f8] sm:$0xff] }
 0x37d   :  { %v12824_v32 = vld [vmem:[#allocation8 + $0xb0] ss:$8 sps:$4 sm:$0xff]   ;;  %v9836_v35 = vcombine.high %v296_v30, %v308_v31 }
 0x37e   :  { %7173 = vmatpush1.bf16.msra.mxu0 %v12776_v33  ;;  %8529 = vmatpush1.bf16.msra.mxu1 %v12779_v34  ;;  %v12832_v33 = vld [vmem:[#allocation8 + $0xc4] ss:$8 sps:$4 sm:$0xff]   ;;  %v9811_v34 = vcombine.low %v272_v22, %v284_v23 }
 0x37f   :  { %9103 = vmatprep.subr.bf16.mxu0 %v12784_v37  ;;  %10750 = vmatprep.subr.bf16.mxu1 %v13223_v38  ;;  %v12838_v37 = vld [vmem:[#allocation8 + $0xd4] ss:$8 sps:$4 sm:$0xff]  }
 0x381   :  { %7175 = vmatmul.mubr.bf16.vlgmr.msra.gmra.mrb[0].mxu0 %v9667_v39  ;;  %8531 = vmatmul.mubr.bf16.vlgmr.msra.gmra.mrb[0].mxu1 %v9667_v39  ;;  %v12836_v39 = vld [vmem:[#allocation8 + $0xd0] ss:$8 sps:$4 sm:$0xff]  }
 0x382   :  { %7184 = vmatprep.mubr.bf16.mxu0 %v9692_v40  ;;  %8540 = vmatprep.mubr.bf16.mxu1 %v9692_v40  ;;  %v9835_v40 = vcombine.low %v296_v30, %v308_v31 }
 0x383   :  { %9104 = vmatpush1.bf16.msra.mxu0 %v12782_v41  ;;  %10766 = vmatpush1.bf16.msra.mxu1 %v13225_v42  ;;  %v12844_v41 = vld [vmem:[#allocation8 + $0xe4] ss:$8 sps:$4 sm:$0xff]  }
 0x384   :  { %9105 = vmatprep.subr.bf16.mxu0 %v12787_v43  ;;  %10751 = vmatprep.subr.bf16.mxu1 %v13228_v44  ;;  %v13259_v43 = vld [vmem:[#allocation8 + $0x164] ss:$8 sps:$4 sm:$0xff]  }
 0x387   :  { %9106 = vmatpush1.bf16.msra.mxu0 %v12785_v47  ;;  %10767 = vmatpush1.bf16.msra.mxu1 %v13231_v48  ;;  %v12850_v47 = vld [vmem:[#allocation8 + $0xf4] ss:$8 sps:$4 sm:$0xff]  }
 0x388   :  { %9107 = vmatprep.subr.bf16.mxu0 %v12790_v49  ;;  %10752 = vmatprep.subr.bf16.mxu1 %v13234_v50  ;;  %v13265_v49 = vld [vmem:[#allocation8 + $0x174] ss:$8 sps:$4 sm:$0xff]  }
 0x389   :  { %7185 = vmatmul.mubr.bf16.gmra.mrb[4].mxu0 %v9691_v51  ;;  %8541 = vmatmul.mubr.bf16.gmra.mrb[4].mxu1 %v9691_v51  ;;  %v12848_v51 = vld [vmem:[#allocation8 + $0xf0] ss:$8 sps:$4 sm:$0xff]  }
 0x38a   :  { %7194 = vmatprep.mubr.bf16.mxu0 %v9716_v52  ;;  %8550 = vmatprep.mubr.bf16.mxu1 %v9716_v52  ;;  %v13267_v52 = vld [vmem:[#allocation8 + $0x170] ss:$8 sps:$4 sm:$0xff]  }
 0x38b   :  { %9108 = vmatpush1.bf16.msra.mxu0 %v12788_v53  ;;  %10768 = vmatpush1.bf16.msra.mxu1 %v13237_v54  ;;  %v13272_v53 = vld [vmem:[#allocation8 + $0x184] ss:$8 sps:$4 sm:$0xff]  }
 0x38c   :  { %9109 = vmatprep.subr.bf16.mxu0 %v12793_v55  ;;  %10753 = vmatprep.subr.bf16.mxu1 %v13240_v56  ;;  %v13274_v55 = vld [vmem:[#allocation8 + $0x180] ss:$8 sps:$4 sm:$0xff]  }
 0x38f   :  { %9110 = vmatpush1.bf16.msra.mxu0 %v12791_v59  ;;  %10769 = vmatpush1.bf16.msra.mxu1 %v13243_v60  ;;  %v13284_v59 = vld [vmem:[#allocation8 + $0x1a4] ss:$8 sps:$4 sm:$0xff]  }
 0x390   :  { %9111 = vmatprep.subr.bf16.mxu0 %v12796_v61  ;;  %10754 = vmatprep.subr.bf16.mxu1 %v13246_v62  ;;  %v13286_v61 = vld [vmem:[#allocation8 + $0x1a0] ss:$8 sps:$4 sm:$0xff]  }
 0x391   :  { %7195 = vmatmul.mubr.bf16.gmra.mrb[8].mxu0 %v9715_v63  ;;  %8551 = vmatmul.mubr.bf16.gmra.mrb[8].mxu1 %v9715_v63  ;;  %v13292_v63 = vld [vmem:[#allocation8 + $0x1b0] ss:$8 sps:$4 sm:$0xff]  }
 0x392   :  { %7204 = vmatprep.mubr.bf16.mxu0 %v9740_v0  ;;  %8560 = vmatprep.mubr.bf16.mxu1 %v9740_v0  ;;  %v13296_v0 = vld [vmem:[#allocation8 + $0x1c4] ss:$8 sps:$4 sm:$0xff]  }
 0x393   :  { %9112 = vmatpush1.bf16.msra.mxu0 %v12794_v1  ;;  %10770 = vmatpush1.bf16.msra.mxu1 %v13249_v2  ;;  %v13298_v1 = vld [vmem:[#allocation8 + $0x1c0] ss:$8 sps:$4 sm:$0xff]  }
 0x394   :  { %9113 = vmatprep.subr.bf16.mxu0 %v12799_v3  ;;  %10755 = vmatprep.subr.bf16.mxu1 %v13252_v4  ;;  %v13302_v3 = vld [vmem:[#allocation8 + $0x1d4] ss:$8 sps:$4 sm:$0xff]  }
 0x397   :  { %9114 = vmatpush1.bf16.msra.mxu0 %v12797_v7  ;;  %10771 = vmatpush1.bf16.msra.mxu1 %v13255_v8  ;;  %v13310_v7 = vld [vmem:[#allocation8 + $0x1e0] ss:$8 sps:$4 sm:$0xff]  }
 0x398   :  { %9115 = vmatprep.subr.bf16.mxu0 %v12802_v9  ;;  %10756 = vmatprep.subr.bf16.mxu1 %v13259_v43  ;;  %v13314_v9 = vld [vmem:[#allocation8 + $0x1f4] ss:$8 sps:$4 sm:$0xff]  }
 0x399   :  { %7205 = vmatmul.mubr.bf16.gmra.mrb[12].mxu0 %v9739_v10  ;;  %8561 = vmatmul.mubr.bf16.gmra.mrb[12].mxu1 %v9739_v10  ;;  %v13316_v10 = vld [vmem:[#allocation8 + $0x1f0] ss:$8 sps:$4 sm:$0xff]  }
 0x39a   :  { %7214 = vmatprep.mubr.bf16.mxu0 %v9764_v11  ;;  %8570 = vmatprep.mubr.bf16.mxu1 %v9764_v11  ;;  %v1079_v11 = vlaneseq }
 0x39b   :  { %9116 = vmatpush1.bf16.msra.mxu0 %v12800_v12  ;;  %10772 = vmatpush1.bf16.msra.mxu1 %v13261_v46 }
 0x39c   :  { %9117 = vmatprep.subr.bf16.mxu0 %v12805_v13  ;;  %10757 = vmatprep.subr.bf16.mxu1 %v13265_v49  ;;  %v13320_v12 = vshrl.u32 %v1079_v11, 7 }
 0x39e   :  { %v1081_v13 = vsub.s32 0, %v13320_v12  ;;  %v1089_v14 = vsub.s32 2, %v13320_v12 }
 0x39f   :  { %9118 = vmatpush1.bf16.msra.mxu0 %v12803_v16  ;;  %10773 = vmatpush1.bf16.msra.mxu1 %v13267_v52  ;;  %v1085_v16 = vsub.s32 1, %v13320_v12 }
 0x3a0   :  { %9119 = vmatprep.subr.bf16.mxu0 %v12808_v17  ;;  %10758 = vmatprep.subr.bf16.mxu1 %v13272_v53  ;;  %v1093_v17 = vsub.s32 3, %v13320_v12 }
 0x3a1   :  { %7215 = vmatmul.mubr.bf16.gmra.mrb[16].mxu0 %v9763_v18  ;;  %8571 = vmatmul.mubr.bf16.gmra.mrb[16].mxu1 %v9763_v18  ;;  %v13328_v18 = vrot.slane %v1077_v15, %v1081_v13 }
 0x3a2   :  { %7224 = vmatprep.mubr.bf16.mxu0 %v9788_v19  ;;  %8580 = vmatprep.mubr.bf16.mxu1 %v9788_v19  ;;  %v13330_v19 = vrot.slane %v1077_v15, %v1089_v14 }
 0x3a3   :  { %9120 = vmatpush1.bf16.msra.mxu0 %v12806_v20  ;;  %10774 = vmatpush1.bf16.msra.mxu1 %v13274_v55  ;;  %v13334_v20 = vrot.slane %v1077_v15, %v1085_v16 }
 0x3a4   :  { %9121 = vmatprep.subr.bf16.mxu0 %v12814_v21  ;;  %10759 = vmatprep.subr.bf16.mxu1 %v13278_v57  ;;  %v13336_v21 = vrot.slane %v1077_v15, %v1093_v17 }
 0x3a7   :  { %9122 = vmatpush1.bf16.msra.mxu0 %v12812_v24  ;;  %10775 = vmatpush1.bf16.msra.mxu1 %v13280_v58 }
 0x3a8   :  { %9123 = vmatprep.subr.bf16.mxu0 %v12820_v25  ;;  %10760 = vmatprep.subr.bf16.mxu1 %v13284_v59 }
 0x3a9   :  { %7225 = vmatmul.mubr.bf16.gmra.mrb[20].mxu0 %v9787_v26  ;;  %8581 = vmatmul.mubr.bf16.gmra.mrb[20].mxu1 %v9787_v26 }
 0x3aa   :  { %7234 = vmatprep.mubr.bf16.mxu0 %v9812_v27  ;;  %8590 = vmatprep.mubr.bf16.mxu1 %v9812_v27 }
 0x3ab   :  { %9124 = vmatpush1.bf16.msra.mxu0 %v12818_v28  ;;  %10776 = vmatpush1.bf16.msra.mxu1 %v13286_v61 }
 0x3ac   :  { %9125 = vmatprep.subr.bf16.mxu0 %v12826_v29 }
 0x3af   :  { %9126 = vmatpush1.bf16.msra.mxu0 %v12824_v32 }
 0x3b0   :  { %9127 = vmatprep.subr.bf16.mxu0 %v12832_v33 }
 0x3b1   :  { %7235 = vmatmul.mubr.bf16.gmra.mrb[24].mxu0 %v9811_v34  ;;  %8591 = vmatmul.mubr.bf16.gmra.mrb[24].mxu1 %v9811_v34 }
 0x3b2   :  { %7244 = vmatprep.mubr.bf16.mxu0 %v9836_v35  ;;  %8600 = vmatprep.mubr.bf16.mxu1 %v9836_v35 }
 0x3b3   :  { %9128 = vmatpush1.bf16.msra.mxu0 %v12830_v36 }
 0x3b4   :  { %9129 = vmatprep.subr.bf16.mxu0 %v12838_v37 }
 0x3b7   :  { %9130 = vmatpush1.bf16.msra.mxu0 %v12836_v39 }
 0x3b8   :  { %9131 = vmatprep.subr.bf16.mxu0 %v12844_v41 }
 0x3b9   :  { %7245 = vmatmul.mubr.bf16.gmra.mrb[28].mxu0 %v9835_v40  ;;  %8601 = vmatmul.mubr.bf16.gmra.mrb[28].mxu1 %v9835_v40 }
 0x3bb   :  { %9132 = vmatpush1.bf16.msra.mxu0 %v12842_v45 }
 0x3bc   :  { %9133 = vmatprep.subr.bf16.mxu0 %v12850_v47 }
 0x3bf   :  { %9134 = vmatpush1.bf16.msra.mxu0 %v12848_v51 }
 0x3c0   :  { %9216 = vmatprep.subr.bf16.mxu0 %v13223_v38  ;;  %v13290_v38 = vld [vmem:[#allocation8 + $0x1b4] ss:$8 sps:$4 sm:$0xff]  }
 0x3c1   :  { %10761 = vmatprep.subr.bf16.mxu1 %v13290_v38 }
 0x3c2   :  { %10777 = vmatpush1.bf16.msra.mxu1 %v13292_v63 }
 0x3c3   :  { %10762 = vmatprep.subr.bf16.mxu1 %v13296_v0 }
 0x3c6   :  { %10778 = vmatpush1.bf16.msra.mxu1 %v13298_v1 }
 0x3c7   :  { %10763 = vmatprep.subr.bf16.mxu1 %v13302_v3 }
 0x3ca   :  { %10779 = vmatpush1.bf16.msra.mxu1 %v13304_v5 }
 0x3cb   :  { %10764 = vmatprep.subr.bf16.mxu1 %v13308_v6 }
 0x3ce   :  { %10780 = vmatpush1.bf16.msra.mxu1 %v13310_v7 }
 0x3cf   :  { %10765 = vmatprep.subr.bf16.mxu1 %v13314_v9 }
 0x3d2   :  { %10781 = vmatpush1.bf16.msra.mxu1 %v13316_v10 }
 0x454   :  { %v7176_v22 = vpop.f32.mrb[0].mxu0  ;;  %v8532_v23 = vpop.f32.mrb[0].mxu1 }
 0x455   :  { %v10782_v24 = vadd.f32 %v7176_v22, %v13328_v18  ;;  %v10814_v25 = vadd.f32 %v8532_v23, %v13330_v19  ;;  %v7178_v26 = vpop.f32.mrb[1].mxu0  ;;  %v8534_v27 = vpop.f32.mrb[1].mxu1 }
 0x456   :  { %v10783_v28 = vadd.f32 %v7178_v26, %v13334_v20  ;;  %v10815_v29 = vadd.f32 %v8534_v27, %v13336_v21  ;;  %v7180_v30 = vpop.f32.mrb[2].mxu0  ;;  %v8536_v31 = vpop.f32.mrb[2].mxu1 }
 0x457   :  { %v10784_v32 = vadd.f32 %v7180_v30, %v13328_v18  ;;  %v10816_v33 = vadd.f32 %v8536_v31, %v13330_v19  ;;  %v7182_v34 = vpop.f32.mrb[3].mxu0  ;;  %v8538_v35 = vpop.f32.mrb[3].mxu1  ;;  %v8611_v39 = vmax.f32 %v10782_v24, 0.0  ;;  %v8613_v40 = vmax.f32 %v10814_v25, 0.0 }
 0x458   :  { %v10785_v36 = vadd.f32 %v7182_v34, %v13334_v20  ;;  %v10817_v37 = vadd.f32 %v8538_v35, %v13336_v21  ;;  %v8612_v47 = vmax.f32 %v10783_v28, 0.0  ;;  %v8614_v51 = vmax.f32 %v10815_v29, 0.0 }
 0x459   :  { %v8615_v41 = vmax.f32 %v10784_v32, 0.0  ;;  %v8617_v45 = vmax.f32 %v10816_v33, 0.0 }
 0x45a   :  { %v8616_v11 = vmax.f32 %v10785_v36, 0.0  ;;  %v8618_v14 = vmax.f32 %v10817_v37, 0.0 }
 0x45b   :  { %v8675_v15 = vpack.c.bf16 %v8615_v41, %v8611_v39  ;;  %v13346_v17 = vpack.c.bf16 %v8617_v45, %v8613_v40 }
 0x45c   :  { %v8676_v22 = vpack.c.bf16 %v8616_v11, %v8612_v47  ;;  %v13348_v23 = vpack.c.bf16 %v8618_v14, %v8614_v51  ;;  %v7186_v26 = vpop.f32.mrb[4].mxu0  ;;  %v8542_v27 = vpop.f32.mrb[4].mxu1 }
 0x45d   :  { %v10786_v30 = vadd.f32 %v7186_v26, %v13328_v18  ;;  %v10818_v31 = vadd.f32 %v8542_v27, %v13330_v19  ;;  %v7188_v24 = vpop.f32.mrb[5].mxu0  ;;  %v8544_v25 = vpop.f32.mrb[5].mxu1 }
 0x45e   :  { %v10787_v32 = vadd.f32 %v7188_v24, %v13334_v20  ;;  %v10819_v28 = vadd.f32 %v8544_v25, %v13336_v21  ;;  %v7190_v29 = vpop.f32.mrb[6].mxu0  ;;  %v8546_v33 = vpop.f32.mrb[6].mxu1  ;;  %9135 = vmatprep.mubr.bf16.mxu0 %v8676_v22 }
 0x45f   :  { %v10788_v34 = vadd.f32 %v7190_v29, %v13328_v18  ;;  %v10820_v35 = vadd.f32 %v8546_v33, %v13330_v19  ;;  %v7192_v36 = vpop.f32.mrb[7].mxu0  ;;  %v8548_v37 = vpop.f32.mrb[7].mxu1  ;;  %9136 = vmatmul.mubr.bf16.vlgmr.msra.gmra.mrb[32].mxu0 %v8675_v15  ;;  %v8619_v41 = vmax.f32 %v10786_v30, 0.0  ;;  %v8621_v45 = vmax.f32 %v10818_v31, 0.0 }
 0x460   :  { %v10789_v39 = vadd.f32 %v7192_v36, %v13334_v20  ;;  %v10821_v40 = vadd.f32 %v8548_v37, %v13336_v21  ;;  %9217 = vmatpush1.bf16.msra.mxu0 %v13225_v42  ;;  %v8620_v11 = vmax.f32 %v10787_v32, 0.0  ;;  %v8622_v14 = vmax.f32 %v10819_v28, 0.0 }
 0x461   :  { %v8623_v47 = vmax.f32 %v10788_v34, 0.0  ;;  %v8625_v51 = vmax.f32 %v10820_v35, 0.0  ;;  %9218 = vmatprep.subr.bf16.mxu0 %v13228_v44 }
 0x462   :  { %v8624_v22 = vmax.f32 %v10789_v39, 0.0  ;;  %v8626_v26 = vmax.f32 %v10821_v40, 0.0 }
 0x463   :  { %v8679_v27 = vpack.c.bf16 %v8623_v47, %v8619_v41  ;;  %v13360_v24 = vpack.c.bf16 %v8625_v51, %v8621_v45 }
 0x464   :  { %v8680_v15 = vpack.c.bf16 %v8624_v22, %v8620_v11  ;;  %v13362_v25 = vpack.c.bf16 %v8626_v26, %v8622_v14  ;;  %v7196_v29 = vpop.f32.mrb[8].mxu0  ;;  %v8552_v33 = vpop.f32.mrb[8].mxu1  ;;  %9219 = vmatpush1.bf16.msra.mxu0 %v13231_v48 }
 0x465   :  { %v10790_v42 = vadd.f32 %v7196_v29, %v13328_v18  ;;  %v10822_v30 = vadd.f32 %v8552_v33, %v13330_v19  ;;  %v7198_v31 = vpop.f32.mrb[9].mxu0  ;;  %v8554_v44 = vpop.f32.mrb[9].mxu1  ;;  %9220 = vmatprep.subr.bf16.mxu0 %v13234_v50 }
 0x466   :  { %v10791_v32 = vadd.f32 %v7198_v31, %v13334_v20  ;;  %v10823_v28 = vadd.f32 %v8554_v44, %v13336_v21  ;;  %v7200_v34 = vpop.f32.mrb[10].mxu0  ;;  %v8556_v35 = vpop.f32.mrb[10].mxu1  ;;  %9145 = vmatprep.mubr.bf16.mxu0 %v8680_v15 }
 0x467   :  { %v10792_v36 = vadd.f32 %v7200_v34, %v13328_v18  ;;  %v10824_v37 = vadd.f32 %v8556_v35, %v13330_v19  ;;  %v7202_v48 = vpop.f32.mrb[11].mxu0  ;;  %v8558_v39 = vpop.f32.mrb[11].mxu1  ;;  %9146 = vmatmul.mubr.bf16.gmra.mrb[36].mxu0 %v8679_v27  ;;  %v8627_v50 = vmax.f32 %v10790_v42, 0.0  ;;  %v8629_v45 = vmax.f32 %v10822_v30, 0.0 }
 0x468   :  { %v10793_v40 = vadd.f32 %v7202_v48, %v13334_v20  ;;  %v10825_v41 = vadd.f32 %v8558_v39, %v13336_v21  ;;  %9221 = vmatpush1.bf16.msra.mxu0 %v13237_v54  ;;  %v8628_v11 = vmax.f32 %v10791_v32, 0.0  ;;  %v8630_v14 = vmax.f32 %v10823_v28, 0.0 }
 0x469   :  { %v8631_v47 = vmax.f32 %v10792_v36, 0.0  ;;  %v8633_v51 = vmax.f32 %v10824_v37, 0.0  ;;  %9222 = vmatprep.subr.bf16.mxu0 %v13240_v56 }
 0x46a   :  { %v8632_v22 = vmax.f32 %v10793_v40, 0.0  ;;  %v8634_v26 = vmax.f32 %v10825_v41, 0.0 }
 0x46b   :  { %v8683_v15 = vpack.c.bf16 %v8631_v47, %v8627_v50  ;;  %v13376_v29 = vpack.c.bf16 %v8633_v51, %v8629_v45 }
 0x46c   :  { %v8684_v27 = vpack.c.bf16 %v8632_v22, %v8628_v11  ;;  %v13378_v33 = vpack.c.bf16 %v8634_v26, %v8630_v14  ;;  %v7206_v31 = vpop.f32.mrb[12].mxu0  ;;  %v8562_v44 = vpop.f32.mrb[12].mxu1  ;;  %9223 = vmatpush1.bf16.msra.mxu0 %v13243_v60 }
 0x46d   :  { %v10794_v54 = vadd.f32 %v7206_v31, %v13328_v18  ;;  %v10826_v42 = vadd.f32 %v8562_v44, %v13330_v19  ;;  %v7208_v30 = vpop.f32.mrb[13].mxu0  ;;  %v8564_v56 = vpop.f32.mrb[13].mxu1  ;;  %9224 = vmatprep.subr.bf16.mxu0 %v13246_v62 }
 0x46e   :  { %v10795_v32 = vadd.f32 %v7208_v30, %v13334_v20  ;;  %v10827_v28 = vadd.f32 %v8564_v56, %v13336_v21  ;;  %v7210_v34 = vpop.f32.mrb[14].mxu0  ;;  %v8566_v35 = vpop.f32.mrb[14].mxu1  ;;  %9155 = vmatprep.mubr.bf16.mxu0 %v8684_v27 }
 0x46f   :  { %v10796_v36 = vadd.f32 %v7210_v34, %v13328_v18  ;;  %v10828_v37 = vadd.f32 %v8566_v35, %v13330_v19  ;;  %v7212_v60 = vpop.f32.mrb[15].mxu0  ;;  %v8568_v48 = vpop.f32.mrb[15].mxu1  ;;  %9156 = vmatmul.mubr.bf16.gmra.mrb[40].mxu0 %v8683_v15  ;;  %v8635_v62 = vmax.f32 %v10794_v54, 0.0  ;;  %v8637_v41 = vmax.f32 %v10826_v42, 0.0 }
 0x470   :  { %v10797_v39 = vadd.f32 %v7212_v60, %v13334_v20  ;;  %v10829_v40 = vadd.f32 %v8568_v48, %v13336_v21  ;;  %9225 = vmatpush1.bf16.msra.mxu0 %v13249_v2  ;;  %v8636_v47 = vmax.f32 %v10795_v32, 0.0  ;;  %v8638_v51 = vmax.f32 %v10827_v28, 0.0 }
 0x471   :  { %v8639_v50 = vmax.f32 %v10796_v36, 0.0  ;;  %v8641_v45 = vmax.f32 %v10828_v37, 0.0  ;;  %9226 = vmatprep.subr.bf16.mxu0 %v13252_v4 }
 0x472   :  { %v8640_v11 = vmax.f32 %v10797_v39, 0.0  ;;  %v8642_v14 = vmax.f32 %v10829_v40, 0.0 }
 0x473   :  { %v8687_v22 = vpack.c.bf16 %v8639_v50, %v8635_v62  ;;  %v13392_v26 = vpack.c.bf16 %v8641_v45, %v8637_v41 }
 0x474   :  { %v8688_v15 = vpack.c.bf16 %v8640_v11, %v8636_v47  ;;  %v13394_v27 = vpack.c.bf16 %v8642_v14, %v8638_v51  ;;  %v7216_v31 = vpop.f32.mrb[16].mxu0  ;;  %v8572_v44 = vpop.f32.mrb[16].mxu1  ;;  %9227 = vmatpush1.bf16.msra.mxu0 %v13255_v8 }
 0x475   :  { %v10798_v2 = vadd.f32 %v7216_v31, %v13328_v18  ;;  %v10830_v54 = vadd.f32 %v8572_v44, %v13330_v19  ;;  %v7218_v42 = vpop.f32.mrb[17].mxu0  ;;  %v8574_v4 = vpop.f32.mrb[17].mxu1  ;;  %9228 = vmatprep.subr.bf16.mxu0 %v13259_v43 }
 0x476   :  { %v10799_v30 = vadd.f32 %v7218_v42, %v13334_v20  ;;  %v10831_v56 = vadd.f32 %v8574_v4, %v13336_v21  ;;  %v7220_v32 = vpop.f32.mrb[18].mxu0  ;;  %v8576_v28 = vpop.f32.mrb[18].mxu1  ;;  %9165 = vmatprep.mubr.bf16.mxu0 %v8688_v15 }
 0x477   :  { %v10800_v34 = vadd.f32 %v7220_v32, %v13328_v18  ;;  %v10832_v35 = vadd.f32 %v8576_v28, %v13330_v19  ;;  %v7222_v8 = vpop.f32.mrb[19].mxu0  ;;  %v8578_v36 = vpop.f32.mrb[19].mxu1  ;;  %9166 = vmatmul.mubr.bf16.gmra.mrb[44].mxu0 %v8687_v22  ;;  %v8643_v43 = vmax.f32 %v10798_v2, 0.0  ;;  %v8645_v48 = vmax.f32 %v10830_v54, 0.0 }
 0x478   :  { %v10801_v37 = vadd.f32 %v7222_v8, %v13334_v20  ;;  %v10833_v60 = vadd.f32 %v8578_v36, %v13336_v21  ;;  %9229 = vmatpush1.bf16.msra.mxu0 %v13261_v46  ;;  %v8644_v62 = vmax.f32 %v10799_v30, 0.0  ;;  %v8646_v41 = vmax.f32 %v10831_v56, 0.0 }
 0x479   :  { %v8647_v39 = vmax.f32 %v10800_v34, 0.0  ;;  %v8649_v40 = vmax.f32 %v10832_v35, 0.0  ;;  %9230 = vmatprep.subr.bf16.mxu0 %v13265_v49 }
 0x47a   :  { %v8648_v50 = vmax.f32 %v10801_v37, 0.0  ;;  %v8650_v45 = vmax.f32 %v10833_v60, 0.0 }
 0x47b   :  { %v8691_v47 = vpack.c.bf16 %v8647_v39, %v8643_v43  ;;  %v8693_v51 = vpack.c.bf16 %v8649_v40, %v8645_v48 }
 0x47c   :  { %v8692_v11 = vpack.c.bf16 %v8648_v50, %v8644_v62  ;;  %v8694_v14 = vpack.c.bf16 %v8650_v45, %v8646_v41  ;;  %v7226_v22 = vpop.f32.mrb[20].mxu0  ;;  %v8582_v15 = vpop.f32.mrb[20].mxu1  ;;  %9231 = vmatpush1.bf16.msra.mxu0 %v13267_v52 }
 0x47d   :  { %v10802_v46 = vadd.f32 %v7226_v22, %v13328_v18  ;;  %v10834_v31 = vadd.f32 %v8582_v15, %v13330_v19  ;;  %v7228_v44 = vpop.f32.mrb[21].mxu0  ;;  %v8584_v2 = vpop.f32.mrb[21].mxu1  ;;  %9232 = vmatprep.subr.bf16.mxu0 %v13272_v53 }
 0x47e   :  { %v10803_v49 = vadd.f32 %v7228_v44, %v13334_v20  ;;  %v10835_v54 = vadd.f32 %v8584_v2, %v13336_v21  ;;  %v7230_v42 = vpop.f32.mrb[22].mxu0  ;;  %v8586_v4 = vpop.f32.mrb[22].mxu1  ;;  %9175 = vmatprep.mubr.bf16.mxu0 %v8692_v11  ;;  %9288 = vmatprep.mubr.bf16.mxu1 %v8694_v14 }
 0x47f   :  { %v10804_v30 = vadd.f32 %v7230_v42, %v13328_v18  ;;  %v10836_v52 = vadd.f32 %v8586_v4, %v13330_v19  ;;  %v7232_v56 = vpop.f32.mrb[23].mxu0  ;;  %v8588_v32 = vpop.f32.mrb[23].mxu1  ;;  %9176 = vmatmul.mubr.bf16.gmra.mrb[48].mxu0 %v8691_v47  ;;  %9289 = vmatmul.mubr.bf16.vlgmr.msra.gmra.mrb[32].mxu1 %v8693_v51  ;;  %v8651_v34 = vmax.f32 %v10802_v46, 0.0  ;;  %v8653_v35 = vmax.f32 %v10834_v31, 0.0 }
 0x480   :  { %v10805_v28 = vadd.f32 %v7232_v56, %v13334_v20  ;;  %v10837_v53 = vadd.f32 %v8588_v32, %v13336_v21  ;;  %9233 = vmatpush1.bf16.msra.mxu0 %v13274_v55  ;;  %v8652_v37 = vmax.f32 %v10803_v49, 0.0  ;;  %v8654_v60 = vmax.f32 %v10835_v54, 0.0 }
 0x481   :  { %v8655_v8 = vmax.f32 %v10804_v30, 0.0  ;;  %v8657_v36 = vmax.f32 %v10836_v52, 0.0  ;;  %9234 = vmatprep.subr.bf16.mxu0 %v13278_v57 }
 0x482   :  { %v8656_v43 = vmax.f32 %v10805_v28, 0.0  ;;  %v8658_v48 = vmax.f32 %v10837_v53, 0.0 }
 0x483   :  { %v8695_v39 = vpack.c.bf16 %v8655_v8, %v8651_v34  ;;  %v8697_v40 = vpack.c.bf16 %v8657_v36, %v8653_v35 }
 0x484   :  { %v8696_v62 = vpack.c.bf16 %v8656_v43, %v8652_v37  ;;  %v8698_v41 = vpack.c.bf16 %v8658_v48, %v8654_v60  ;;  %v7236_v50 = vpop.f32.mrb[24].mxu0  ;;  %v8592_v45 = vpop.f32.mrb[24].mxu1  ;;  %9235 = vmatpush1.bf16.msra.mxu0 %v13280_v58 }
 0x485   :  { %v10806_v55 = vadd.f32 %v7236_v50, %v13328_v18  ;;  %v10838_v47 = vadd.f32 %v8592_v45, %v13330_v19  ;;  %v7238_v51 = vpop.f32.mrb[25].mxu0  ;;  %v8594_v11 = vpop.f32.mrb[25].mxu1  ;;  %9236 = vmatprep.subr.bf16.mxu0 %v13284_v59 }
 0x486   :  { %v10807_v57 = vadd.f32 %v7238_v51, %v13334_v20  ;;  %v10839_v14 = vadd.f32 %v8594_v11, %v13336_v21  ;;  %v7240_v22 = vpop.f32.mrb[26].mxu0  ;;  %v8596_v15 = vpop.f32.mrb[26].mxu1  ;;  %9185 = vmatprep.mubr.bf16.mxu0 %v8696_v62  ;;  %9298 = vmatprep.mubr.bf16.mxu1 %v8698_v41 }
 0x487   :  { %v10808_v46 = vadd.f32 %v7240_v22, %v13328_v18  ;;  %v10840_v58 = vadd.f32 %v8596_v15, %v13330_v19  ;;  %v7242_v31 = vpop.f32.mrb[27].mxu0  ;;  %v8598_v44 = vpop.f32.mrb[27].mxu1  ;;  %9186 = vmatmul.mubr.bf16.gmra.mrb[52].mxu0 %v8695_v39  ;;  %9299 = vmatmul.mubr.bf16.gmra.mrb[36].mxu1 %v8697_v40  ;;  %v8659_v49 = vmax.f32 %v10806_v55, 0.0  ;;  %v8661_v54 = vmax.f32 %v10838_v47, 0.0 }
 0x488   :  { %v10809_v2 = vadd.f32 %v7242_v31, %v13334_v20  ;;  %v10841_v59 = vadd.f32 %v8598_v44, %v13336_v21  ;;  %9237 = vmatpush1.bf16.msra.mxu0 %v13286_v61  ;;  %v8660_v30 = vmax.f32 %v10807_v57, 0.0  ;;  %v8662_v52 = vmax.f32 %v10839_v14, 0.0 }
 0x489   :  { %v8663_v42 = vmax.f32 %v10808_v46, 0.0  ;;  %v8665_v4 = vmax.f32 %v10840_v58, 0.0  ;;  %9238 = vmatprep.subr.bf16.mxu0 %v13290_v38 }
 0x48a   :  { %v8664_v56 = vmax.f32 %v10809_v2, 0.0  ;;  %v8666_v32 = vmax.f32 %v10841_v59, 0.0 }
 0x48b   :  { %v8699_v28 = vpack.c.bf16 %v8663_v42, %v8659_v49  ;;  %v8701_v53 = vpack.c.bf16 %v8665_v4, %v8661_v54 }
 0x48c   :  { %v8700_v34 = vpack.c.bf16 %v8664_v56, %v8660_v30  ;;  %v8702_v35 = vpack.c.bf16 %v8666_v32, %v8662_v52  ;;  %v7246_v8 = vpop.f32.mrb[28].mxu0  ;;  %v8602_v36 = vpop.f32.mrb[28].mxu1  ;;  %9239 = vmatpush1.bf16.msra.mxu0 %v13292_v63 }
 0x48d   :  { %v10810_v61 = vadd.f32 %v7246_v8, %v13328_v18  ;;  %v10842_v37 = vadd.f32 %v8602_v36, %v13330_v19  ;;  %v7248_v60 = vpop.f32.mrb[29].mxu0  ;;  %v8604_v43 = vpop.f32.mrb[29].mxu1  ;;  %9240 = vmatprep.subr.bf16.mxu0 %v13296_v0 }
 0x48e   :  { %v10811_v38 = vadd.f32 %v7248_v60, %v13334_v20  ;;  %v10843_v48 = vadd.f32 %v8604_v43, %v13336_v21  ;;  %v7250_v39 = vpop.f32.mrb[30].mxu0  ;;  %v8606_v40 = vpop.f32.mrb[30].mxu1  ;;  %9195 = vmatprep.mubr.bf16.mxu0 %v8700_v34  ;;  %9308 = vmatprep.mubr.bf16.mxu1 %v8702_v35 }
 0x48f   :  { %v10812_v62 = vadd.f32 %v7250_v39, %v13328_v18  ;;  %v10844_v63 = vadd.f32 %v8606_v40, %v13330_v19  ;;  %v7252_v41 = vpop.f32.mrb[31].mxu0  ;;  %v8608_v50 = vpop.f32.mrb[31].mxu1  ;;  %9196 = vmatmul.mubr.bf16.gmra.mrb[56].mxu0 %v8699_v28  ;;  %9309 = vmatmul.mubr.bf16.gmra.mrb[40].mxu1 %v8701_v53  ;;  %v8667_v55 = vmax.f32 %v10810_v61, 0.0  ;;  %v8669_v47 = vmax.f32 %v10842_v37, 0.0 }
 0x490   :  { %v10813_v45 = vadd.f32 %v7252_v41, %v13334_v20  ;;  %v10845_v0 = vadd.f32 %v8608_v50, %v13336_v21  ;;  %9241 = vmatpush1.bf16.msra.mxu0 %v13298_v1  ;;  %v8668_v57 = vmax.f32 %v10811_v38, 0.0  ;;  %v8670_v18 = vmax.f32 %v10843_v48, 0.0  ;;  %v12878_v1 = vld [vmem:[#allocation11 + $0x40] sm:$0xff]   ;;  %v12885_v20 = vld [vmem:[#allocation11 + $0x18] sm:$0xff]  }
 0x491   :  { %v8671_v51 = vmax.f32 %v10812_v62, 0.0  ;;  %v8673_v11 = vmax.f32 %v10844_v63, 0.0  ;;  %9242 = vmatprep.subr.bf16.mxu0 %v13302_v3  ;;  %v12879_v3 = vld [vmem:[#allocation11] sm:$0xff]   ;;  %10686 = vmatprep.subr.bf16.mxu1 %v12878_v1 }
 0x492   :  { %v8672_v14 = vmax.f32 %v10813_v45, 0.0  ;;  %v8674_v19 = vmax.f32 %v10845_v0, 0.0  ;;  %10687 = vmatpush3.bf16.msra.mxu1 %v12879_v3  ;;  %v12886_v21 = vld [vmem:[#allocation11 + $0x60] sm:$0xff]  }
 0x493   :  { %v8703_v22 = vpack.c.bf16 %v8671_v51, %v8667_v55  ;;  %v8705_v15 = vpack.c.bf16 %v8673_v11, %v8669_v47 }
 0x494   :  { %v8704_v46 = vpack.c.bf16 %v8672_v14, %v8668_v57  ;;  %v8706_v58 = vpack.c.bf16 %v8674_v19, %v8670_v18  ;;  %9243 = vmatpush1.bf16.msra.mxu0 %v13304_v5  ;;  %v12880_v5 = vld [vmem:[#allocation11 + $0x48] sm:$0xff]  }
 0x495   :  { %9244 = vmatprep.subr.bf16.mxu0 %v13308_v6  ;;  %v12881_v6 = vld [vmem:[#allocation11 + $0x8] sm:$0xff]   ;;  %10688 = vmatprep.subr.bf16.mxu1 %v12880_v5 }
 0x496   :  { %9205 = vmatprep.mubr.bf16.mxu0 %v8704_v46  ;;  %9318 = vmatprep.mubr.bf16.mxu1 %v8706_v58 }
 0x497   :  { %9206 = vmatmul.mubr.bf16.gmra.mrb[60].mxu0 %v8703_v22  ;;  %9319 = vmatmul.mubr.bf16.gmra.mrb[44].mxu1 %v8705_v15 }
 0x498   :  { %9245 = vmatpush1.bf16.msra.mxu0 %v13310_v7  ;;  %9248 = vmatprep.mubr.bf16.mxu0 %v13348_v23  ;;  %v12882_v7 = vld [vmem:[#allocation11 + $0x50] sm:$0xff]   ;;  %v12888_v23 = vld [vmem:[#allocation11 + $0x68] sm:$0xff]  }
 0x499   :  { %9246 = vmatprep.subr.bf16.mxu0 %v13314_v9  ;;  %10689 = vmatpush3.bf16.msra.mxu1 %v12881_v6  ;;  %v12883_v9 = vld [vmem:[#allocation11 + $0x10] sm:$0xff]  }
 0x49a   :  { %10690 = vmatprep.subr.bf16.mxu1 %v12882_v7 }
 0x49c   :  { %9247 = vmatpush1.bf16.msra.mxu0 %v13316_v10  ;;  %v12884_v10 = vld [vmem:[#allocation11 + $0x58] sm:$0xff]  }
 0x49d   :  { %10691 = vmatpush3.bf16.msra.mxu1 %v12883_v9 }
 0x49e   :  { %10692 = vmatprep.subr.bf16.mxu1 %v12884_v10 }
 0x49f   :  { %9249 = vmatmul.mubr.bf16.vlgmr.msra.gmra.mrb[32].mxu0 %v13346_v17  ;;  %v12887_v17 = vld [vmem:[#allocation11 + $0x20] sm:$0xff]  }
 0x4a0   :  { %9258 = vmatprep.mubr.bf16.mxu0 %v13362_v25  ;;  %v12890_v25 = vld [vmem:[#allocation11 + $0x70] sm:$0xff]  }
 0x4a1   :  { %10693 = vmatpush3.bf16.msra.mxu1 %v12885_v20 }
 0x4a2   :  { %10694 = vmatprep.subr.bf16.mxu1 %v12886_v21 }
 0x4a5   :  { %10695 = vmatpush3.bf16.msra.mxu1 %v12887_v17 }
 0x4a6   :  { %10696 = vmatprep.subr.bf16.mxu1 %v12888_v23 }
 0x4a7   :  { %9259 = vmatmul.mubr.bf16.gmra.mrb[36].mxu0 %v13360_v24  ;;  %v12889_v24 = vld [vmem:[#allocation11 + $0x28] sm:$0xff]  }
 0x4a8   :  { %9268 = vmatprep.mubr.bf16.mxu0 %v13378_v33  ;;  %v12892_v33 = vld [vmem:[#allocation11 + $0x78] sm:$0xff]  }
 0x4a9   :  { %10697 = vmatpush3.bf16.msra.mxu1 %v12889_v24 }
 0x4aa   :  { %10698 = vmatprep.subr.bf16.mxu1 %v12890_v25 }
 0x4af   :  { %9269 = vmatmul.mubr.bf16.gmra.mrb[40].mxu0 %v13376_v29  ;;  %v12891_v29 = vld [vmem:[#allocation11 + $0x30] sm:$0xff]  }
 0x4b0   :  { %9278 = vmatprep.mubr.bf16.mxu0 %v13394_v27  ;;  %10699 = vmatpush3.bf16.msra.mxu1 %v12891_v29  ;;  %v8771_v27 = vld [vmem:[#allocation10] sm:$0x3] }
 0x4b1   :  { %10700 = vmatprep.subr.bf16.mxu1 %v12892_v33  ;;  %v13459_v31 = vrot.slane %v8771_v27, %v1081_v13  ;;  %v13463_v44 = vrot.slane %v8771_v27, %v1085_v16 }
 0x4b7   :  { %9279 = vmatmul.mubr.bf16.gmra.mrb[44].mxu0 %v13392_v26  ;;  %v12893_v26 = vld [vmem:[#allocation11 + $0x38] sm:$0xff]  }
 0x4b8   :  { %10701 = vmatpush3.bf16.msra.mxu1 %v12893_v26 }
 0x552   :  { %v9177_v2 = vpop.f32.mrb[48].mxu0  ;;  %v9290_v59 = vpop.f32.mrb[32].mxu1 }
 0x553   :  { %v9178_v49 = vadd.f32 %v9177_v2, %v13459_v31  ;;  %v9179_v54 = vpop.f32.mrb[49].mxu0  ;;  %v9292_v42 = vpop.f32.mrb[33].mxu1 }
 0x554   :  { %v9180_v4 = vadd.f32 %v9179_v54, %v13463_v44  ;;  %v9181_v30 = vpop.f32.mrb[50].mxu0  ;;  %v9294_v52 = vpop.f32.mrb[34].mxu1 }
 0x555   :  { %v9291_v56 = vadd.f32 %v9290_v59, %v9178_v49  ;;  %v9182_v32 = vadd.f32 %v9181_v30, %v13459_v31  ;;  %v9183_v28 = vpop.f32.mrb[51].mxu0  ;;  %v9296_v13 = vpop.f32.mrb[35].mxu1 }
 0x556   :  { %v9293_v53 = vadd.f32 %v9292_v42, %v9180_v4  ;;  %v9184_v12 = vadd.f32 %v9183_v28, %v13463_v44 }
 0x557   :  { %v9295_v16 = vadd.f32 %v9294_v52, %v9182_v32  ;;  %v9345_v35 = vmax.f32 %v9291_v56, 0.0 }
 0x558   :  { %v9297_v34 = vadd.f32 %v9296_v13, %v9184_v12  ;;  %v9346_v36 = vmax.f32 %v9293_v53, 0.0 }
 0x559   :  { %v9347_v8 = vmax.f32 %v9295_v16, 0.0 }
 0x55a   :  { %v9348_v61 = vmax.f32 %v9297_v34, 0.0  ;;  %v9187_v37 = vpop.f32.mrb[52].mxu0  ;;  %v9300_v60 = vpop.f32.mrb[36].mxu1 }
 0x55b   :  { %v13469_v43 = vpack.c.bf16 %v9347_v8, %v9345_v35  ;;  %v9188_v38 = vadd.f32 %v9187_v37, %v13459_v31  ;;  %v9189_v48 = vpop.f32.mrb[53].mxu0  ;;  %v9302_v39 = vpop.f32.mrb[37].mxu1 }
 0x55c   :  { %v13472_v40 = vpack.c.bf16 %v9348_v61, %v9346_v36  ;;  %v9190_v62 = vadd.f32 %v9189_v48, %v13463_v44  ;;  %v9191_v63 = vpop.f32.mrb[54].mxu0  ;;  %v9304_v41 = vpop.f32.mrb[38].mxu1 }
 0x55d   :  { %v9301_v50 = vadd.f32 %v9300_v60, %v9188_v38  ;;  %v9192_v45 = vadd.f32 %v9191_v63, %v13459_v31  ;;  %v9193_v0 = vpop.f32.mrb[55].mxu0  ;;  %v9306_v55 = vpop.f32.mrb[39].mxu1 }
 0x55e   :  { %v9303_v47 = vadd.f32 %v9302_v39, %v9190_v62  ;;  %v9194_v51 = vadd.f32 %v9193_v0, %v13463_v44 }
 0x55f   :  { %v9305_v11 = vadd.f32 %v9304_v41, %v9192_v45  ;;  %v9349_v18 = vmax.f32 %v9301_v50, 0.0 }
 0x560   :  { %v9307_v57 = vadd.f32 %v9306_v55, %v9194_v51  ;;  %v9350_v19 = vmax.f32 %v9303_v47, 0.0 }
 0x561   :  { %v9351_v14 = vmax.f32 %v9305_v11, 0.0 }
 0x562   :  { %v9352_v22 = vmax.f32 %v9307_v57, 0.0  ;;  %v9197_v15 = vpop.f32.mrb[56].mxu0  ;;  %v9310_v46 = vpop.f32.mrb[40].mxu1 }
 0x563   :  { %v13477_v58 = vpack.c.bf16 %v9351_v14, %v9349_v18  ;;  %v9198_v1 = vadd.f32 %v9197_v15, %v13459_v31  ;;  %v9199_v3 = vpop.f32.mrb[57].mxu0  ;;  %v9312_v5 = vpop.f32.mrb[41].mxu1 }
 0x564   :  { %v13480_v6 = vpack.c.bf16 %v9352_v22, %v9350_v19  ;;  %v9200_v7 = vadd.f32 %v9199_v3, %v13463_v44  ;;  %v9201_v9 = vpop.f32.mrb[58].mxu0  ;;  %v9314_v10 = vpop.f32.mrb[42].mxu1 }
 0x565   :  { %v9311_v20 = vadd.f32 %v9310_v46, %v9198_v1  ;;  %v9202_v21 = vadd.f32 %v9201_v9, %v13459_v31  ;;  %v9203_v17 = vpop.f32.mrb[59].mxu0  ;;  %v9316_v23 = vpop.f32.mrb[43].mxu1 }
 0x566   :  { %v9313_v24 = vadd.f32 %v9312_v5, %v9200_v7  ;;  %v9204_v25 = vadd.f32 %v9203_v17, %v13463_v44 }
 0x567   :  { %v9315_v29 = vadd.f32 %v9314_v10, %v9202_v21  ;;  %v9353_v26 = vmax.f32 %v9311_v20, 0.0 }
 0x568   :  { %v9317_v33 = vadd.f32 %v9316_v23, %v9204_v25  ;;  %v9354_v2 = vmax.f32 %v9313_v24, 0.0 }
 0x569   :  { %v9355_v27 = vmax.f32 %v9315_v29, 0.0 }
 0x56a   :  { %v9356_v59 = vmax.f32 %v9317_v33, 0.0  ;;  %v9207_v49 = vpop.f32.mrb[60].mxu0  ;;  %v9320_v54 = vpop.f32.mrb[44].mxu1 }
 0x56b   :  { %v13485_v42 = vpack.c.bf16 %v9355_v27, %v9353_v26  ;;  %v9208_v4 = vadd.f32 %v9207_v49, %v13459_v31  ;;  %v9209_v30 = vpop.f32.mrb[61].mxu0  ;;  %v9322_v52 = vpop.f32.mrb[45].mxu1 }
 0x56c   :  { %v13488_v56 = vpack.c.bf16 %v9356_v59, %v9354_v2  ;;  %v9210_v32 = vadd.f32 %v9209_v30, %v13463_v44  ;;  %v9211_v28 = vpop.f32.mrb[62].mxu0  ;;  %v9324_v13 = vpop.f32.mrb[46].mxu1 }
 0x56d   :  { %v9321_v53 = vadd.f32 %v9320_v54, %v9208_v4  ;;  %v9212_v12 = vadd.f32 %v9211_v28, %v13459_v31  ;;  %v9213_v16 = vpop.f32.mrb[63].mxu0  ;;  %v9326_v34 = vpop.f32.mrb[47].mxu1 }
 0x56e   :  { %v9323_v35 = vadd.f32 %v9322_v52, %v9210_v32  ;;  %v9214_v8 = vadd.f32 %v9213_v16, %v13463_v44 }
 0x56f   :  { %v9325_v36 = vadd.f32 %v9324_v13, %v9212_v12  ;;  %v9357_v37 = vmax.f32 %v9321_v53, 0.0 }
 0x570   :  { %v9327_v61 = vadd.f32 %v9326_v34, %v9214_v8  ;;  %v9358_v38 = vmax.f32 %v9323_v35, 0.0 }
 0x571   :  { %v9359_v60 = vmax.f32 %v9325_v36, 0.0 }
 0x572   :  { %v9360_v48 = vmax.f32 %v9327_v61, 0.0  ;;  %v9250_v39 = vpop.f32.mrb[32].mxu0 }
 0x573   :  { %v13493_v62 = vpack.c.bf16 %v9359_v60, %v9357_v37  ;;  %v10846_v63 = vadd.f32 %v9250_v39, %v13459_v31  ;;  %v9252_v41 = vpop.f32.mrb[33].mxu0 }
 0x574   :  { %v13496_v50 = vpack.c.bf16 %v9360_v48, %v9358_v38  ;;  %v10847_v45 = vadd.f32 %v9252_v41, %v13463_v44  ;;  %v9254_v0 = vpop.f32.mrb[34].mxu0 }
 0x575   :  { %v10848_v55 = vadd.f32 %v9254_v0, %v13459_v31  ;;  %v9256_v47 = vpop.f32.mrb[35].mxu0  ;;  %v9329_v11 = vmax.f32 %v10846_v63, 0.0 }
 0x576   :  { %v10849_v51 = vadd.f32 %v9256_v47, %v13463_v44  ;;  %v9330_v18 = vmax.f32 %v10847_v45, 0.0 }
 0x577   :  { %v9331_v57 = vmax.f32 %v10848_v55, 0.0 }
 0x578   :  { %v9332_v14 = vmax.f32 %v10849_v51, 0.0 }
 0x579   :  { %v9361_v19 = vpack.c.bf16 %v9331_v57, %v9329_v11 }
 0x57a   :  { %v9362_v22 = vpack.c.bf16 %v9332_v14, %v9330_v18  ;;  %v9260_v15 = vpop.f32.mrb[36].mxu0 }
 0x57b   :  { %v10850_v46 = vadd.f32 %v9260_v15, %v13459_v31  ;;  %v9262_v1 = vpop.f32.mrb[37].mxu0 }
 0x57c   :  { %v10851_v3 = vadd.f32 %v9262_v1, %v13463_v44  ;;  %v9264_v5 = vpop.f32.mrb[38].mxu0  ;;  %9544 = vmatprep.mubr.bf16.mxu1 %v9362_v22 }
 0x57d   :  { %v10852_v7 = vadd.f32 %v9264_v5, %v13459_v31  ;;  %v9266_v9 = vpop.f32.mrb[39].mxu0  ;;  %9545 = vmatmul.mubr.bf16.vlgmr.msra.gmra.mrb[48].mxu1 %v9361_v19  ;;  %v9333_v20 = vmax.f32 %v10850_v46, 0.0 }
 0x57e   :  { %v10853_v10 = vadd.f32 %v9266_v9, %v13463_v44  ;;  %v9334_v17 = vmax.f32 %v10851_v3, 0.0 }
 0x57f   :  { %v9335_v21 = vmax.f32 %v10852_v7, 0.0 }
 0x580   :  { %v9336_v23 = vmax.f32 %v10853_v10, 0.0 }
 0x581   :  { %v9363_v24 = vpack.c.bf16 %v9335_v21, %v9333_v20 }
 0x582   :  { %v9364_v25 = vpack.c.bf16 %v9336_v23, %v9334_v17  ;;  %v9270_v29 = vpop.f32.mrb[40].mxu0 }
 0x583   :  { %v10854_v33 = vadd.f32 %v9270_v29, %v13459_v31  ;;  %v9272_v26 = vpop.f32.mrb[41].mxu0 }
 0x584   :  { %v10855_v27 = vadd.f32 %v9272_v26, %v13463_v44  ;;  %v9274_v2 = vpop.f32.mrb[42].mxu0  ;;  %9552 = vmatprep.mubr.bf16.mxu1 %v9364_v25 }
 0x585   :  { %v10856_v59 = vadd.f32 %v9274_v2, %v13459_v31  ;;  %v9276_v49 = vpop.f32.mrb[43].mxu0  ;;  %9553 = vmatmul.mubr.bf16.gmra.mrb[52].mxu1 %v9363_v24  ;;  %v9337_v4 = vmax.f32 %v10854_v33, 0.0 }
 0x586   :  { %v10857_v54 = vadd.f32 %v9276_v49, %v13463_v44  ;;  %v9338_v52 = vmax.f32 %v10855_v27, 0.0 }
 0x587   :  { %v9339_v30 = vmax.f32 %v10856_v59, 0.0 }
 0x588   :  { %v9340_v32 = vmax.f32 %v10857_v54, 0.0 }
 0x589   :  { %v9365_v28 = vpack.c.bf16 %v9339_v30, %v9337_v4 }
 0x58a   :  { %v9366_v13 = vpack.c.bf16 %v9340_v32, %v9338_v52  ;;  %v9280_v53 = vpop.f32.mrb[44].mxu0 }
 0x58b   :  { %v10858_v12 = vadd.f32 %v9280_v53, %v13459_v31  ;;  %v9282_v16 = vpop.f32.mrb[45].mxu0 }
 0x58c   :  { %v10859_v34 = vadd.f32 %v9282_v16, %v13463_v44  ;;  %v9284_v35 = vpop.f32.mrb[46].mxu0  ;;  %9560 = vmatprep.mubr.bf16.mxu1 %v9366_v13 }
 0x58d   :  { %v10860_v8 = vadd.f32 %v9284_v35, %v13459_v31  ;;  %v9286_v36 = vpop.f32.mrb[47].mxu0  ;;  %9561 = vmatmul.mubr.bf16.gmra.mrb[56].mxu1 %v9365_v28  ;;  %v9341_v37 = vmax.f32 %v10858_v12, 0.0 }
 0x58e   :  { %v10861_v61 = vadd.f32 %v9286_v36, %v13463_v44  ;;  %v9342_v38 = vmax.f32 %v10859_v34, 0.0  ;;  %v13521_v44 = vld [vmem:[#allocation13] ss:$0 sm:$0xff] }
 0x58f   :  { %v9343_v60 = vmax.f32 %v10860_v8, 0.0 }
 0x590   :  { %v9344_v48 = vmax.f32 %v10861_v61, 0.0 }
 0x591   :  { %v9367_v39 = vpack.c.bf16 %v9343_v60, %v9341_v37 }
 0x592   :  { %v9368_v63 = vpack.c.bf16 %v9344_v48, %v9342_v38 }
 0x594   :  { %9568 = vmatprep.mubr.bf16.mxu1 %v9368_v63 }
 0x595   :  { %9569 = vmatmul.mubr.bf16.gmra.mrb[60].mxu1 %v9367_v39 }
 0x596   :  { %9576 = vmatprep.mubr.bf16.mxu1 %v13472_v40 }
 0x59d   :  { %9577 = vmatmul.mubr.bf16.gmra.mrb[64].mxu1 %v13469_v43 }
 0x59e   :  { %9584 = vmatprep.mubr.bf16.mxu1 %v13480_v6 }
 0x5a5   :  { %9585 = vmatmul.mubr.bf16.gmra.mrb[68].mxu1 %v13477_v58 }
 0x5a6   :  { %9592 = vmatprep.mubr.bf16.mxu1 %v13488_v56 }
 0x5ad   :  { %9593 = vmatmul.mubr.bf16.gmra.mrb[72].mxu1 %v13485_v42 }
 0x5ae   :  { %9600 = vmatprep.mubr.bf16.mxu1 %v13496_v50 }
 0x5b5   :  { %9601 = vmatmul.mubr.bf16.gmra.mrb[76].mxu1 %v13493_v62 }
 0x650   :  { %v10702_v31 = vpop.f32.mrb[48].mxu1 }
 0x651   :  { %v10703_v41 = vpop.f32.mrb[49].mxu1 }
 0x652   :  { %v10704_v45 = vadd.f32 %v10703_v41, %v10702_v31  ;;  %v10705_v40 = vpop.f32.mrb[50].mxu1 }
 0x653   :  { %v10706_v0 = vpop.f32.mrb[51].mxu1 }
 0x654   :  { %v9547_v43 = vadd.f32 %v10704_v45, %v13521_v44  ;;  %v10707_v6 = vadd.f32 %v10706_v0, %v10705_v40 }
 0x656   :  { %9609 = vst [vmem:[#allocation14] sm:$0xff] %v9547_v43  ;;  %v9550_v58 = vadd.f32 %v10707_v6, %v13521_v44 }
 0x658   :  { %9610 = vst [vmem:[#allocation14 + $0x8] sm:$0xff] %v9550_v58  ;;  %v10708_v56 = vpop.f32.mrb[52].mxu1 }
 0x659   :  { %v10709_v42 = vpop.f32.mrb[53].mxu1 }
 0x65a   :  { %v10710_v55 = vadd.f32 %v10709_v42, %v10708_v56  ;;  %v10711_v50 = vpop.f32.mrb[54].mxu1 }
 0x65b   :  { %v10712_v47 = vpop.f32.mrb[55].mxu1 }
 0x65c   :  { %v9555_v62 = vadd.f32 %v10710_v55, %v13521_v44  ;;  %v10713_v51 = vadd.f32 %v10712_v47, %v10711_v50 }
 0x65e   :  { %9611 = vst [vmem:[#allocation14 + $0x10] sm:$0xff] %v9555_v62  ;;  %v9558_v11 = vadd.f32 %v10713_v51, %v13521_v44 }
 0x660   :  { %9612 = vst [vmem:[#allocation14 + $0x18] sm:$0xff] %v9558_v11  ;;  %v10714_v57 = vpop.f32.mrb[56].mxu1 }
 0x661   :  { %v10715_v18 = vpop.f32.mrb[57].mxu1 }
 0x662   :  { %v10716_v14 = vadd.f32 %v10715_v18, %v10714_v57  ;;  %v10717_v19 = vpop.f32.mrb[58].mxu1 }
 0x663   :  { %v10718_v22 = vpop.f32.mrb[59].mxu1 }
 0x664   :  { %v9563_v15 = vadd.f32 %v10716_v14, %v13521_v44  ;;  %v10719_v46 = vadd.f32 %v10718_v22, %v10717_v19 }
 0x666   :  { %9613 = vst [vmem:[#allocation14 + $0x20] sm:$0xff] %v9563_v15  ;;  %v9566_v1 = vadd.f32 %v10719_v46, %v13521_v44 }
 0x668   :  { %9614 = vst [vmem:[#allocation14 + $0x28] sm:$0xff] %v9566_v1  ;;  %v10720_v3 = vpop.f32.mrb[60].mxu1 }
 0x669   :  { %v10721_v5 = vpop.f32.mrb[61].mxu1 }
 0x66a   :  { %v10722_v7 = vadd.f32 %v10721_v5, %v10720_v3  ;;  %v10723_v9 = vpop.f32.mrb[62].mxu1 }
 0x66b   :  { %v10724_v10 = vpop.f32.mrb[63].mxu1 }
 0x66c   :  { %v9571_v20 = vadd.f32 %v10722_v7, %v13521_v44  ;;  %v10725_v21 = vadd.f32 %v10724_v10, %v10723_v9 }
 0x66e   :  { %9615 = vst [vmem:[#allocation14 + $0x30] sm:$0xff] %v9571_v20  ;;  %v9574_v17 = vadd.f32 %v10725_v21, %v13521_v44 }
 0x670   :  { %9616 = vst [vmem:[#allocation14 + $0x38] sm:$0xff] %v9574_v17  ;;  %v10726_v23 = vpop.f32.mrb[64].mxu1 }
 0x671   :  { %v10727_v24 = vpop.f32.mrb[65].mxu1 }
 0x672   :  { %v10728_v25 = vadd.f32 %v10727_v24, %v10726_v23  ;;  %v10729_v29 = vpop.f32.mrb[66].mxu1 }
 0x673   :  { %v10730_v33 = vpop.f32.mrb[67].mxu1 }
 0x674   :  { %v9579_v26 = vadd.f32 %v10728_v25, %v13521_v44  ;;  %v10731_v27 = vadd.f32 %v10730_v33, %v10729_v29 }
 0x676   :  { %9617 = vst [vmem:[#allocation14 + $0x40] sm:$0xff] %v9579_v26  ;;  %v9582_v2 = vadd.f32 %v10731_v27, %v13521_v44 }
 0x678   :  { %9618 = vst [vmem:[#allocation14 + $0x48] sm:$0xff] %v9582_v2  ;;  %v10732_v59 = vpop.f32.mrb[68].mxu1 }
 0x679   :  { %v10733_v49 = vpop.f32.mrb[69].mxu1 }
 0x67a   :  { %v10734_v54 = vadd.f32 %v10733_v49, %v10732_v59  ;;  %v10735_v4 = vpop.f32.mrb[70].mxu1 }
 0x67b   :  { %v10736_v30 = vpop.f32.mrb[71].mxu1 }
 0x67c   :  { %v9587_v52 = vadd.f32 %v10734_v54, %v13521_v44  ;;  %v10737_v32 = vadd.f32 %v10736_v30, %v10735_v4 }
 0x67e   :  { %9619 = vst [vmem:[#allocation14 + $0x50] sm:$0xff] %v9587_v52  ;;  %v9590_v28 = vadd.f32 %v10737_v32, %v13521_v44 }
 0x680   :  { %9620 = vst [vmem:[#allocation14 + $0x58] sm:$0xff] %v9590_v28  ;;  %v10738_v13 = vpop.f32.mrb[72].mxu1 }
 0x681   :  { %v10739_v53 = vpop.f32.mrb[73].mxu1 }
 0x682   :  { %v10740_v12 = vadd.f32 %v10739_v53, %v10738_v13  ;;  %v10741_v16 = vpop.f32.mrb[74].mxu1 }
 0x683   :  { %v10742_v34 = vpop.f32.mrb[75].mxu1 }
 0x684   :  { %v9595_v35 = vadd.f32 %v10740_v12, %v13521_v44  ;;  %v10743_v8 = vadd.f32 %v10742_v34, %v10741_v16 }
 0x686   :  { %9621 = vst [vmem:[#allocation14 + $0x60] sm:$0xff] %v9595_v35  ;;  %v9598_v36 = vadd.f32 %v10743_v8, %v13521_v44 }
 0x688   :  { %9622 = vst [vmem:[#allocation14 + $0x68] sm:$0xff] %v9598_v36  ;;  %v10744_v61 = vpop.f32.mrb[76].mxu1 }
 0x689   :  { %v10745_v37 = vpop.f32.mrb[77].mxu1 }
 0x68a   :  { %v10746_v60 = vadd.f32 %v10745_v37, %v10744_v61  ;;  %v10747_v38 = vpop.f32.mrb[78].mxu1 }
 0x68b   :  { %v10748_v48 = vpop.f32.mrb[79].mxu1 }
 0x68c   :  { %v9603_v39 = vadd.f32 %v10746_v60, %v13521_v44  ;;  %v10749_v63 = vadd.f32 %v10748_v48, %v10747_v38 }
 0x68e   :  { %9623 = vst [vmem:[#allocation14 + $0x70] sm:$0xff] %v9603_v39  ;;  %v9606_v31 = vadd.f32 %v10749_v63, %v13521_v44 }
 0x690   :  { %9624 = vst [vmem:[#allocation14 + $0x78] sm:$0xff] %v9606_v31 }
 0x691   :  { %13059 = shalt.err (!%p13056_p4)
}
 0x692   :  { %s13060_s21 = scalar_lea.hbm %s13561_s7, 2048 }
 0x693   :  { %p13061_p5 = scmp.ne.s32.totalorder %s13561_s7, %s13060_s21  ;;  %p13064_p6 = scmp.lt.u32.totalorder %s13060_s21, %s13561_s7 }
 0x695   :  { %p13066_p7 = pnand %p13064_p6, %p13061_p5 }
 0x697   :  { %13069 = shalt.err (!%p13066_p7)
}
 0x698   :  { %9636 = dma.vmem_to_hbm [thread:$0]  %s9631_s18, 2048, %s13561_s7, [#allocation4], %s13084_s1, %s13084_s1, %s13085_s25  }
 0x699   :  { %13078 = dma.done.wait [#allocation4], 2048  }
 0x69a   :  { %13079 = vsyncadd [#allocation4], 4294965248 }
 0x69b   :  { %9640 = vsyncpa [#allocation3], 1 }
 0x69c   :  { %9641 = vsyncpa [#allocation6], 1 }
 0x69d   :  { %9642 = vsyncpa [#allocation9], 1 }
 0x69e   :  { %9643 = vsyncpa [#allocation12], 1 }
 0x69f   :  { %9644 = vsyncpa [#allocation4], 1 }

</bundles_post_ra>
